<compile_context>
chip_gen: v7x
topology: tpu7x:2x2x1
jax: 0.10.0
libtpu: 0.0.40
codegen_flags: <defaults>
</compile_context>

<pallas_src>
import functools

import jax
import jax.numpy as jnp
from jax import lax
from jax.experimental import pallas as pl
from jax.experimental.pallas import tpu as pltpu


def bottleneck_kernel(x_ref, w1_ref, b1_ref, w2_ref, b2_ref, w3_ref, b3_ref,
                      o_ref, pad_ref, *, H, W, accumulate_conv2):
    """One batch element per grid step.  x_ref block: (1, H*W, Cin) bf16."""
    HW = H * W
    width = pad_ref.shape[1]                       # lane-padded internal width
    base = 2 * W                                   # row where the image starts

    # ---- conv1 (1x1) + folded-BN bias + relu --------------------------------
    t1 = jnp.dot(x_ref[0], w1_ref[...], preferred_element_type=jnp.float32)
    t1 = jnp.maximum(t1 + b1_ref[...], 0.0)        # (HW, width) f32

    # ---- conv2 (3x3, stride=1, SAME) ----------------------------------------
    # Zero only the top/bottom margins (interior is fully overwritten by t1).
    # Re-zeroed every step so megacore sharding of the batch axis stays safe.
    margin = jnp.zeros((2 * W, width), pad_ref.dtype)
    pad_ref[0:2 * W, :] = margin
    pad_ref[base + HW:base + HW + 2 * W, :] = margin
    pad_ref[base:base + HW, :] = t1.astype(pad_ref.dtype)   # bf16 scratch

    # Column wrap-around masks, hoisted out of the 9-tap loop.
    col = lax.broadcasted_iota(jnp.int32, (HW, 1), 0) % W
    mask_l = col >= 1            # tap dw = -1 is valid
    mask_r = col < (W - 1)       # tap dw = +1 is valid

    def tap(k):
        dh, dw = k // 3 - 1, k % 3 - 1
        start = base + dh * W + dw                 # static python int
        win = pad_ref[start:start + HW, :]         # (HW, width) bf16
        if dw == -1:
            win = jnp.where(mask_l, win, jnp.zeros_like(win))
        elif dw == 1:
            win = jnp.where(mask_r, win, jnp.zeros_like(win))
        return win

    if accumulate_conv2:
        # v7x path: 9 MXU matmuls accumulated in f32 (MRB in-place accumulate),
        # no (HW, 9*width) im2col buffer.
        t2 = jnp.zeros((HW, width), jnp.float32)
        for k in range(9):
            t2 = t2 + jnp.dot(tap(k), w2_ref[k * width:(k + 1) * width, :],
                              preferred_element_type=jnp.float32)
    else:
        # v5e/v6e path: single deep-K im2col matmul (K = 9*width, lane-dense).
        patches = jnp.concatenate([tap(k) for k in range(9)], axis=-1)
        t2 = jnp.dot(patches, w2_ref[...], preferred_element_type=jnp.float32)
    t2 = jnp.maximum(t2 + b2_ref[...], 0.0)        # (HW, width) f32

    # ---- conv3 (1x1) + folded-BN bias ---------------------------------------
    t3 = jnp.dot(t2.astype(jnp.bfloat16), w3_ref[...],
                 preferred_element_type=jnp.float32) + b3_ref[...]

    # ---- residual add (f32) + relu  (Cout == Cin since downsample is None) --
    o_ref[0] = jnp.maximum(t3 + x_ref[0].astype(jnp.float32), 0.0
                           ).astype(o_ref.dtype)


def _default_conv2_mode():
    # v7x (MRB) prefers 9 accumulating matmuls; v5e/v6e (MRF) prefer one
    # deep-K im2col matmul.  Fall back to im2col if detection fails.
    try:
        kind = jax.devices()[0].device_kind.lower()
        if "v7" in kind:
            return "accumulate"
    except Exception:
        pass
    return "im2col"


def bottleneck_pallas_nhwc(x_nhwc, p, *, conv2_mode=None):
    """Primary entry point: x_nhwc is (N, H, W, Cin); returns (N, H, W, Cout) bf16."""
    N, H, W, Cin = x_nhwc.shape
    width = p["w1"].shape[1]            # already lane-padded to a 128 multiple
    Cout = p["w3"].shape[1]
    assert Cin == Cout, "downsample=None path needs inplanes == planes*expansion"
    HW = H * W
    if conv2_mode is None:
        conv2_mode = _default_conv2_mode()

    # bf16 HBM I/O (cast fuses with the flattening copy).
    x = x_nhwc.reshape(N, HW, Cin).astype(jnp.bfloat16)

    # VMEM budget: double-buffered I/O blocks + weights + scratch + the
    # compiler-materialized intermediates, plus headroom.
    need = (
        2 * HW * (Cin + Cout) * 2                                    # x / out (bf16)
        + 2 * 2 * (Cin * width + 9 * width * width + width * Cout)   # bf16 weights
        + 2 * 4 * (2 * width + Cout)                                 # f32 biases
        + (H + 4) * W * width * 2                                    # bf16 pad scratch
        + HW * width * (4 + 4)                                       # t1 + t2 (f32)
        + HW * 9 * width * 2                                         # im2col patches
        + HW * (Cout + Cin) * 4                                      # t3 + residual
    )
    vmem_limit = int(min(48 * 2 ** 20, need + 8 * 2 ** 20))

    kernel = functools.partial(bottleneck_kernel, H=H, W=W,
                               accumulate_conv2=(conv2_mode == "accumulate"))
    out = pl.pallas_call(
        kernel,
        out_shape=jax.ShapeDtypeStruct((N, HW, Cout), jnp.bfloat16),
        grid_spec=pltpu.PrefetchScalarGridSpec(
            num_scalar_prefetch=0,
            grid=(N,),
            in_specs=[
                pl.BlockSpec((1, HW, Cin), lambda n: (n, 0, 0)),
                pl.BlockSpec((Cin, width), lambda n: (0, 0)),
                pl.BlockSpec((1, width), lambda n: (0, 0)),
                pl.BlockSpec((9 * width, width), lambda n: (0, 0)),
                pl.BlockSpec((1, width), lambda n: (0, 0)),
                pl.BlockSpec((width, Cout), lambda n: (0, 0)),
                pl.BlockSpec((1, Cout), lambda n: (0, 0)),
            ],
            out_specs=pl.BlockSpec((1, HW, Cout), lambda n: (n, 0, 0)),
            scratch_shapes=[pltpu.VMEM(((H + 4) * W, width), jnp.bfloat16)],
        ),
        compiler_params=pltpu.CompilerParams(
            dimension_semantics=("parallel",),
            vmem_limit_bytes=vmem_limit),
    )(x, p["w1"], p["b1"], p["w2"], p["b2"], p["w3"], p["b3"])
    return out.reshape(N, H, W, Cout)


def bottleneck_pallas(x_nchw, p, *, conv2_mode=None):
    """NCHW adapter matching the PyTorch module's interface.

    In a real network keep activations NHWC (bf16) end-to-end and call
    bottleneck_pallas_nhwc directly -- these transposes read/write the whole
    activation in HBM and dominate end-to-end traffic otherwise.
    """
    x = jnp.transpose(x_nchw, (0, 2, 3, 1))
    out = bottleneck_pallas_nhwc(x, p, conv2_mode=conv2_mode)
    return jnp.transpose(out, (0, 3, 1, 2)).astype(x_nchw.dtype)


# ---------------------- parameter construction ------------------------------
def make_raw_params(key, inplanes, planes, base_width=64):
    width = int(planes * (base_width / 64.0))
    cout = planes * 4
    ks = jax.random.split(key, 6)

    def bn_params(k, c):
        k0, k1, k2, k3 = jax.random.split(k, 4)
        return (jax.random.uniform(k0, (c,), jnp.float32, 0.5, 1.5),
                jax.random.normal(k1, (c,), jnp.float32) * 0.1,
                jax.random.normal(k2, (c,), jnp.float32) * 0.1,
                jax.random.uniform(k3, (c,), jnp.float32, 0.5, 1.5))

    raw = {
        "w1": jax.random.normal(ks[0], (inplanes, width), jnp.float32) * 0.3,
        "w2": jax.random.normal(ks[1], (9, width, width), jnp.float32) * 0.2,
        "w3": jax.random.normal(ks[2], (width, cout), jnp.float32) * 0.3,
    }
    raw["g1"], raw["be1"], raw["m1"], raw["v1"] = bn_params(ks[3], width)
    raw["g2"], raw["be2"], raw["m2"], raw["v2"] = bn_params(ks[4], width)
    raw["g3"], raw["be3"], raw["m3"], raw["v3"] = bn_params(ks[5], cout)
    return raw


def prepare_kernel_params(raw, eps=1e-5, lane=128):
    """Fold BN into (weight-scale, bias), zero-pad the internal `width` axis to
    a lane multiple, and cast weights to bf16 for the MXU."""
    def fold(g, b, m, v):
        s = g / jnp.sqrt(v + eps)
        return s, b - m * s

    width = raw["w1"].shape[1]
    width_p = max(lane, ((width + lane - 1) // lane) * lane)
    pw = width_p - width

    s1, b1 = fold(raw["g1"], raw["be1"], raw["m1"], raw["v1"])
    s2, b2 = fold(raw["g2"], raw["be2"], raw["m2"], raw["v2"])
    s3, b3 = fold(raw["g3"], raw["be3"], raw["m3"], raw["v3"])

    w1 = jnp.pad(raw["w1"] * s1[None, :], ((0, 0), (0, pw)))
    w2 = jnp.pad(raw["w2"] * s2[None, None, :], ((0, 0), (0, pw), (0, pw)))
    w3 = jnp.pad(raw["w3"] * s3[None, :], ((0, pw), (0, 0)))
    b1 = jnp.pad(b1, ((0, pw),))
    b2 = jnp.pad(b2, ((0, pw),))

    return {
        "w1": w1.astype(jnp.bfloat16),
        "b1": b1.reshape(1, -1),
        "w2": w2.reshape(9 * width_p, width_p).astype(jnp.bfloat16),
        "b2": b2.reshape(1, -1),
        "w3": w3.astype(jnp.bfloat16),
        "b3": b3.reshape(1, -1),
    }


# ---------------------- pure-JAX references (for checking) ------------------
def bottleneck_ref_f32(x_nchw, raw, eps=1e-5):
    """Full-precision reference with the original BatchNorm semantics."""
    x = jnp.transpose(x_nchw, (0, 2, 3, 1))
    dn = ("NHWC", "HWIO", "NHWC")

    def bn(y, g, b, m, v):
        return (y - m) / jnp.sqrt(v + eps) * g + b

    width = raw["w1"].shape[1]
    t = lax.conv_general_dilated(x, raw["w1"][None, None], (1, 1), "VALID",
                                 dimension_numbers=dn)
    t = jax.nn.relu(bn(t, raw["g1"], raw["be1"], raw["m1"], raw["v1"]))
    w2 = raw["w2"].reshape(3, 3, width, width)
    t = lax.conv_general_dilated(t, w2, (1, 1), ((1, 1), (1, 1)),
                                 dimension_numbers=dn)
    t = jax.nn.relu(bn(t, raw["g2"], raw["be2"], raw["m2"], raw["v2"]))
    t = lax.conv_general_dilated(t, raw["w3"][None, None], (1, 1), "VALID",
                                 dimension_numbers=dn)
    t = bn(t, raw["g3"], raw["be3"], raw["m3"], raw["v3"])
    return jnp.transpose(jax.nn.relu(t + x), (0, 3, 1, 2))


def bottleneck_ref_matched(x_nchw, p):
    """Reference mirroring the kernel's folded-BN / bf16-I/O / bf16-matmul numerics."""
    x = jnp.transpose(x_nchw, (0, 2, 3, 1)).astype(jnp.bfloat16)
    dn = ("NHWC", "HWIO", "NHWC")
    width = p["w1"].shape[1]

    def conv(a, w):
        pad = "VALID" if w.shape[0] == 1 else ((1, 1), (1, 1))
        return lax.conv_general_dilated(a.astype(jnp.bfloat16), w, (1, 1), pad,
                                        dimension_numbers=dn,
                                        preferred_element_type=jnp.float32)

    t = jax.nn.relu(conv(x, p["w1"][None, None]) + p["b1"])
    w2 = p["w2"].reshape(3, 3, width, width)
    t = jax.nn.relu(conv(t, w2) + p["b2"])
    t = conv(t, p["w3"][None, None]) + p["b3"]
    out = jax.nn.relu(t + x.astype(jnp.float32)).astype(jnp.bfloat16)
    return jnp.transpose(out, (0, 3, 1, 2)).astype(x_nchw.dtype)


if __name__ == "__main__":
    # Bottleneck(inplanes=16, planes=4, stride=1, downsample=None)
    N, inplanes, planes, H, W = 2, 16, 4, 16, 16
    key = jax.random.PRNGKey(0)
    kx, kp = jax.random.split(key)
    x = jax.random.normal(kx, (N, inplanes, H, W), jnp.float32)

    raw = make_raw_params(kp, inplanes, planes)
    params = prepare_kernel_params(raw)

    out = jax.block_until_ready(bottleneck_pallas(x, params))
    assert out.shape == (N, planes * 4, H, W)

    # Tight check against a reference with matching bf16/f32 numerics.
    ref_m = jax.block_until_ready(bottleneck_ref_matched(x, params))
    assert jnp.allclose(out, ref_m, atol=3e-2, rtol=3e-2), (
        float(jnp.max(jnp.abs(out - ref_m))))

    # Loose check against the full-precision original-module semantics
    # (slack covers the intentional bf16 I/O and bf16 matmul inputs).
    ref_f = jax.block_until_ready(bottleneck_ref_f32(x, raw))
    assert jnp.allclose(out, ref_f, atol=2.5e-1, rtol=5e-2), (
        float(jnp.max(jnp.abs(out - ref_f))))

    print("KERNEL_OK")
</pallas_src>

<mosaic_0001>
module attributes {stable_mosaic.version = 11 : i64} {
  func.func @bottleneck_kernel(%arg0: i32, %arg1: memref<1x256x16xbf16, #tpu.memory_space<vmem>>, %arg2: memref<16x128xbf16, #tpu.memory_space<vmem>>, %arg3: memref<1x128xf32, #tpu.memory_space<vmem>>, %arg4: memref<1152x128xbf16, #tpu.memory_space<vmem>>, %arg5: memref<1x128xf32, #tpu.memory_space<vmem>>, %arg6: memref<128x16xbf16, #tpu.memory_space<vmem>>, %arg7: memref<1x16xf32, #tpu.memory_space<vmem>>, %arg8: memref<1x256x16xbf16, #tpu.memory_space<vmem>>, %arg9: memref<320x128xbf16, #tpu.memory_space<vmem>>) attributes {dimension_semantics = [#tpu.dimension_semantics<parallel>], iteration_bounds = array<i64: 2>, scalar_prefetch = 0 : i64, scratch_operands = 1 : i64, tpu.core_type = #tpu.core_type<tc>, window_params = [{transform_indices = @transform_0, window_bounds = array<i64: 1, 256, 16>}, {pipeline_mode = #tpu.pipeline_mode<synchronous>, transform_indices = @transform_1, window_bounds = array<i64: 16, 128>}, {pipeline_mode = #tpu.pipeline_mode<synchronous>, transform_indices = @transform_2, window_bounds = array<i64: 1, 128>}, {pipeline_mode = #tpu.pipeline_mode<synchronous>, transform_indices = @transform_3, window_bounds = array<i64: 1152, 128>}, {pipeline_mode = #tpu.pipeline_mode<synchronous>, transform_indices = @transform_4, window_bounds = array<i64: 1, 128>}, {pipeline_mode = #tpu.pipeline_mode<synchronous>, transform_indices = @transform_5, window_bounds = array<i64: 128, 16>}, {pipeline_mode = #tpu.pipeline_mode<synchronous>, transform_indices = @transform_6, window_bounds = array<i64: 1, 16>}, {transform_indices = @transform_7, window_bounds = array<i64: 1, 256, 16>}]} {
    %c0 = arith.constant 0 : index
    %c0_0 = arith.constant 0 : index
    %c0_1 = arith.constant 0 : index
    %0 = vector.load %arg1[%c0, %c0_0, %c0_1] : memref<1x256x16xbf16, #tpu.memory_space<vmem>>, vector<1x256x16xbf16>
    %1 = vector.shape_cast %0 : vector<1x256x16xbf16> to vector<256x16xbf16>
    %c0_2 = arith.constant 0 : index
    %c0_3 = arith.constant 0 : index
    %2 = vector.load %arg2[%c0_2, %c0_3] : memref<16x128xbf16, #tpu.memory_space<vmem>>, vector<16x128xbf16>
    %cst = arith.constant dense<0.000000e+00> : vector<256x128xf32>
    %3 = tpu.matmul %1, %2, %cst {dimension_numbers = #tpu.dot_dimension_numbers<[1], [0], [0], [1], [0, 0, 1, 1], [], []>} : vector<256x16xbf16>, vector<16x128xbf16>, vector<256x128xf32> -> vector<256x128xf32>
    %c0_4 = arith.constant 0 : index
    %c0_5 = arith.constant 0 : index
    %4 = vector.load %arg3[%c0_4, %c0_5] : memref<1x128xf32, #tpu.memory_space<vmem>>, vector<1x128xf32>
    %5 = vector.broadcast %4 : vector<1x128xf32> to vector<256x128xf32>
    %6 = arith.addf %3, %5 : vector<256x128xf32>
    %cst_6 = arith.constant 0.000000e+00 : f32
    %7 = vector.broadcast %cst_6 : f32 to vector<256x128xf32>
    %8 = arith.maximumf %6, %7 : vector<256x128xf32>
    %cst_7 = arith.constant 0.000000e+00 : bf16
    %9 = vector.broadcast %cst_7 : bf16 to vector<32x128xbf16>
    %c0_8 = arith.constant 0 : index
    %c0_9 = arith.constant 0 : index
    %10 = vector.load %arg9[%c0_8, %c0_9] : memref<320x128xbf16, #tpu.memory_space<vmem>>, vector<32x128xbf16>
    tpu.vector_store %arg9[%c0_8, %c0_9], %9 {strides = array<i32>} : memref<320x128xbf16, #tpu.memory_space<vmem>>, vector<32x128xbf16>,
    %c288 = arith.constant 288 : index
    %c0_10 = arith.constant 0 : index
    %11 = vector.load %arg9[%c288, %c0_10] : memref<320x128xbf16, #tpu.memory_space<vmem>>, vector<32x128xbf16>
    tpu.vector_store %arg9[%c288, %c0_10], %9 {strides = array<i32>} : memref<320x128xbf16, #tpu.memory_space<vmem>>, vector<32x128xbf16>,
    %12 = arith.truncf %8 : vector<256x128xf32> to vector<256x128xbf16>
    %c32 = arith.constant 32 : index
    %c0_11 = arith.constant 0 : index
    %13 = vector.load %arg9[%c32, %c0_11] : memref<320x128xbf16, #tpu.memory_space<vmem>>, vector<256x128xbf16>
    tpu.vector_store %arg9[%c32, %c0_11], %12 {strides = array<i32>} : memref<320x128xbf16, #tpu.memory_space<vmem>>, vector<256x128xbf16>,
    %14 = tpu.iota {dimensions = array<i32: 0>} : vector<256x1xi32>
    %c16_i32 = arith.constant 16 : i32
    %c0_i32 = arith.constant 0 : i32
    %15 = arith.cmpi eq, %c16_i32, %c0_i32 : i32
    %c1_i32 = arith.constant 1 : i32
    %16 = arith.select %15, %c1_i32, %c16_i32 : i32
    %17 = vector.broadcast %16 : i32 to vector<256x1xi32>
    %18 = arith.remsi %14, %17 : vector<256x1xi32>
    %c0_i32_12 = arith.constant 0 : i32
    %19 = vector.broadcast %c0_i32_12 : i32 to vector<256x1xi32>
    %20 = arith.cmpi ne, %18, %19 : vector<256x1xi32>
    %c0_i32_13 = arith.constant 0 : i32
    %21 = vector.broadcast %c0_i32_13 : i32 to vector<256x1xi32>
    %22 = arith.cmpi slt, %18, %21 : vector<256x1xi32>
    %c0_i32_14 = arith.constant 0 : i32
    %23 = arith.cmpi slt, %16, %c0_i32_14 : i32
    %24 = vector.broadcast %23 : i1 to vector<256x1xi1>
    %25 = vector.broadcast %24 : vector<256x1xi1> to vector<256x1xi1>
    %26 = arith.xori %22, %25 : vector<256x1xi1>
    %27 = arith.andi %26, %20 : vector<256x1xi1>
    %28 = vector.broadcast %16 : i32 to vector<256x1xi32>
    %29 = arith.addi %18, %28 : vector<256x1xi32>
    %30 = arith.select %27, %29, %18 : vector<256x1xi1>, vector<256x1xi32>
    %c1_i32_15 = arith.constant 1 : i32
    %31 = vector.broadcast %c1_i32_15 : i32 to vector<256x1xi32>
    %32 = arith.cmpi sge, %30, %31 : vector<256x1xi32>
    %c15_i32 = arith.constant 15 : i32
    %33 = vector.broadcast %c15_i32 : i32 to vector<256x1xi32>
    %34 = arith.cmpi slt, %30, %33 : vector<256x1xi32>
    %c15 = arith.constant 15 : index
    %c0_16 = arith.constant 0 : index
    %35 = vector.load %arg9[%c15, %c0_16] : memref<320x128xbf16, #tpu.memory_space<vmem>>, vector<256x128xbf16>
    %cst_17 = arith.constant 0.000000e+00 : bf16
    %36 = vector.broadcast %cst_17 : bf16 to vector<256x128xbf16>
    %37 = vector.shape_cast %32 : vector<256x1xi1> to vector<256x1xi1>
    %38 = vector.broadcast %37 : vector<256x1xi1> to vector<256x128xi1>
    %39 = arith.select %38, %35, %36 : vector<256x128xi1>, vector<256x128xbf16>
    %c16 = arith.constant 16 : index
    %c0_18 = arith.constant 0 : index
    %40 = vector.load %arg9[%c16, %c0_18] : memref<320x128xbf16, #tpu.memory_space<vmem>>, vector<256x128xbf16>
    %c17 = arith.constant 17 : index
    %c0_19 = arith.constant 0 : index
    %41 = vector.load %arg9[%c17, %c0_19] : memref<320x128xbf16, #tpu.memory_space<vmem>>, vector<256x128xbf16>
    %cst_20 = arith.constant 0.000000e+00 : bf16
    %42 = vector.broadcast %cst_20 : bf16 to vector<256x128xbf16>
    %43 = vector.shape_cast %34 : vector<256x1xi1> to vector<256x1xi1>
    %44 = vector.broadcast %43 : vector<256x1xi1> to vector<256x128xi1>
    %45 = arith.select %44, %41, %42 : vector<256x128xi1>, vector<256x128xbf16>
    %c31 = arith.constant 31 : index
    %c0_21 = arith.constant 0 : index
    %46 = vector.load %arg9[%c31, %c0_21] : memref<320x128xbf16, #tpu.memory_space<vmem>>, vector<256x128xbf16>
    %cst_22 = arith.constant 0.000000e+00 : bf16
    %47 = vector.broadcast %cst_22 : bf16 to vector<256x128xbf16>
    %48 = vector.shape_cast %32 : vector<256x1xi1> to vector<256x1xi1>
    %49 = vector.broadcast %48 : vector<256x1xi1> to vector<256x128xi1>
    %50 = arith.select %49, %46, %47 : vector<256x128xi1>, vector<256x128xbf16>
    %c32_23 = arith.constant 32 : index
    %c0_24 = arith.constant 0 : index
    %51 = vector.load %arg9[%c32_23, %c0_24] : memref<320x128xbf16, #tpu.memory_space<vmem>>, vector<256x128xbf16>
    %c33 = arith.constant 33 : index
    %c0_25 = arith.constant 0 : index
    %52 = vector.load %arg9[%c33, %c0_25] : memref<320x128xbf16, #tpu.memory_space<vmem>>, vector<256x128xbf16>
    %cst_26 = arith.constant 0.000000e+00 : bf16
    %53 = vector.broadcast %cst_26 : bf16 to vector<256x128xbf16>
    %54 = vector.shape_cast %34 : vector<256x1xi1> to vector<256x1xi1>
    %55 = vector.broadcast %54 : vector<256x1xi1> to vector<256x128xi1>
    %56 = arith.select %55, %52, %53 : vector<256x128xi1>, vector<256x128xbf16>
    %c47 = arith.constant 47 : index
    %c0_27 = arith.constant 0 : index
    %57 = vector.load %arg9[%c47, %c0_27] : memref<320x128xbf16, #tpu.memory_space<vmem>>, vector<256x128xbf16>
    %cst_28 = arith.constant 0.000000e+00 : bf16
    %58 = vector.broadcast %cst_28 : bf16 to vector<256x128xbf16>
    %59 = vector.shape_cast %32 : vector<256x1xi1> to vector<256x1xi1>
    %60 = vector.broadcast %59 : vector<256x1xi1> to vector<256x128xi1>
    %61 = arith.select %60, %57, %58 : vector<256x128xi1>, vector<256x128xbf16>
    %c48 = arith.constant 48 : index
    %c0_29 = arith.constant 0 : index
    %62 = vector.load %arg9[%c48, %c0_29] : memref<320x128xbf16, #tpu.memory_space<vmem>>, vector<256x128xbf16>
    %c49 = arith.constant 49 : index
    %c0_30 = arith.constant 0 : index
    %63 = vector.load %arg9[%c49, %c0_30] : memref<320x128xbf16, #tpu.memory_space<vmem>>, vector<256x128xbf16>
    %cst_31 = arith.constant 0.000000e+00 : bf16
    %64 = vector.broadcast %cst_31 : bf16 to vector<256x128xbf16>
    %65 = vector.shape_cast %34 : vector<256x1xi1> to vector<256x1xi1>
    %66 = vector.broadcast %65 : vector<256x1xi1> to vector<256x128xi1>
    %67 = arith.select %66, %63, %64 : vector<256x128xi1>, vector<256x128xbf16>
    %68 = tpu.concatenate %39, %40, %45, %50, %51, %56, %61, %62, %67 in 1 : vector<256x128xbf16>, vector<256x128xbf16>, vector<256x128xbf16>, vector<256x128xbf16>, vector<256x128xbf16>, vector<256x128xbf16>, vector<256x128xbf16>, vector<256x128xbf16>, vector<256x128xbf16> -> vector<256x1152xbf16>
    %c0_32 = arith.constant 0 : index
    %c0_33 = arith.constant 0 : index
    %69 = vector.load %arg4[%c0_32, %c0_33] : memref<1152x128xbf16, #tpu.memory_space<vmem>>, vector<1152x128xbf16>
    %cst_34 = arith.constant dense<0.000000e+00> : vector<256x128xf32>
    %70 = tpu.matmul %68, %69, %cst_34 {dimension_numbers = #tpu.dot_dimension_numbers<[1], [0], [0], [1], [0, 0, 1, 1], [], []>} : vector<256x1152xbf16>, vector<1152x128xbf16>, vector<256x128xf32> -> vector<256x128xf32>
    %c0_35 = arith.constant 0 : index
    %c0_36 = arith.constant 0 : index
    %71 = vector.load %arg5[%c0_35, %c0_36] : memref<1x128xf32, #tpu.memory_space<vmem>>, vector<1x128xf32>
    %72 = vector.broadcast %71 : vector<1x128xf32> to vector<256x128xf32>
    %73 = arith.addf %70, %72 : vector<256x128xf32>
    %cst_37 = arith.constant 0.000000e+00 : f32
    %74 = vector.broadcast %cst_37 : f32 to vector<256x128xf32>
    %75 = arith.maximumf %73, %74 : vector<256x128xf32>
    %76 = arith.truncf %75 : vector<256x128xf32> to vector<256x128xbf16>
    %c0_38 = arith.constant 0 : index
    %c0_39 = arith.constant 0 : index
    %77 = vector.load %arg6[%c0_38, %c0_39] : memref<128x16xbf16, #tpu.memory_space<vmem>>, vector<128x16xbf16>
    %cst_40 = arith.constant dense<0.000000e+00> : vector<256x16xf32>
    %78 = tpu.matmul %76, %77, %cst_40 {dimension_numbers = #tpu.dot_dimension_numbers<[1], [0], [0], [1], [0, 0, 1, 1], [], []>} : vector<256x128xbf16>, vector<128x16xbf16>, vector<256x16xf32> -> vector<256x16xf32>
    %c0_41 = arith.constant 0 : index
    %c0_42 = arith.constant 0 : index
    %79 = vector.load %arg7[%c0_41, %c0_42] : memref<1x16xf32, #tpu.memory_space<vmem>>, vector<1x16xf32>
    %80 = vector.broadcast %79 : vector<1x16xf32> to vector<256x16xf32>
    %81 = arith.addf %78, %80 : vector<256x16xf32>
    %c0_43 = arith.constant 0 : index
    %c0_44 = arith.constant 0 : index
    %c0_45 = arith.constant 0 : index
    %82 = vector.load %arg1[%c0_43, %c0_44, %c0_45] : memref<1x256x16xbf16, #tpu.memory_space<vmem>>, vector<1x256x16xbf16>
    %83 = vector.shape_cast %82 : vector<1x256x16xbf16> to vector<256x16xbf16>
    %84 = arith.extf %83 : vector<256x16xbf16> to vector<256x16xf32>
    %85 = arith.addf %81, %84 : vector<256x16xf32>
    %cst_46 = arith.constant 0.000000e+00 : f32
    %86 = vector.broadcast %cst_46 : f32 to vector<256x16xf32>
    %87 = arith.maximumf %85, %86 : vector<256x16xf32>
    %88 = arith.truncf %87 : vector<256x16xf32> to vector<256x16xbf16>
    %c0_47 = arith.constant 0 : index
    %c0_48 = arith.constant 0 : index
    %c0_49 = arith.constant 0 : index
    %89 = vector.load %arg8[%c0_47, %c0_48, %c0_49] : memref<1x256x16xbf16, #tpu.memory_space<vmem>>, vector<1x256x16xbf16>
    %90 = vector.shape_cast %89 : vector<1x256x16xbf16> to vector<256x16xbf16>
    %91 = vector.shape_cast %88 : vector<256x16xbf16> to vector<1x256x16xbf16>
    tpu.vector_store %arg8[%c0_47, %c0_48, %c0_49], %91 {strides = array<i32>} : memref<1x256x16xbf16, #tpu.memory_space<vmem>>, vector<1x256x16xbf16>,
    return
  }
  func.func @transform_0(%arg0: i32) -> (i32, i32, i32) {
    %c0_i32 = arith.constant 0 : i32
    %c0_i32_0 = arith.constant 0 : i32
    %c0_i32_1 = arith.constant 0 : i32
    return %arg0, %c0_i32, %c0_i32_0 : i32, i32, i32
  }
  func.func @transform_1(%arg0: i32) -> (i32, i32) {
    %c0_i32 = arith.constant 0 : i32
    %c0_i32_0 = arith.constant 0 : i32
    %c0_i32_1 = arith.constant 0 : i32
    return %c0_i32, %c0_i32_0 : i32, i32
  }
  func.func @transform_2(%arg0: i32) -> (i32, i32) {
    %c0_i32 = arith.constant 0 : i32
    %c0_i32_0 = arith.constant 0 : i32
    %c0_i32_1 = arith.constant 0 : i32
    return %c0_i32, %c0_i32_0 : i32, i32
  }
  func.func @transform_3(%arg0: i32) -> (i32, i32) {
    %c0_i32 = arith.constant 0 : i32
    %c0_i32_0 = arith.constant 0 : i32
    %c0_i32_1 = arith.constant 0 : i32
    return %c0_i32, %c0_i32_0 : i32, i32
  }
  func.func @transform_4(%arg0: i32) -> (i32, i32) {
    %c0_i32 = arith.constant 0 : i32
    %c0_i32_0 = arith.constant 0 : i32
    %c0_i32_1 = arith.constant 0 : i32
    return %c0_i32, %c0_i32_0 : i32, i32
  }
  func.func @transform_5(%arg0: i32) -> (i32, i32) {
    %c0_i32 = arith.constant 0 : i32
    %c0_i32_0 = arith.constant 0 : i32
    %c0_i32_1 = arith.constant 0 : i32
    return %c0_i32, %c0_i32_0 : i32, i32
  }
  func.func @transform_6(%arg0: i32) -> (i32, i32) {
    %c0_i32 = arith.constant 0 : i32
    %c0_i32_0 = arith.constant 0 : i32
    %c0_i32_1 = arith.constant 0 : i32
    return %c0_i32, %c0_i32_0 : i32, i32
  }
  func.func @transform_7(%arg0: i32) -> (i32, i32, i32) {
    %c0_i32 = arith.constant 0 : i32
    %c0_i32_0 = arith.constant 0 : i32
    %c0_i32_1 = arith.constant 0 : i32
    return %arg0, %c0_i32, %c0_i32_0 : i32, i32, i32
  }
}

</mosaic_0001>

<bundles_post_ra>
// kernel: tpu_custom_call.1
= control target key start
LH: loop header
LB: loop body
LE: loop exit
PB: predicated region body
PF: predicated region fallthrough
CT: control target
= control target key end

     0   :  { %12 = vsyncpa [#allocation4], 0  ;;  %s6544_s24 = smov 0   ;;  %s8523_s0 = inlined_call_operand.vmem [shape: bf16[2,256,16], index: 0, kind: input, shape index: {}]   ;;  %s8524_s1 = inlined_call_operand.vmem [shape: bf16[16,128], index: 1, kind: input, shape index: {}]   ;;  %s8525_s2 = inlined_call_operand.vmem [shape: f32[1,128], index: 2, kind: input, shape index: {}]   ;;  %s8526_s3 = inlined_call_operand.hbm [shape: bf16[1152,128], index: 3, kind: input, shape index: {}]   ;;  %s8527_s4 = inlined_call_operand.vmem [shape: f32[1,128], index: 4, kind: input, shape index: {}]   ;;  %s8528_s5 = inlined_call_operand.vmem [shape: bf16[128,16], index: 5, kind: input, shape index: {}]   ;;  %s8529_s6 = inlined_call_operand.vmem [shape: f32[1,16], index: 6, kind: input, shape index: {}]   ;;  %s8530_s7 = inlined_call_operand.vmem [shape: bf16[2,256,16], index: 7, kind: output, shape index: {}]  }
   0x1 LB: > { %s6550_s25 = sadd.s32 4294967295, %s6497_s24   ;;  %p5371_p0 = scmp.ge.s32.totalorder %s6497_s24, 1  ;;  %s6497_s24 = sphi %s6544_s24, %s18_s24  }
   0x2   : > { %p201_p1 = scmp.lt.s32.totalorder %s6497_s24, 3  ;;  %s6499_s26 = smov [#allocation3]  }
   0x3   : > { %s219_s27 = sshll.u32 %s6499_s26, 4  ;;  %p8531_p3 = scmp.eq.s32.totalorder %s6550_s25, 0  ;;  %s220_s27 = int_to_ptr.vmem [resolvable:$true] %s219_s27 }
   0x4   : > { %p6554_p2 = pnand %p5371_p0, %p201_p1  ;;  %s6459_s9 = scalar_lea.hbm %s8526_s3, 9216 }
   0x5   : > { %p6460_p6 = scmp.ne.s32.totalorder %s8526_s3, %s6459_s9  ;;  %p6466_p10 = scmp.lt.u32.totalorder %s6459_s9, %s8526_s3 }
   0x6   : > { %s8598_s28 = scalar_select %p6554_p2, 1, 0 }
   0x7   : > { %p6324_p4 = pneg %p6554_p2 }
   0x9   : > { %p6563_p5 = pnand %p8531_p3, %p6324_p4 }
   0xb   : > { %p6461_p7 = pneg %p6563_p5 }
   0xd   : > { %p6462_p8 = pnand %p6461_p7, %p6460_p6 }
   0xf   : > { %p6463_p9 = pneg %p6462_p8 }
  0x11   : > { %p6468_p11 = pnand %p6466_p10, %p6463_p9 }
  0x13   : > { %6471 = shalt.err (!%p6468_p11)
}
  0x14   : > { %s6472_s14 = scalar_lea.vmem %s220_s27, 9216  ;;  %p6480_p1 = scmp.lt.s32.totalorder %s220_s27, %s220_s27 }
  0x15   : > { %p6473_p12 = scmp.ne.s32.totalorder %s220_s27, %s6472_s14  ;;  %p6481_p4 = scmp.lt.s32.totalorder %s6472_s14, %s6472_s14 }
  0x17   : > { %p6475_p13 = pnand %p6473_p12, %p6461_p7  ;;  %p6482_p3 = por %p6481_p4, %p6480_p1 }
  0x19   : > { %p6476_p0 = pneg %p6475_p13 }
  0x1b   : > { %p6483_p2 = pnand %p6482_p3, %p6476_p0 }
  0x1d   : > { %6486 = shalt.err (!%p6483_p2)
}
  0x1e   : > { %s6500_s15 = smov 64   ;;  %s6501_s16 = smov 4  }
  0x1f   : > { %6327 = dma.hbm_to_vmem [thread:$0]  (!%p6563_p5), %s8526_s3, 9216, %s220_s27, [#allocation4], %s6500_s15, %s6500_s15, %s6501_s16  }
  0x20   : > { %p8600_p6 = scmp.ne.s32.totalorder %s8598_s28, 0 }
  0x22   : > { %252 = sbr.rel (%p8600_p6) target bundleno = 1057 (0x421), region = 48 }
  0x29   : > { %p8601_p8 = scmp.eq.s32.totalorder %s6550_s25, 0 }
  0x2b   : > { %6492 = dma.done.wait (%p8601_p8), [#allocation4], 9216   ;;  %p8602_p7 = pmov %p8601_p8 }
  0x2c   : > { %p284_p2 = scmp.lt.s32.totalorder %s6550_s25, 1  ;;  %v6343_v0 = vld [vmem:[%s8524_s1] sm:$0xff]   ;;  %vm424_vm0 = vcmask 130048   ;;  %v6364_v21 = vld [vmem:[#allocation3 + $0xc8] sm:$0xff]   ;;  %v6368_v25 = vld [vmem:[#allocation3 + $0xd0] sm:$0xff]   ;;  %v6502_v29 = vmov 0   ;;  %v702_v50 = vlaneseq }
  0x2d   : > { %6494 = vsyncadd (%p8602_p7), [#allocation4], 4294958080  ;;  %6188 = vmatprep.subr.bf16.mxu0 %v6343_v0  ;;  %6318 = vmatprep.subr.bf16.mxu1 %v6343_v0  ;;  %v6360_v13 = vld [vmem:[#allocation3 + $0xc0] sm:$0xff]   ;;  %v6366_v22 = vld [vmem:[#allocation3 + $0x88] sm:$0xff]   ;;  %667 = vst [vmem:[#allocation2 + $0x8] sm:$0xff] %v6502_v29  ;;  %vm6503_vm4 = vmmov 1  }
  0x2e   : > { %s8748_s25 = smov (!%p284_p2, %s6550_s25), 1  ;;  %6189 = vmatpush3.bf16.msra.mxu0 %v6343_v0  ;;  %6319 = vmatpush3.bf16.msra.mxu1 %v6343_v0  ;;  %v6361_v14 = vld [vmem:[#allocation3 + $0x40] sm:$0xff]   ;;  %v6365_v23 = vld [vmem:[#allocation3 + $0x48] sm:$0xff]   ;;  %v6370_v26 = vld [vmem:[#allocation3 + $0x90] sm:$0xff]   ;;  %666 = vst [vmem:[#allocation2] sm:$0xff] %v6502_v29  ;;  %v6640_v51 = vshrl.u32 %v702_v50, 7 }
  0x2f   : > { %s5562_s19 = sshll.u32 %s8748_s25, 7  ;;  %5804 = vmatprep.subr.bf16.mxu0 %v6360_v13  ;;  %v6362_v15 = vld [vmem:[#allocation3 + $0x80] sm:$0xff]   ;;  %5692 = vmatprep.subr.bf16.mxu1 %v6361_v14  ;;  %v6367_v24 = vld [vmem:[#allocation3 + $0x8] sm:$0xff]   ;;  %v6369_v27 = vld [vmem:[#allocation3 + $0x50] sm:$0xff]   ;;  %668 = vst [vmem:[#allocation2 + $0x90] sm:$0xff] %v6502_v29  ;;  %v6710_v50 = vrot.slane %v6502_v29, 1 }
  0x30   : > { %s6599_s22 = scalar_lea.vmem %s8523_s0, %s5562_s19  ;;  %v6363_v16 = vld [vmem:[#allocation3] sm:$0xff]   ;;  %v6371_v28 = vld [vmem:[#allocation3 + $0x10] sm:$0xff]   ;;  %669 = vst [vmem:[#allocation2 + $0x98] sm:$0xff] %v6502_v29  ;;  %v6372_v30 = vld [vmem:[#allocation3 + $0xd8] sm:$0xff]   ;;  %v704_v52 = vadd.s32 8, %v6640_v51  ;;  %v739_v53 = vand.u32 15, %v6640_v51  ;;  %s8414_s13 = scalar_lea.vmem %s8530_s7, %s5562_s19 }
  0x31   : > { %v6344_v1 = vld [vmem:[%s6599_s22] sm:$0xff]   ;;  %v6345_v2 = vld [vmem:[%s6599_s22 + $0x8] sm:$0xff]   ;;  %v6346_v3 = vld [vmem:[%s6599_s22 + $0x10] sm:$0xff]   ;;  %v706_v54 = vadd.s32 24, %v6640_v51  ;;  %v705_v57 = vadd.s32 16, %v6640_v51  ;;  %v707_v59 = vadd.s32 32, %v6640_v51 }
  0x32   : > { %6190 = vmatprep.mubr.msk.bf16.mxu0 %vm424_vm0, %v6344_v1  ;;  %v6347_v4 = vld [vmem:[%s6599_s22 + $0x18] sm:$0xff]   ;;  %v6348_v5 = vld [vmem:[%s6599_s22 + $0x20] sm:$0xff]   ;;  %v6353_v7 = vld [vmem:[%s6599_s22 + $0x48] sm:$0xff]   ;;  %v746_v55 = vand.u32 15, %v704_v52  ;;  %vm1119_vm1 = vcmp.ge.s32.totalorder %v739_v53, 1 }
  0x33   : > { %6191 = vmatmul.mubr.msk.bf16.vlgmr.msra.gmra.mrb[0].mxu0 %vm424_vm0, %v6345_v2  ;;  %v6352_v6 = vld [vmem:[%s6599_s22 + $0x40] sm:$0xff]   ;;  %v6354_v8 = vld [vmem:[%s6599_s22 + $0x50] sm:$0xff]   ;;  %v6355_v9 = vld [vmem:[%s6599_s22 + $0x58] sm:$0xff]   ;;  %v760_v58 = vand.u32 15, %v706_v54  ;;  %v753_v60 = vand.u32 15, %v705_v57  ;;  %v767_v61 = vand.u32 15, %v707_v59 }
  0x34   : > { %6194 = vmatprep.mubr.msk.bf16.mxu0 %vm424_vm0, %v6346_v3  ;;  %6206 = vmatprep.mubr.msk.bf16.mxu1 %vm424_vm0, %v6352_v6  ;;  %v6349_v10 = vld [vmem:[%s6599_s22 + $0x28] sm:$0xff]   ;;  %v6356_v11 = vld [vmem:[%s6599_s22 + $0x60] sm:$0xff]   ;;  %v6350_v12 = vld [vmem:[%s6599_s22 + $0x30] sm:$0xff]   ;;  %vm1152_vm2 = vcmp.lt.s32.totalorder %v746_v55, 15  ;;  %vm8593_vm14 = vsmask.f32 7424 }
  0x35   : > { %6207 = vmatmul.mubr.msk.bf16.vlgmr.msra.gmra.mrb[0].mxu1 %vm424_vm0, %v6353_v7  ;;  %5805 = vmatpush3.bf16.msra.mxu0 %v6362_v15  ;;  %v6357_v17 = vld [vmem:[%s6599_s22 + $0x68] sm:$0xff]   ;;  %v6358_v18 = vld [vmem:[%s6599_s22 + $0x70] sm:$0xff]   ;;  %v6351_v19 = vld [vmem:[%s6599_s22 + $0x38] sm:$0xff]   ;;  %vm1154_vm7 = vcmp.lt.s32.totalorder %v760_v58, 15  ;;  %vm1121_vm8 = vcmp.ge.s32.totalorder %v753_v60, 1  ;;  %vm1123_vm11 = vcmp.ge.s32.totalorder %v767_v61, 1 }
  0x36   : > { %6210 = vmatprep.mubr.msk.bf16.mxu1 %vm424_vm0, %v6354_v8  ;;  %5693 = vmatpush3.bf16.msra.mxu1 %v6363_v16  ;;  %v6359_v20 = vld [vmem:[%s6599_s22 + $0x78] sm:$0xff]   ;;  %v6376_v34 = vld [vmem:[#allocation3 + $0xe0] sm:$0xff]   ;;  %v6380_v38 = vld [vmem:[#allocation3 + $0xe8] sm:$0xff]   ;;  %v713_v55 = vadd.s32 80, %v6640_v51 }
  0x37   : > { %5806 = vmatprep.subr.bf16.mxu0 %v6364_v21  ;;  %5694 = vmatprep.subr.bf16.mxu1 %v6365_v23  ;;  %v6374_v31 = vld [vmem:[#allocation3 + $0x98] sm:$0xff]   ;;  %v6378_v35 = vld [vmem:[#allocation3 + $0xa0] sm:$0xff]   ;;  %v6382_v39 = vld [vmem:[#allocation3 + $0xa8] sm:$0xff]  }
  0x38   : > { %v6373_v32 = vld [vmem:[#allocation3 + $0x58] sm:$0xff]   ;;  %v6377_v36 = vld [vmem:[#allocation3 + $0x60] sm:$0xff]   ;;  %v6381_v40 = vld [vmem:[#allocation3 + $0x68] sm:$0xff]  }
  0x39   : > { %5807 = vmatpush3.bf16.msra.mxu0 %v6366_v22  ;;  %v6375_v33 = vld [vmem:[#allocation3 + $0x18] sm:$0xff]   ;;  %v6379_v37 = vld [vmem:[#allocation3 + $0x20] sm:$0xff]   ;;  %v6383_v41 = vld [vmem:[#allocation3 + $0x28] sm:$0xff]  }
  0x3a   : > { %5695 = vmatpush3.bf16.msra.mxu1 %v6367_v24  ;;  %5808 = vmatprep.subr.bf16.mxu0 %v6368_v25  ;;  %v6384_v42 = vld [vmem:[#allocation3 + $0xf0] sm:$0xff]   ;;  %v6388_v46 = vld [vmem:[#allocation3 + $0xf8] sm:$0xff]   ;;  %v6392_v56 = vld [vmem:[#allocation3 + $0x140] sm:$0xff]  }
  0x3b   : > { %6195 = vmatmul.mubr.msk.bf16.gmra.mrb[4].mxu0 %vm424_vm0, %v6347_v4  ;;  %5696 = vmatprep.subr.bf16.mxu1 %v6369_v27  ;;  %v6386_v43 = vld [vmem:[#allocation3 + $0xb0] sm:$0xff]   ;;  %v6390_v47 = vld [vmem:[#allocation3 + $0xb8] sm:$0xff]   ;;  %vm1264_vm3 = vmpackc.low %vm1119_vm1, %vm1119_vm1  ;;  %v708_v4 = vadd.s32 40, %v6640_v51 }
  0x3c   : > { %6198 = vmatprep.mubr.msk.bf16.mxu0 %vm424_vm0, %v6348_v5  ;;  %v6385_v44 = vld [vmem:[#allocation3 + $0x70] sm:$0xff]   ;;  %v6389_v48 = vld [vmem:[#allocation3 + $0x78] sm:$0xff]   ;;  %vm1265_vm5 = vmpackc.low %vm6503_vm4, %vm6503_vm4  ;;  %v1296_v62 = vsel %vm1264_vm3, 65537, %v6502_v29 }
  0x3d   : > { %6211 = vmatmul.mubr.msk.bf16.gmra.mrb[4].mxu1 %vm424_vm0, %v6355_v9  ;;  %5809 = vmatpush3.bf16.msra.mxu0 %v6370_v26  ;;  %v6387_v45 = vld [vmem:[#allocation3 + $0x30] sm:$0xff]   ;;  %v6391_v49 = vld [vmem:[#allocation3 + $0x38] sm:$0xff]   ;;  %vm1604_vm6 = vmpackc.low %vm1152_vm2, %vm1152_vm2  ;;  %v6649_v63 = vsel %vm1265_vm5, 65537, %v6502_v29  ;;  %vm1715_vm2 = vsmask.f32 256 }
  0x3e   : > { %6214 = vmatprep.mubr.msk.bf16.mxu1 %vm424_vm0, %v6356_v11  ;;  %5697 = vmatpush3.bf16.msra.mxu1 %v6371_v28  ;;  %v1636_v0 = vsel %vm1604_vm6, 65537, %v6502_v29  ;;  %vm1606_vm9 = vmpackc.low %vm1154_vm7, %vm1154_vm7  ;;  %v5414_v1 = vcombine.low %v1296_v62, %v6649_v63  ;;  %v709_v11 = vadd.s32 48, %v6640_v51  ;;  %v1183_v52 = vld [vmem:[#allocation2] sm:$0x80] }
  0x3f   : > { %5810 = vmatprep.subr.bf16.mxu0 %v6372_v30  ;;  %5698 = vmatprep.subr.bf16.mxu1 %v6373_v32  ;;  %vm1266_vm10 = vmpackc.low %vm1121_vm8, %vm1121_vm8  ;;  %v5430_v2 = vcombine.low %v6649_v63, %v1636_v0  ;;  %v1638_v3 = vsel %vm1606_vm9, 65537, %v6502_v29  ;;  %v711_v30 = vadd.s32 64, %v6640_v51  ;;  %v1877_v32 = vld [vmem:[#allocation2 + $0x8] sm:$0x80] }
  0x40   : > { %v1298_v5 = vsel %vm1266_vm10, 65537, %v6502_v29  ;;  %v1378_v6 = vshll.u32 %v5414_v1, 16  ;;  %v5431_v7 = vcombine.low %v6649_v63, %v1638_v3  ;;  %vm1268_vm12 = vmpackc.low %vm1123_vm11, %vm1123_vm11  ;;  %v781_v21 = vand.u32 15, %v709_v11 }
  0x41   : > { %5811 = vmatpush3.bf16.msra.mxu0 %v6374_v31  ;;  %v1717_v8 = vshrl.u32 %v5430_v2, 16  ;;  %v5415_v9 = vcombine.low %v1298_v5, %v6649_v63  ;;  %v1300_v13 = vsel %vm1268_vm12, 65537, %v6502_v29  ;;  %v1720_v16 = vshll.u32 %v5430_v2, 16 }
  0x42   : > { %5699 = vmatpush3.bf16.msra.mxu1 %v6375_v33  ;;  %5812 = vmatprep.subr.bf16.mxu0 %v6376_v34  ;;  %v6661_v14 = vrot.slane %v1378_v6, 1  ;;  %v5416_v22 = vcombine.low %v1300_v13, %v6649_v63  ;;  %v1727_v26 = vshll.u32 %v5431_v7, 16  ;;  %vm6679_vm1 = vcmp.ge.s32.totalorder %v781_v21, 1 }
  0x43   : > { %6199 = vmatmul.mubr.msk.bf16.gmra.mrb[8].mxu0 %vm424_vm0, %v6349_v10  ;;  %5700 = vmatprep.subr.bf16.mxu1 %v6377_v36  ;;  %v774_v10 = vand.u32 15, %v708_v4  ;;  %v1719_v15 = vrot.slane %v1717_v8, 7  ;;  %v1389_v27 = vshrl.u32 %v5415_v9, 16  ;;  %v712_v34 = vadd.s32 72, %v6640_v51  ;;  %vm1270_vm4 = vmpackc.low %vm6679_vm1, %vm6679_vm1 }
  0x44   : > { %6202 = vmatprep.mubr.msk.bf16.mxu0 %vm424_vm0, %v6350_v12  ;;  %v1381_v12 = vshrl.u32 %v5414_v1, 16  ;;  %8603 = vst [vmem:[#allocation6_spill] sm:$0xff] %v6661_v14  ;;  %v1397_v53 = vshrl.u32 %v5416_v22, 16  ;;  %v715_v1 = vadd.s32 96, %v6640_v51  ;;  %v809_v4 = vand.u32 15, %v713_v55 }
  0x45   : > { %6215 = vmatmul.mubr.msk.bf16.gmra.mrb[8].mxu1 %vm424_vm0, %v6357_v17  ;;  %5813 = vmatpush3.bf16.msra.mxu0 %v6378_v35  ;;  %v1724_v17 = vshrl.u32 %v5431_v7, 16  ;;  %vm6664_vm13 = vcmp.lt.s32.totalorder %v774_v10, 15  ;;  %v6670_v24 = vor.u32 %v1720_v16, %v1719_v15  ;;  %v1393_v35 = vshll.u32 %v5416_v22, 16 }
  0x46   : > { %6218 = vmatprep.mubr.msk.bf16.mxu1 %vm424_vm0, %v6358_v18  ;;  %5701 = vmatpush3.bf16.msra.mxu1 %v6379_v37  ;;  %v710_v18 = vadd.s32 56, %v6640_v51  ;;  %v1383_v23 = vor.u32 %v1381_v12, %v6661_v14  ;;  %vm1608_vm15 = vmpackc.low %vm6664_vm13, %vm6664_vm13  ;;  %v716_v5 = vadd.s32 104, %v6640_v51  ;;  %v2437_v6 = vshrl.u32 %v6710_v50, 16 }
  0x47   : > { %5814 = vmatprep.subr.bf16.mxu0 %v6380_v38  ;;  %5702 = vmatprep.subr.bf16.mxu1 %v6381_v40  ;;  %8606 = vst [vmem:[#allocation7_spill] sm:$0xff] %v6670_v24  ;;  %v6672_v25 = vrot.slane %v1724_v17, 7  ;;  %vm1843_vm3 = vcmp.ne.s16.totalorder %v6670_v24, 0  ;;  %v1640_v38 = vsel %vm1608_vm15, 65537, %v6502_v29  ;;  %v717_v8 = vadd.s32 112, %v6640_v51 }
  0x48   : > { %v788_v28 = vand.u32 15, %v710_v18  ;;  %v718_v12 = vadd.s32 120, %v6640_v51  ;;  %v823_v17 = vand.u32 15, %v715_v1  ;;  %vm6751_vm13 = vcmp.ge.s32.totalorder %v809_v4, 1 }
  0x49   : > { %5815 = vmatpush3.bf16.msra.mxu0 %v6382_v39  ;;  %v1729_v37 = vor.u32 %v1727_v26, %v6672_v25  ;;  %v6757_v21 = vrot.slane %v6502_v29, 7  ;;  %vm1274_vm1 = vmpackc.low %vm6751_vm13, %vm6751_vm13  ;;  %v722_v1 = vadd.s32 152, %v6640_v51 }
  0x4a   : > { %5703 = vmatpush3.bf16.msra.mxu1 %v6383_v41  ;;  %5816 = vmatprep.subr.bf16.mxu0 %v6384_v42  ;;  %vm6695_vm5 = vcmp.lt.s32.totalorder %v788_v28, 15  ;;  %v795_v41 = vand.u32 15, %v711_v30  ;;  %v844_v30 = vand.u32 15, %v718_v12 }
  0x4b   : > { %6203 = vmatmul.mubr.msk.bf16.gmra.mrb[12].mxu0 %vm424_vm0, %v6351_v19  ;;  %5704 = vmatprep.subr.bf16.mxu1 %v6385_v44  ;;  %v1385_v19 = vshll.u32 %v5415_v9, 16  ;;  %v1395_v44 = vrot.slane %v1393_v35, 1  ;;  %vm1610_vm7 = vmpackc.low %vm6695_vm5, %vm6695_vm5 }
  0x4c   : > { %vm6712_vm8 = vcmp.ge.s32.totalorder %v795_v41, 1  ;;  %v1642_v60 = vsel %vm1610_vm7, 65537, %v6502_v29 }
  0x4d   : > { %6219 = vmatmul.mubr.msk.bf16.gmra.mrb[12].mxu1 %vm424_vm0, %v6359_v20  ;;  %5817 = vmatpush3.bf16.msra.mxu0 %v6386_v43  ;;  %v1387_v31 = vrot.slane %v1385_v19, 1  ;;  %vm1504_vm0 = vcmp.ne.s16.totalorder %v6661_v14, 0  ;;  %v802_v43 = vand.u32 15, %v712_v34  ;;  %vm1272_vm10 = vmpackc.low %vm6712_vm8, %vm6712_vm8  ;;  %v1399_v3 = vor.u32 %v1397_v53, %v1395_v44 }
  0x4e   : > { %5705 = vmatpush3.bf16.msra.mxu1 %v6387_v45  ;;  %5818 = vmatprep.subr.bf16.mxu0 %v6388_v46  ;;  %v1879_v39 = vsel %vm1504_vm0, %v1877_v32, 0  ;;  %v5432_v45 = vcombine.low %v6649_v63, %v1640_v38  ;;  %v1521_v62 = vsel %vm1504_vm0, %v1183_v52, 0  ;;  %v5433_v7 = vcombine.low %v6649_v63, %v1642_v60 }
  0x4f   : > { %5706 = vmatprep.subr.bf16.mxu1 %v6389_v48  ;;  %v6685_v36 = vsel %vm8593_vm14, %v1383_v23, %v1387_v31  ;;  %v1391_v42 = vor.u32 %v1389_v27, %v1387_v31  ;;  %v2449_v46 = vshrl.u32 %v1879_v39, 16  ;;  %v1302_v48 = vsel %vm1270_vm4, 65537, %v6502_v29 }
  0x50   : > { %8609 = vst [vmem:[#allocation8_spill] sm:$0xff] %v6685_v36  ;;  %vm1505_vm6 = vcmp.ne.s16.totalorder %v6685_v36, 0  ;;  %vm6720_vm9 = vcmp.lt.s32.totalorder %v802_v43, 15  ;;  %v1732_v58 = vshrl.u32 %v5432_v45, 16  ;;  %v6725_v59 = vcombine.low %v1302_v48, %v6649_v63 }
  0x51   : > { %5819 = vmatpush3.bf16.msra.mxu0 %v6390_v47  ;;  %v6702_v47 = vsel %vm1715_vm2, %v1719_v15, %v1729_v37  ;;  %v6728_v61 = vrot.slane %v2449_v46, 7  ;;  %v1735_v2 = vshll.u32 %v5432_v45, 16  ;;  %vm1612_vm11 = vmpackc.low %vm6720_vm9, %vm6720_vm9  ;;  %v2413_v9 = vshrl.u32 %v1521_v62, 16 }
  0x52   : > { %5707 = vmatpush3.bf16.msra.mxu1 %v6391_v49  ;;  %8612 = vst [vmem:[#allocation9_spill] sm:$0xff] %v6702_v47  ;;  %v714_v49 = vadd.s32 88, %v6640_v51  ;;  %v1734_v10 = vrot.slane %v1732_v58, 7  ;;  %v1401_v11 = vshll.u32 %v6725_v59, 16  ;;  %v1304_v13 = vsel %vm1272_vm10, 65537, %v6502_v29 }
  0x53   : > { %5916 = vmatprep.subr.bf16.mxu1 %v6392_v56  ;;  %v6718_v56 = vsel %vm8593_vm14, %v1391_v42, %v1395_v44  ;;  %v1644_v15 = vsel %vm1612_vm11, 65537, %v6502_v29  ;;  %v830_v19 = vand.u32 15, %v716_v5  ;;  %v720_v20 = vadd.s32 136, %v6640_v51 }
  0x54   : > { %8615 = vst [vmem:[#allocation10_spill] sm:$0xff] %v6718_v56  ;;  %v816_v0 = vand.u32 15, %v714_v49  ;;  %v1740_v22 = vshrl.u32 %v5433_v7, 16  ;;  %v837_v23 = vand.u32 15, %v717_v8  ;;  %v1737_v26 = vor.u32 %v1735_v2, %v1734_v10 }
  0x55   : > { %v6760_v27 = vcombine.low %v1304_v13, %v6649_v63  ;;  %v5434_v28 = vcombine.low %v6649_v63, %v1644_v15  ;;  %v2415_v31 = vrot.slane %v2413_v9, 7  ;;  %v1403_v32 = vrot.slane %v1401_v11, 1 }
  0x56   : > { %vm6747_vm12 = vcmp.lt.s32.totalorder %v816_v0, 15  ;;  %vm6769_vm4 = vcmp.ge.s32.totalorder %v823_v17, 1  ;;  %v719_v34 = vadd.s32 128, %v6640_v51  ;;  %v1743_v35 = vshll.u32 %v5433_v7, 16 }
  0x57   : > { %vm1614_vm15 = vmpackc.low %vm6747_vm12, %vm6747_vm12  ;;  %vm6774_vm5 = vcmp.lt.s32.totalorder %v830_v19, 15  ;;  %v858_v38 = vand.u32 15, %v720_v20  ;;  %v6778_v39 = vrot.slane %v1740_v22, 7  ;;  %v1405_v40 = vshrl.u32 %v6725_v59, 16 }
  0x58   : > { %v1646_v41 = vsel %vm1614_vm15, 65537, %v6502_v29  ;;  %vm6782_vm7 = vcmp.ge.s32.totalorder %v837_v23, 1  ;;  %v1409_v43 = vshll.u32 %v6760_v27, 16  ;;  %v1748_v44 = vshrl.u32 %v5434_v28, 16  ;;  %vm1276_vm8 = vmpackc.low %vm6769_vm4, %vm6769_vm4 }
  0x59   : > { %v1306_v45 = vsel %vm1274_vm1, 65537, %v6502_v29  ;;  %vm6791_vm9 = vcmp.lt.s32.totalorder %v844_v30, 15  ;;  %v6795_v48 = vrot.slane %v2437_v6, 7  ;;  %vm1616_vm10 = vmpackc.low %vm6774_vm5, %vm6774_vm5  ;;  %v851_v49 = vand.u32 15, %v719_v34  ;;  %v6400_v34 = vld [vmem:[#allocation3 + $0x1c0] sm:$0xff]  }
  0x5a   : > { %v721_v52 = vadd.s32 144, %v6640_v51  ;;  %v6803_v53 = vsel %vm1715_vm2, %v6672_v25, %v1737_v26  ;;  %v5435_v54 = vcombine.low %v6649_v63, %v1646_v41  ;;  %vm1278_vm11 = vmpackc.low %vm6782_vm7, %vm6782_vm7  ;;  %vm6809_vm12 = vcmp.lt.s32.totalorder %v858_v38, 15  ;;  %6028 = vmatprep.subr.bf16.mxu0 %v6400_v34 }
  0x5b   : > { %8630 = vst [vmem:[#allocation11_spill] sm:$0xff] %v6803_v53  ;;  %v6815_v57 = vsel %vm1715_vm2, %v2415_v31, %v6757_v21  ;;  %v6818_v58 = vsel %vm8593_vm14, %v1399_v3, %v1403_v32  ;;  %v1745_v25 = vor.u32 %v1743_v35, %v6778_v39  ;;  %v6822_v59 = vcombine.low %v1306_v45, %v6649_v63  ;;  %vm1618_vm13 = vmpackc.low %vm6791_vm9, %vm6791_vm9 }
  0x5c   : > { %v1407_v60 = vor.u32 %v1405_v40, %v1403_v32  ;;  %v1411_v62 = vrot.slane %v1409_v43, 1  ;;  %v6827_v0 = vrot.slane %v1748_v44, 7  ;;  %v1648_v2 = vsel %vm1616_vm10, 65537, %v6502_v29  ;;  %vm1620_vm1 = vmpackc.low %vm6809_vm12, %vm6809_vm12 }
  0x5d   : > { %v1310_v3 = vsel %vm1278_vm11, 65537, %v6502_v29  ;;  %vm6837_vm15 = vcmp.ge.s32.totalorder %v851_v49, 1  ;;  %v865_v5 = vand.u32 15, %v721_v52  ;;  %v1751_v6 = vshll.u32 %v5434_v28, 16 }
  0x5e   : > { %v1756_v7 = vshrl.u32 %v5435_v54, 16  ;;  %v1308_v8 = vsel %vm1276_vm8, 65537, %v6502_v29  ;;  %v1650_v9 = vsel %vm1618_vm13, 65537, %v6502_v29  ;;  %v6852_v11 = vsel %vm1715_vm2, %v1734_v10, %v1745_v25  ;;  %vm1280_vm4 = vmpackc.low %vm6837_vm15, %vm6837_vm15 }
  0x5f   : > { %8635 = vst [vmem:[#allocation12_spill] sm:$0xff] %v6852_v11  ;;  %v1413_v12 = vshrl.u32 %v6760_v27, 16  ;;  %v1417_v13 = vshll.u32 %v6822_v59, 16  ;;  %v724_v15 = vadd.s32 168, %v6640_v51  ;;  %v5436_v16 = vcombine.low %v6649_v63, %v1648_v2 }
  0x60   : > { %v6859_v17 = vcombine.low %v1310_v3, %v6649_v63  ;;  %v1652_v18 = vsel %vm1620_vm1, 65537, %v6502_v29  ;;  %v872_v19 = vand.u32 15, %v722_v1  ;;  %v6866_v10 = vsel %vm8593_vm14, %v1407_v60, %v1411_v62 }
  0x61   : > { %8636 = vst [vmem:[#allocation13_spill] sm:$0xff] %v6866_v10  ;;  %v5420_v20 = vcombine.low %v1308_v8, %v6649_v63  ;;  %v5437_v22 = vcombine.low %v6649_v63, %v1650_v9  ;;  %vm6870_vm5 = vcmp.ge.s32.totalorder %v865_v5, 1  ;;  %v6875_v26 = vor.u32 %v1751_v6, %v6827_v0 }
  0x62   : > { %v6877_v27 = vrot.slane %v1756_v7, 7  ;;  %v1759_v28 = vshll.u32 %v5435_v54, 16  ;;  %v723_v30 = vadd.s32 160, %v6640_v51  ;;  %v6880_v31 = vor.u32 %v1413_v12, %v1411_v62  ;;  %vm1282_vm7 = vmpackc.low %vm6870_vm5, %vm6870_vm5 }
  0x63   : > { %v1312_v32 = vsel %vm1280_vm4, 65537, %v6502_v29  ;;  %v5438_v33 = vcombine.low %v6649_v63, %v1652_v18  ;;  %v886_v35 = vand.u32 15, %v724_v15  ;;  %v1419_v37 = vrot.slane %v1417_v13, 1 }
  0x64   : > { %v1764_v38 = vshrl.u32 %v5436_v16, 16  ;;  %v1433_v40 = vshll.u32 %v6859_v17, 16  ;;  %vm6888_vm8 = vcmp.lt.s32.totalorder %v872_v19, 15  ;;  %v1421_v42 = vshrl.u32 %v6822_v59, 16 }
  0x65   : > { %v1425_v43 = vshll.u32 %v5420_v20, 16  ;;  %v1772_v44 = vshrl.u32 %v5437_v22, 16  ;;  %v725_v45 = vadd.s32 176, %v6640_v51  ;;  %v1761_v46 = vor.u32 %v1759_v28, %v6877_v27  ;;  %vm1622_vm9 = vmpackc.low %vm6888_vm8, %vm6888_vm8 }
  0x66   : > { %v1767_v49 = vshll.u32 %v5436_v16, 16  ;;  %v5422_v52 = vcombine.low %v1312_v32, %v6649_v63  ;;  %v879_v54 = vand.u32 15, %v723_v30  ;;  %v1780_v55 = vshrl.u32 %v5438_v33, 16 }
  0x67   : > { %v1314_v25 = vsel %vm1282_vm7, 65537, %v6502_v29  ;;  %vm6900_vm10 = vcmp.lt.s32.totalorder %v886_v35, 15  ;;  %v726_v60 = vadd.s32 184, %v6640_v51  ;;  %v1766_v62 = vrot.slane %v1764_v38, 7 }
  0x68   : > { %v1429_v1 = vshrl.u32 %v5420_v20, 16  ;;  %v1435_v2 = vrot.slane %v1433_v40, 1  ;;  %v728_v3 = vadd.s32 200, %v6640_v51  ;;  %v1774_v4 = vrot.slane %v1772_v44, 7  ;;  %vm1624_vm12 = vmpackc.low %vm6900_vm10, %vm6900_vm10 }
  0x69   : > { %v1775_v5 = vshll.u32 %v5437_v22, 16  ;;  %v1437_v6 = vshrl.u32 %v6859_v17, 16  ;;  %v893_v7 = vand.u32 15, %v725_v45  ;;  %v1441_v8 = vshll.u32 %v5422_v52, 16 }
  0x6a   : > { %v6908_v9 = vcombine.low %v1314_v25, %v6649_v63  ;;  %v1654_v12 = vsel %vm1622_vm9, 65537, %v6502_v29  ;;  %vm6911_vm11 = vcmp.ge.s32.totalorder %v879_v54, 1  ;;  %v6918_v15 = vrot.slane %v1780_v55, 7 }
  0x6b   : > { %v1783_v16 = vshll.u32 %v5438_v33, 16  ;;  %v900_v18 = vand.u32 15, %v726_v60  ;;  %v727_v17 = vadd.s32 192, %v6640_v51  ;;  %v1423_v19 = vor.u32 %v1421_v42, %v1419_v37  ;;  %vm1284_vm13 = vmpackc.low %vm6911_vm11, %vm6911_vm11 }
  0x6c   : > { %v1427_v20 = vrot.slane %v1425_v43, 1  ;;  %v1445_v22 = vshrl.u32 %v5422_v52, 16  ;;  %v914_v23 = vand.u32 15, %v728_v3  ;;  %v1769_v28 = vor.u32 %v1767_v49, %v1766_v62 }
  0x6d   : > { %v5439_v30 = vcombine.low %v6649_v63, %v1654_v12  ;;  %v1656_v32 = vsel %vm1624_vm12, 65537, %v6502_v29  ;;  %vm6926_vm15 = vcmp.ge.s32.totalorder %v893_v7, 1  ;;  %v1777_v35 = vor.u32 %v1775_v5, %v1774_v4 }
  0x6e   : > { %v1431_v33 = vor.u32 %v1429_v1, %v1427_v20  ;;  %v1443_v38 = vrot.slane %v1441_v8, 1  ;;  %v1449_v40 = vshll.u32 %v6908_v9, 16  ;;  %v1439_v41 = vor.u32 %v1437_v6, %v1435_v2  ;;  %vm1286_vm4 = vmpackc.low %vm6926_vm15, %vm6926_vm15 }
  0x6f   : > { %v1785_v42 = vor.u32 %v1783_v16, %v6918_v15  ;;  %vm6932_vm1 = vcmp.lt.s32.totalorder %v900_v18, 15  ;;  %v907_v44 = vand.u32 15, %v727_v17  ;;  %v1316_v49 = vsel %vm1284_vm13, 65537, %v6502_v29 }
  0x70   : > { %v1447_v45 = vor.u32 %v1445_v22, %v1443_v38  ;;  %v6938_v52 = vcombine.low %v6649_v63, %v1656_v32  ;;  %vm6943_vm5 = vcmp.lt.s32.totalorder %v914_v23, 15  ;;  %v6950_v55 = vsel %vm1715_vm2, %v6778_v39, %v6875_v26  ;;  %vm1626_vm7 = vmpackc.low %vm6932_vm1, %vm6932_vm1 }
  0x71   : > { %v6954_v25 = vsel %vm8593_vm14, %v6880_v31, %v1419_v37  ;;  %v6958_v59 = vsel %vm1715_vm2, %v6827_v0, %v1761_v46  ;;  %v1788_v60 = vshrl.u32 %v5439_v30, 16  ;;  %v6961_v1 = vsel %vm8593_vm14, %v1423_v19, %v1427_v20  ;;  %vm1628_vm9 = vmpackc.low %vm6943_vm5, %vm6943_vm5 }
  0x72   : > { %v6965_v3 = vsel %vm1715_vm2, %v6877_v27, %v1769_v28  ;;  %v6968_v5 = vsel %vm8593_vm14, %v1431_v33, %v1435_v2  ;;  %v1451_v39 = vrot.slane %v1449_v40, 1  ;;  %v6974_v26 = vsel %vm1715_vm2, %v1766_v62, %v1777_v35 }
  0x73   : > { %v6977_v0 = vcombine.low %v1316_v49, %v6649_v63  ;;  %v1318_v31 = vsel %vm1286_vm4, 65537, %v6502_v29  ;;  %vm6980_vm8 = vcmp.ge.s32.totalorder %v907_v44, 1  ;;  %v6988_v27 = vsel %vm8593_vm14, %v1439_v41, %v1443_v38 }
  0x74   : > { %v6991_v46 = vsel %vm1715_vm2, %v1774_v4, %v1785_v42  ;;  %v6994_v62 = vsel %vm8593_vm14, %v1447_v45, %v1451_v39  ;;  %v1796_v2 = vshrl.u32 %v6938_v52, 16  ;;  %v6997_v6 = vrot.slane %v1788_v60, 7  ;;  %vm1288_vm10 = vmpackc.low %vm6980_vm8, %vm6980_vm8 }
  0x75   : > { %v1791_v7 = vshll.u32 %v5439_v30, 16  ;;  %v1658_v8 = vsel %vm1626_vm7, 65537, %v6502_v29  ;;  %v729_v12 = vadd.s32 208, %v6640_v51  ;;  %v7002_v13 = vcombine.low %v1318_v31, %v6649_v63 }
  0x76   : > { %v1660_v4 = vsel %vm1628_vm9, 65537, %v6502_v29  ;;  %v730_v16 = vadd.s32 216, %v6640_v51  ;;  %v732_v18 = vadd.s32 232, %v6640_v51  ;;  %v1453_v17 = vshrl.u32 %v6908_v9, 16 }
  0x77   : > { %v1457_v19 = vshll.u32 %v6977_v0, 16  ;;  %v921_v20 = vand.u32 15, %v729_v12  ;;  %v731_v22 = vadd.s32 224, %v6640_v51  ;;  %v7013_v23 = vrot.slane %v1796_v2, 7 }
  0x78   : > { %v5441_v28 = vcombine.low %v6649_v63, %v1658_v8  ;;  %v928_v30 = vand.u32 15, %v730_v16  ;;  %v942_v32 = vand.u32 15, %v732_v18  ;;  %v1320_v34 = vsel %vm1288_vm10, 65537, %v6502_v29 }
  0x79   : > { %v5442_v33 = vcombine.low %v6649_v63, %v1660_v4  ;;  %vm1145_vm11 = vcmp.ge.s32.totalorder %v921_v20, 1  ;;  %v935_v35 = vand.u32 15, %v731_v22  ;;  %v1799_v38 = vshll.u32 %v6938_v52, 16 }
  0x7a   : > { %v1465_v9 = vshll.u32 %v7002_v13, 16  ;;  %vm1290_vm12 = vmpackc.low %vm1145_vm11, %vm1145_vm11  ;;  %vm1178_vm13 = vcmp.lt.s32.totalorder %v928_v30, 15  ;;  %vm7020_vm15 = vcmp.lt.s32.totalorder %v942_v32, 15  ;;  %v1793_v41 = vor.u32 %v1791_v7, %v6997_v6 }
  0x7b   : > { %v1455_v42 = vor.u32 %v1453_v17, %v1451_v39  ;;  %v1322_v43 = vsel %vm1290_vm12, 65537, %v6502_v29  ;;  %vm1630_vm1 = vmpackc.low %vm1178_vm13, %vm1178_vm13  ;;  %vm1147_vm4 = vcmp.ge.s32.totalorder %v935_v35, 1  ;;  %v1804_v44 = vshrl.u32 %v5441_v28, 16 }
  0x7c   : > { %v5426_v45 = vcombine.low %v1320_v34, %v6649_v63  ;;  %v5427_v49 = vcombine.low %v1322_v43, %v6649_v63  ;;  %v1662_v52 = vsel %vm1630_vm1, 65537, %v6502_v29  ;;  %vm1292_vm5 = vmpackc.low %vm1147_vm4, %vm1147_vm4  ;;  %v1459_v54 = vrot.slane %v1457_v19, 1 }
  0x7d   : > { %v1812_v60 = vshrl.u32 %v5442_v33, 16  ;;  %v5443_v31 = vcombine.low %v6649_v63, %v1662_v52  ;;  %v1324_v37 = vsel %vm1292_vm5, 65537, %v6502_v29  ;;  %vm1632_vm7 = vmpackc.low %vm7020_vm15, %vm7020_vm15  ;;  %v1801_v39 = vor.u32 %v1799_v38, %v7013_v23 }
  0x7e   : > { %v1461_v2 = vshrl.u32 %v6977_v0, 16  ;;  %v1467_v7 = vrot.slane %v1465_v9, 1  ;;  %v1664_v8 = vsel %vm1632_vm7, 65537, %v6502_v29  ;;  %v1481_v12 = vshll.u32 %v5427_v49, 16 }
  0x7f   : > { %v1820_v4 = vshrl.u32 %v5443_v31, 16  ;;  %v7038_v16 = vcombine.low %v1324_v37, %v6649_v63  ;;  %v5444_v18 = vcombine.low %v6649_v63, %v1664_v8  ;;  %v1806_v17 = vrot.slane %v1804_v44, 7 }
  0x80   : > { %v1807_v19 = vshll.u32 %v5441_v28, 16  ;;  %v1469_v20 = vshrl.u32 %v7002_v13, 16  ;;  %v1473_v22 = vshll.u32 %v5426_v45, 16  ;;  %v7044_v30 = vsel %vm1715_vm2, %v6918_v15, %v1793_v41  ;;  %v7053_v13 = vld [vmem:[%s8525_s2] ss:$0 sm:$0xff] }
  0x81   : > { %8655 = vst [vmem:[#allocation14_spill] sm:$0xff] %v7038_v16  ;;  %8656 = vst [vmem:[#allocation15_spill] sm:$0xff] %v7044_v30  ;;  %v1814_v0 = vrot.slane %v1812_v60, 7  ;;  %v1815_v32 = vshll.u32 %v5442_v33, 16  ;;  %v1828_v34 = vshrl.u32 %v5444_v18, 16  ;;  %v1463_v35 = vor.u32 %v1461_v2, %v1459_v54 }
  0x82   : > { %v1477_v38 = vshrl.u32 %v5426_v45, 16  ;;  %v1822_v9 = vrot.slane %v1820_v4, 7  ;;  %v1823_v40 = vshll.u32 %v5443_v31, 16  ;;  %v7047_v43 = vsel %vm8593_vm14, %v1455_v42, %v1459_v54 }
  0x83   : > { %8657 = vst [vmem:[#allocation16_spill] sm:$0xff] %v7047_v43  ;;  %v1483_v52 = vrot.slane %v1481_v12, 1  ;;  %v1485_v44 = vshrl.u32 %v5427_v49, 16  ;;  %v1489_v28 = vshll.u32 %v7038_v16, 16  ;;  %vm1506_vm8 = vcmp.ne.s16.totalorder %v6718_v56, 0  ;;  %v6396_v56 = vld [vmem:[#allocation3 + $0x150] sm:$0xff]  }
  0x84   : > { %vm1845_vm9 = vcmp.ne.s16.totalorder %v6803_v53, 0  ;;  %v7059_v15 = vsel %vm1715_vm2, %v6997_v6, %v1801_v39  ;;  %v1809_v33 = vor.u32 %v1807_v19, %v1806_v17  ;;  %v1471_v41 = vor.u32 %v1469_v20, %v1467_v7 }
  0x85   : > { %8658 = vst [vmem:[#allocation17_spill] sm:$0xff] %v7059_v15  ;;  %v1475_v42 = vrot.slane %v1473_v22, 1  ;;  %vm1844_vm10 = vcmp.ne.s16.totalorder %v6702_v47, 0  ;;  %v1817_v45 = vor.u32 %v1815_v32, %v1814_v0  ;;  %v7062_v49 = vrot.slane %v1828_v34, 7  ;;  %v6408_v15 = vld [vmem:[#allocation3 + $0x1d0] sm:$0xff]  }
  0x86   : > { %v1831_v54 = vshll.u32 %v5444_v18, 16  ;;  %v734_v60 = vadd.s32 248, %v6640_v51  ;;  %v7066_v37 = vsel %vm8593_vm14, %v1463_v35, %v1467_v7  ;;  %v1825_v8 = vor.u32 %v1823_v40, %v1822_v9 }
  0x87   : > { %8659 = vst [vmem:[#allocation18_spill] sm:$0xff] %v7062_v49  ;;  %8660 = vst [vmem:[#allocation19_spill] sm:$0xff] %v7066_v37  ;;  %v1479_v2 = vor.u32 %v1477_v38, %v1475_v42  ;;  %v733_v6 = vadd.s32 240, %v6640_v51  ;;  %v1487_v4 = vor.u32 %v1485_v44, %v1483_v52  ;;  %v7070_v19 = vrot.slane %v1489_v28, 1 }
  0x88   : > { %v956_v20 = vand.u32 15, %v734_v60  ;;  %v7075_v32 = vsel %vm1715_vm2, %v7013_v23, %v1809_v33  ;;  %v7078_v7 = vsel %vm8593_vm14, %v1471_v41, %v1475_v42  ;;  %vm2111_vm11 = vcmask 1046528  }
  0x89   : > { %8661 = vst [vmem:[#allocation20_spill] sm:$0xff] %v7070_v19  ;;  %8662 = vst [vmem:[#allocation21_spill] sm:$0xff] %v7075_v32  ;;  %v949_v34 = vand.u32 15, %v733_v6  ;;  %v7082_v38 = vsel %vm1715_vm2, %v1806_v17, %v1817_v45  ;;  %v1833_v40 = vor.u32 %v1831_v54, %v7062_v49  ;;  %v7087_v28 = vsel %vm8593_vm14, %v1479_v2, %v1483_v52 }
  0x8a   : > { %8663 = vst [vmem:[#allocation22_spill] sm:$0xff] %v7078_v7  ;;  %8664 = vst [vmem:[#allocation23_spill] sm:$0xff] %v7082_v38  ;;  %vm1182_vm12 = vcmp.lt.s32.totalorder %v956_v20, 15  ;;  %v7090_v23 = vsel %vm1715_vm2, %v1814_v0, %v1825_v8  ;;  %v7094_v42 = vsel %vm8593_vm14, %v1487_v4, %v7070_v19  ;;  %vm8566_vm4 = vcmp.ne.s16.totalorder %v6818_v58, 0 }
  0x8b   : > { %8665 = vst [vmem:[#allocation24_spill] sm:$0xff] %v7087_v28  ;;  %8666 = vst [vmem:[#allocation25_spill] sm:$0xff] %v7090_v23  ;;  %vm1149_vm13 = vcmp.ge.s32.totalorder %v949_v34, 1  ;;  %v7107_v6 = vsel %vm1715_vm2, %v1822_v9, %v1833_v40  ;;  %vm1846_vm5 = vcmp.ne.s16.totalorder %v6852_v11, 0  ;;  %vm8565_vm7 = vcmp.ne.s16.totalorder %v6866_v10, 0  ;;  %v6410_v10 = vld [vmem:[#allocation3 + $0x170] sm:$0xff]  }
  0x8c   : > { %vm1634_vm15 = vmpackc.low %vm1182_vm12, %vm1182_vm12  ;;  %8667 = vst [vmem:[#allocation26_spill] sm:$0xff] %v7094_v42  ;;  %vm8575_vm12 = vcmp.ne.s16.totalorder %v6950_v55, 0 }
  0x8d   : > { %vm1294_vm1 = vmpackc.low %vm1149_vm13, %vm1149_vm13  ;;  %v1666_v17 = vsel %vm1634_vm15, 65537, %v6502_v29  ;;  %8669 = vst [vmem:[#allocation28_spill] sm:$0xff] %v7107_v6  ;;  %vm8567_vm13 = vcmp.ne.s16.totalorder %v6954_v25, 0  ;;  %vm8570_vm15 = vcmp.ne.s16.totalorder %v6958_v59, 0 }
  0x8e   : > { %v1326_v52 = vsel %vm1294_vm1, 65537, %v6502_v29  ;;  %vm8569_vm1 = vcmp.ne.s16.totalorder %v6961_v1, 0 }
 0x106   : > { %v6192_v31 = vpop.f32.mrb[0].mxu0 }
 0x107   : > { %v516_v39 = vadd.f32 %v6192_v31, %v7053_v13  ;;  %v507_v12 = vpop.f32.mrb[1].mxu0  ;;  %v7099_v31 = vcombine.low %v6649_v63, %v1666_v17 }
 0x108   : > { %v508_v22 = vadd.f32 %v7053_v13, %v507_v12  ;;  %v6193_v18 = vpop.f32.mrb[2].mxu0  ;;  %v6208_v60 = vpop.f32.mrb[0].mxu1 }
 0x109   : > { %v519_v51 = vadd.f32 %v6193_v18, %v7053_v13  ;;  %v510_v35 = vpop.f32.mrb[3].mxu0  ;;  %v636_v33 = vmax.f32 %v516_v39, 0.0  ;;  %8668 = vst [vmem:[#allocation27_spill] sm:$0xff] %v7099_v31  ;;  %v7104_v2 = vadd.f32 %v6208_v60, %v7053_v13  ;;  %v571_v8 = vpop.f32.mrb[1].mxu1  ;;  %v7110_v39 = vcombine.low %v1326_v52, %v6649_v63 }
 0x10a   : > { %v511_v44 = vadd.f32 %v7053_v13, %v510_v35  ;;  %v634_v45 = vmax.f32 %v508_v22, 0.0  ;;  %v7115_v29 = vadd.f32 %v7053_v13, %v571_v8  ;;  %v7117_v20 = vpop.f32.mrb[2].mxu1 }
 0x10b   : > { %v637_v41 = vmax.f32 %v519_v51, 0.0  ;;  %8670 = vst [vmem:[#allocation29_spill] sm:$0xff] %v7110_v39  ;;  %v7132_v40 = vpop.f32.mrb[3].mxu1 }
 0x10c   : > { %v635_v54 = vmax.f32 %v511_v44, 0.0 }
 0x10d   : > { %v7101_v0 = vpack.c.bf16 %v637_v41, %v636_v33 }
 0x10e   : > { %v7112_v12 = vpack.c.bf16 %v635_v54, %v634_v45  ;;  %v6196_v4 = vpop.f32.mrb[4].mxu0 }
 0x10f   : > { %687 = vst [vmem:[#allocation2 + $0x18] sm:$0xff] %v7101_v0  ;;  %v532_v9 = vadd.f32 %v6196_v4, %v7053_v13  ;;  %v523_v34 = vpop.f32.mrb[5].mxu0  ;;  %v1881_v63 = vsel %vm1506_vm8, %v7101_v0, 0  ;;  %v1983_v51 = vshll.u32 %v7101_v0, 16  ;;  %v7130_v35 = vsel %vm1845_vm9, %v7101_v0, 0 }
 0x110   : > { %686 = vst [vmem:[#allocation2 + $0x10] sm:$0xff] %v7112_v12  ;;  %v524_v44 = vadd.f32 %v7053_v13, %v523_v34  ;;  %v6197_v33 = vpop.f32.mrb[6].mxu0  ;;  %v1880_v41 = vsel %vm1505_vm6, %v7112_v12, 0  ;;  %v1861_v17 = vsel %vm1844_vm10, %v7112_v12, 0  ;;  %v1975_v45 = vshll.u32 %v7112_v12, 16 }
 0x111   : > { %v640_v54 = vmax.f32 %v532_v9, 0.0  ;;  %v535_v60 = vadd.f32 %v6197_v33, %v7053_v13  ;;  %v526_v52 = vpop.f32.mrb[7].mxu0  ;;  %v2453_v8 = vshrl.u32 %v1880_v41, 16  ;;  %v2456_v4 = vshll.u32 %v1880_v41, 16 }
 0x112   : > { %v638_v18 = vmax.f32 %v524_v44, 0.0  ;;  %v527_v34 = vadd.f32 %v7053_v13, %v526_v52  ;;  %v2113_v22 = vrot.slane %v1861_v17, 1  ;;  %v7145_v53 = vrot.slane %v1975_v45, 1  ;;  %v7154_v44 = vpop.f32.mrb[4].mxu1 }
 0x113   : > { %v641_v14 = vmax.f32 %v535_v60, 0.0  ;;  %v2455_v36 = vrot.slane %v2453_v8, 7  ;;  %v2538_v24 = vshrl.u32 %v1881_v63, 16  ;;  %v2541_v49 = vshll.u32 %v1881_v63, 16  ;;  %v7158_v63 = vpop.f32.mrb[5].mxu1 }
 0x114   : > { %8671 = vst [vmem:[#allocation30_spill] sm:$0xff] %v7145_v53  ;;  %v639_v47 = vmax.f32 %v527_v34, 0.0  ;;  %v2114_v31 = vsel %vm2111_vm11, %v6710_v50, %v2113_v22  ;;  %v1978_v9 = vsel %vm8593_vm14, %v6710_v50, %v7145_v53  ;;  %v1979_v33 = vshrl.u32 %v7112_v12, 16  ;;  %v7164_v50 = vpop.f32.mrb[6].mxu1 }
 0x115   : > { %v7156_v41 = vpack.c.bf16 %v641_v14, %v640_v54  ;;  %v2458_v17 = vor.u32 %v2456_v4, %v2455_v36  ;;  %v2441_v45 = vshrl.u32 %v2114_v31, 16  ;;  %v2444_v60 = vshll.u32 %v2114_v31, 16 }
 0x116   : > { %v7160_v52 = vpack.c.bf16 %v639_v47, %v638_v18  ;;  %v6200_v8 = vpop.f32.mrb[8].mxu0  ;;  %v2429_v34 = vshrl.u32 %v1978_v9, 16  ;;  %v2432_v39 = vshll.u32 %v1978_v9, 16  ;;  %v7162_v16 = vrot.slane %v2538_v24, 7  ;;  %v7173_v18 = vpop.f32.mrb[7].mxu1 }
 0x117   : > { %689 = vst [vmem:[#allocation2 + $0x28] sm:$0xff] %v7156_v41  ;;  %v548_v19 = vadd.f32 %v6200_v8, %v7053_v13  ;;  %v539_v14 = vpop.f32.mrb[9].mxu0  ;;  %v2459_v54 = vsel %vm1715_vm2, %v6728_v61, %v2458_v17  ;;  %v7170_v31 = vrot.slane %v2441_v45, 7  ;;  %v1981_v47 = vor.u32 %v1979_v33, %v7145_v53 }
 0x118   : > { %688 = vst [vmem:[#allocation2 + $0x20] sm:$0xff] %v7160_v52  ;;  %v540_v24 = vadd.f32 %v7053_v13, %v539_v14  ;;  %v6201_v4 = vpop.f32.mrb[10].mxu0  ;;  %4121 = vmatprep.mubr.bf16.mxu0 %v2459_v54  ;;  %v7177_v9 = vrot.slane %v2429_v34, 7  ;;  %v2543_v8 = vor.u32 %v2541_v49, %v7162_v16  ;;  %v7180_v6 = vrot.slane %v1983_v51, 1  ;;  %v6401_v54 = vld [vmem:[#allocation3 + $0x180] sm:$0xff]  }
 0x119   : > { %v644_v42 = vmax.f32 %v548_v19, 0.0  ;;  %v551_v61 = vadd.f32 %v6201_v4, %v7053_v13  ;;  %v542_v17 = vpop.f32.mrb[11].mxu0  ;;  %v2446_v33 = vor.u32 %v2444_v60, %v7170_v31  ;;  %v8553_v45 = vrot.slane %v7130_v35, 1  ;;  %v6393_v19 = vld [vmem:[#allocation3 + $0x100] sm:$0xff]  }
 0x11a   : > { %v642_v53 = vmax.f32 %v540_v24, 0.0  ;;  %v543_v23 = vadd.f32 %v7053_v13, %v542_v17  ;;  %v2434_v14 = vor.u32 %v2432_v39, %v7177_v9  ;;  %v2544_v34 = vsel %vm1715_vm2, %v2455_v36, %v2543_v8  ;;  %v6404_v24 = vld [vmem:[#allocation3 + $0x1c8] sm:$0xff]   ;;  %v7198_v17 = vpop.f32.mrb[8].mxu1 }
 0x11b   : > { %v645_v28 = vmax.f32 %v551_v61, 0.0  ;;  %v2447_v49 = vsel %vm1715_vm2, %v6795_v48, %v2446_v33  ;;  %v1986_v51 = vsel %vm8593_vm14, %v1981_v47, %v7180_v6  ;;  %v2116_v60 = vsel %vm2111_vm11, %v2113_v22, %v8553_v45  ;;  %v6394_v61 = vld [vmem:[#allocation3 + $0x148] sm:$0xff]  }
 0x11c   : > { %v643_v4 = vmax.f32 %v543_v23, 0.0  ;;  %4122 = vmatmul.mubr.bf16.vlgmr.msra.gmra.mrb[16].mxu0 %v2447_v49  ;;  %v2435_v36 = vsel %vm1715_vm2, %v6795_v48, %v2434_v14  ;;  %v2465_v39 = vshrl.u32 %v1986_v51, 16  ;;  %v2468_v8 = vshll.u32 %v1986_v51, 16  ;;  %v7205_v23 = vpop.f32.mrb[9].mxu1 }
 0x11d   : > { %v7200_v33 = vpack.c.bf16 %v645_v28, %v644_v42  ;;  %3960 = vmatprep.mubr.bf16.mxu1 %v2435_v36  ;;  %4129 = vmatprep.mubr.bf16.mxu0 %v2544_v34  ;;  %v2530_v47 = vshrl.u32 %v2116_v60, 16  ;;  %v2533_v38 = vshll.u32 %v2116_v60, 16  ;;  %v1882_v22 = vsel %vm8566_vm4, %v7160_v52, 0  ;;  %v7213_v42 = vpop.f32.mrb[10].mxu1  ;;  %v6405_v34 = vld [vmem:[#allocation3 + $0x188] sm:$0xff]  }
 0x11e   : > { %v7207_v49 = vpack.c.bf16 %v643_v4, %v642_v53  ;;  %v6204_v48 = vpop.f32.mrb[12].mxu0  ;;  %3961 = vmatmul.mubr.bf16.vlgmr.msra.gmra.mrb[16].mxu1 %v6815_v57  ;;  %v7210_v14 = vrot.slane %v2465_v39, 7  ;;  %v2595_v51 = vshrl.u32 %v1882_v22, 16  ;;  %v2598_v28 = vshll.u32 %v1882_v22, 16  ;;  %6029 = vmatpush3.bf16.msra.mxu0 %v6401_v54  ;;  %v6395_v39 = vld [vmem:[#allocation3 + $0x108] sm:$0xff]   ;;  %v7223_v22 = vpop.f32.mrb[11].mxu1 }
 0x11f   : > { %691 = vst [vmem:[#allocation2 + $0x38] sm:$0xff] %v7200_v33  ;;  %v564_v60 = vadd.f32 %v6204_v48, %v7053_v13  ;;  %v555_v36 = vpop.f32.mrb[13].mxu0  ;;  %5917 = vmatpush3.bf16.msra.mxu1 %v6393_v19  ;;  %v7217_v53 = vrot.slane %v2530_v47, 7  ;;  %v1523_v57 = vsel %vm1506_vm8, %v7112_v12, 0  ;;  %v1987_v4 = vshrl.u32 %v7101_v0, 16  ;;  %6030 = vmatprep.subr.bf16.mxu0 %v6404_v24 }
 0x120   : > { %690 = vst [vmem:[#allocation2 + $0x30] sm:$0xff] %v7207_v49  ;;  %v556_v54 = vadd.f32 %v7053_v13, %v555_v36  ;;  %v6205_v45 = vpop.f32.mrb[14].mxu0  ;;  %v7228_v48 = vor.u32 %v2468_v8, %v7210_v14  ;;  %v7230_v19 = vrot.slane %v2595_v51, 7  ;;  %v2521_v47 = vshrl.u32 %v1523_v57, 16  ;;  %5918 = vmatprep.subr.bf16.mxu1 %v6394_v61  ;;  %v6409_v61 = vld [vmem:[#allocation3 + $0x190] sm:$0xff]  }
 0x121   : > { %v648_v12 = vmax.f32 %v564_v60, 0.0  ;;  %v567_v7 = vadd.f32 %v6205_v45, %v7053_v13  ;;  %v558_v32 = vpop.f32.mrb[15].mxu0  ;;  %v2535_v37 = vor.u32 %v2533_v38, %v7217_v53  ;;  %v2524_v24 = vshll.u32 %v1523_v57, 16 }
 0x122   : > { %8672 = vst [vmem:[#allocation31_spill] sm:$0xff] %v7228_v48  ;;  %v646_v43 = vmax.f32 %v556_v54, 0.0  ;;  %v559_v36 = vadd.f32 %v7053_v13, %v558_v32  ;;  %v2528_v8 = vsel %vm1715_vm2, %v7177_v9, %v7228_v48  ;;  %v2600_v51 = vor.u32 %v2598_v28, %v7230_v19  ;;  %6031 = vmatpush3.bf16.msra.mxu0 %v6405_v34  ;;  %v6397_v32 = vld [vmem:[#allocation3 + $0x110] sm:$0xff]   ;;  %v6412_v54 = vld [vmem:[#allocation3 + $0x1d8] sm:$0xff]  }
 0x123   : > { %v649_v60 = vmax.f32 %v567_v7, 0.0  ;;  %3968 = vmatprep.mubr.bf16.mxu1 %v2528_v8  ;;  %v2536_v38 = vsel %vm1715_vm2, %v7170_v31, %v2535_v37  ;;  %v7242_v45 = vrot.slane %v2521_v47, 7  ;;  %v1989_v57 = vor.u32 %v1987_v4, %v7180_v6  ;;  %5919 = vmatpush3.bf16.msra.mxu1 %v6395_v39  ;;  %v6398_v34 = vld [vmem:[#allocation3 + $0x158] sm:$0xff]   ;;  %v7249_v8 = vpop.f32.mrb[12].mxu1 }
 0x124   : > { %v647_v30 = vmax.f32 %v559_v36, 0.0  ;;  %4130 = vmatmul.mubr.bf16.gmra.mrb[20].mxu0 %v2536_v38  ;;  %v2601_v9 = vsel %vm1715_vm2, %v7162_v16, %v2600_v51  ;;  %v1991_v28 = vshll.u32 %v7160_v52, 16  ;;  %v652_v7 = vmax.f32 %v7104_v2, 0.0  ;;  %5920 = vmatprep.subr.bf16.mxu1 %v6396_v56  ;;  %v7257_v47 = vpop.f32.mrb[13].mxu1  ;;  %v6414_v51 = vld [vmem:[#allocation3 + $0x1e0] sm:$0xff]  }
 0x125   : > { %v7251_v37 = vpack.c.bf16 %v649_v60, %v648_v12  ;;  %4137 = vmatprep.mubr.bf16.mxu0 %v2601_v9  ;;  %v2526_v31 = vor.u32 %v2524_v24, %v7242_v45  ;;  %v650_v4 = vmax.f32 %v7115_v29, 0.0  ;;  %v583_v39 = vadd.f32 %v7117_v20, %v7053_v13  ;;  %6032 = vmatprep.subr.bf16.mxu0 %v6408_v15  ;;  %v7269_v29 = vpop.f32.mrb[14].mxu1  ;;  %v6413_v20 = vld [vmem:[#allocation3 + $0x198] sm:$0xff]   ;;  %v6402_v9 = vld [vmem:[#allocation3 + $0x160] sm:$0xff]  }
 0x126   : > { %v7259_v16 = vpack.c.bf16 %v647_v30, %v646_v43  ;;  %v1993_v2 = vrot.slane %v1991_v28, 1  ;;  %v575_v56 = vadd.f32 %v7053_v13, %v7132_v40  ;;  %v7266_v12 = vsel %vm1846_vm5, %v7160_v52, 0  ;;  %6033 = vmatpush3.bf16.msra.mxu0 %v6409_v61  ;;  %v6399_v24 = vld [vmem:[#allocation3 + $0x118] sm:$0xff]   ;;  %v7278_v36 = vpop.f32.mrb[15].mxu1 }
 0x127   : > { %693 = vst [vmem:[#allocation2 + $0x48] sm:$0xff] %v7251_v37  ;;  %v2527_v30 = vsel %vm1715_vm2, %v6757_v21, %v2526_v31  ;;  %v653_v43 = vmax.f32 %v583_v39, 0.0  ;;  %v2117_v15 = vrot.slane %v7266_v12, 1  ;;  %v1883_v40 = vsel %vm8565_vm7, %v7156_v41, 0  ;;  %5921 = vmatpush3.bf16.msra.mxu1 %v6397_v32  ;;  %6034 = vmatprep.subr.bf16.mxu0 %v6412_v54 }
 0x128   : > { %692 = vst [vmem:[#allocation2 + $0x40] sm:$0xff] %v7259_v16  ;;  %3969 = vmatmul.mubr.bf16.gmra.mrb[20].mxu1 %v2527_v30  ;;  %v1994_v61 = vsel %vm8593_vm14, %v1989_v57, %v1993_v2  ;;  %v651_v60 = vmax.f32 %v575_v56, 0.0  ;;  %v2651_v21 = vshrl.u32 %v1883_v40, 16  ;;  %v2654_v38 = vshll.u32 %v1883_v40, 16  ;;  %5922 = vmatprep.subr.bf16.mxu1 %v6398_v34  ;;  %v6416_v56 = vld [vmem:[#allocation3 + $0x1a0] sm:$0xff]   ;;  %v6418_v40 = vld [vmem:[#allocation3 + $0x1e8] sm:$0xff]  }
 0x129   : > { %v2501_v28 = vshrl.u32 %v1994_v61, 16  ;;  %v2504_v31 = vshll.u32 %v1994_v61, 16  ;;  %v7282_v39 = vpack.c.bf16 %v653_v43, %v652_v7  ;;  %v8673_v32 = vrot.slane %v7130_v35, 1 }
 0x12a   : > { %v7289_v48 = vpack.c.bf16 %v651_v60, %v650_v4  ;;  %v7291_v57 = vrot.slane %v2651_v21, 7  ;;  %6035 = vmatpush3.bf16.msra.mxu0 %v6413_v20  ;;  %v1524_v7 = vsel %vm8566_vm4, %v7101_v0, 0  ;;  %v1995_v35 = vshrl.u32 %v7160_v52, 16  ;;  %v6403_v4 = vld [vmem:[#allocation3 + $0x120] sm:$0xff]  }
 0x12b   : > { %v2118_v54 = vsel %vm2111_vm11, %v8673_v32, %v2117_v15  ;;  %v7293_v34 = vrot.slane %v2501_v28, 7  ;;  %695 = vst [vmem:[#allocation2 + $0x58] sm:$0xff] %v7282_v39  ;;  %v1999_v43 = vshll.u32 %v7156_v41, 16  ;;  %5923 = vmatpush3.bf16.msra.mxu1 %v6399_v24  ;;  %6036 = vmatprep.subr.bf16.mxu0 %v6414_v51  ;;  %v2579_v60 = vshrl.u32 %v1524_v7, 16  ;;  %v6406_v28 = vld [vmem:[#allocation3 + $0x168] sm:$0xff]  }
 0x12c   : > { %v2587_v30 = vshrl.u32 %v2118_v54, 16  ;;  %v2590_v11 = vshll.u32 %v2118_v54, 16  ;;  %694 = vst [vmem:[#allocation2 + $0x50] sm:$0xff] %v7289_v48  ;;  %v2656_v61 = vor.u32 %v2654_v38, %v7291_v57  ;;  %v2582_v21 = vshll.u32 %v1524_v7, 16  ;;  %5924 = vmatprep.subr.bf16.mxu1 %v6402_v9 }
 0x12d   : > { %v7306_v0 = vor.u32 %v2504_v31, %v7293_v34  ;;  %v1997_v32 = vor.u32 %v1995_v35, %v1993_v2  ;;  %v2001_v54 = vrot.slane %v1999_v43, 1  ;;  %v7311_v24 = vsel %vm8575_vm12, %v7156_v41, 0  ;;  %v6419_v31 = vld [vmem:[#allocation3 + $0x1a8] sm:$0xff]  }
 0x12e   : > { %v7302_v20 = vrot.slane %v2587_v30, 7  ;;  %v2657_v38 = vsel %vm1715_vm2, %v7230_v19, %v2656_v61  ;;  %v2581_v30 = vrot.slane %v2579_v60, 7  ;;  %v2119_v9 = vrot.slane %v7311_v24, 1  ;;  %6037 = vmatpush3.bf16.msra.mxu0 %v6416_v56  ;;  %v6420_v19 = vld [vmem:[#allocation3 + $0x1f0] sm:$0xff]   ;;  %v6407_v60 = vld [vmem:[#allocation3 + $0x128] sm:$0xff]  }
 0x12f   : > { %v7321_v2 = vsel %vm1715_vm2, %v7210_v14, %v7306_v0  ;;  %v2002_v7 = vsel %vm8593_vm14, %v1997_v32, %v2001_v54  ;;  %v1884_v35 = vsel %vm8567_vm13, %v7207_v49, 0  ;;  %5925 = vmatpush3.bf16.msra.mxu1 %v6403_v4  ;;  %6038 = vmatprep.subr.bf16.mxu0 %v6418_v40  ;;  %vm8571_vm4 = vcmp.ne.s16.totalorder %v6968_v5, 0 }
 0x130   : > { %v2592_v51 = vor.u32 %v2590_v11, %v7302_v20  ;;  %v1525_v11 = vsel %vm8565_vm7, %v7160_v52, 0  ;;  %3976 = vmatprep.mubr.bf16.mxu1 %v7321_v2  ;;  %v2584_v14 = vor.u32 %v2582_v21, %v2581_v30  ;;  %v2563_v43 = vshrl.u32 %v2002_v7, 16  ;;  %5926 = vmatprep.subr.bf16.mxu1 %v6406_v28 }
 0x131   : > { %v2566_v61 = vshll.u32 %v2002_v7, 16  ;;  %v2120_v52 = vsel %vm2111_vm11, %v2117_v15, %v2119_v9  ;;  %v2707_v4 = vshrl.u32 %v1884_v35, 16  ;;  %v2710_v40 = vshll.u32 %v1884_v35, 16  ;;  %v6421_v7 = vld [vmem:[#allocation3 + $0x1b0] sm:$0xff]  }
 0x132   : > { %v2593_v56 = vsel %vm1715_vm2, %v7217_v53, %v2592_v51  ;;  %v2635_v32 = vshrl.u32 %v1525_v11, 16  ;;  %v2585_v53 = vsel %vm1715_vm2, %v7242_v45, %v2584_v14  ;;  %v7341_v21 = vrot.slane %v2563_v43, 7  ;;  %6039 = vmatpush3.bf16.msra.mxu0 %v6419_v31 }
 0x133   : > { %4138 = vmatmul.mubr.bf16.gmra.mrb[24].mxu0 %v2593_v56  ;;  %v2643_v28 = vshrl.u32 %v2120_v52, 16  ;;  %v2646_v51 = vshll.u32 %v2120_v52, 16  ;;  %3977 = vmatmul.mubr.bf16.gmra.mrb[24].mxu1 %v2585_v53  ;;  %v7343_v12 = vrot.slane %v2707_v4, 7  ;;  %v2638_v35 = vshll.u32 %v1525_v11, 16  ;;  %v6411_v52 = vld [vmem:[#allocation3 + $0x130] sm:$0xff]  }
 0x134   : > { %4145 = vmatprep.mubr.bf16.mxu0 %v2657_v38  ;;  %v7345_v15 = vrot.slane %v2635_v32, 7  ;;  %v2003_v56 = vshrl.u32 %v7156_v41, 16  ;;  %vm8568_vm7 = vcmp.ne.s16.totalorder %v6965_v3, 0  ;;  %6040 = vmatprep.subr.bf16.mxu0 %v6420_v19  ;;  %v6422_v38 = vld [vmem:[#allocation3 + $0x1f8] sm:$0xff]   ;;  %v2568_v45 = vor.u32 %v2566_v61, %v7341_v21 }
 0x135   : > { %v7350_v14 = vrot.slane %v2643_v28, 7  ;;  %v2007_v43 = vshll.u32 %v7207_v49, 16  ;;  %v596_v31 = vadd.f32 %v7154_v44, %v7053_v13  ;;  %5927 = vmatpush3.bf16.msra.mxu1 %v6407_v60  ;;  %v2712_v4 = vor.u32 %v2710_v40, %v7343_v12  ;;  %v6415_v61 = vld [vmem:[#allocation3 + $0x178] sm:$0xff]  }
 0x136   : > { %v2640_v11 = vor.u32 %v2638_v35, %v7345_v15  ;;  %v2005_v32 = vor.u32 %v2003_v56, %v2001_v54  ;;  %v588_v19 = vadd.f32 %v7053_v13, %v7158_v63  ;;  %5928 = vmatprep.subr.bf16.mxu1 %v6410_v10  ;;  %v7362_v53 = vsel %vm1715_vm2, %v7293_v34, %v2568_v45  ;;  %v6423_v40 = vld [vmem:[#allocation3 + $0x1b8] sm:$0xff]  }
 0x137   : > { %v2648_v44 = vor.u32 %v2646_v51, %v7350_v14  ;;  %v2009_v60 = vrot.slane %v2007_v43, 1  ;;  %v656_v28 = vmax.f32 %v596_v31, 0.0  ;;  %6041 = vmatpush3.bf16.msra.mxu0 %v6421_v7  ;;  %3984 = vmatprep.mubr.bf16.mxu1 %v7362_v53  ;;  %v2713_v54 = vsel %vm1715_vm2, %v7291_v57, %v2712_v4  ;;  %v6417_v57 = vld [vmem:[#allocation3 + $0x138] sm:$0xff]  }
 0x138   : > { %v2641_v63 = vsel %vm1715_vm2, %v2581_v30, %v2640_v11  ;;  %v654_v35 = vmax.f32 %v588_v19, 0.0  ;;  %v599_v10 = vadd.f32 %v7164_v50, %v7053_v13  ;;  %6042 = vmatprep.subr.bf16.mxu0 %v6422_v38  ;;  %v591_v7 = vadd.f32 %v7053_v13, %v7173_v18  ;;  %v7379_v38 = vld [vmem:[#allocation3 + $0x200] sm:$0xff]  }
 0x139   : > { %v2649_v34 = vsel %vm1715_vm2, %v7302_v20, %v2648_v44  ;;  %v2010_v51 = vsel %vm8593_vm14, %v2005_v32, %v2009_v60  ;;  %v1865_v56 = vsel %vm8570_vm15, %v7207_v49, 0  ;;  %5929 = vmatpush3.bf16.msra.mxu1 %v6411_v52  ;;  %v1885_v18 = vsel %vm8569_vm1, %v7200_v33, 0 }
 0x13a   : > { %v2619_v30 = vshrl.u32 %v2010_v51, 16  ;;  %v2622_v45 = vshll.u32 %v2010_v51, 16  ;;  %v657_v43 = vmax.f32 %v599_v10, 0.0  ;;  %v2121_v50 = vrot.slane %v1865_v56, 1  ;;  %5930 = vmatprep.subr.bf16.mxu1 %v6415_v61 }
 0x13b   : > { %4146 = vmatmul.mubr.bf16.gmra.mrb[28].mxu0 %v2649_v34  ;;  %v655_v20 = vmax.f32 %v591_v7, 0.0  ;;  %v1526_v31 = vsel %vm8567_vm13, %v7156_v41, 0  ;;  %v2011_v52 = vshrl.u32 %v7207_v49, 16  ;;  %3985 = vmatmul.mubr.bf16.gmra.mrb[28].mxu1 %v2641_v63  ;;  %v2763_v19 = vshrl.u32 %v1885_v18, 16 }
 0x13c   : > { %4153 = vmatprep.mubr.bf16.mxu0 %v2713_v54  ;;  %6043 = vmatpush3.bf16.msra.mxu0 %v6423_v40  ;;  %v7388_v4 = vrot.slane %v2619_v30, 7  ;;  %v7390_v11 = vpack.c.bf16 %v657_v43, %v656_v28  ;;  %v2122_v32 = vsel %vm2111_vm11, %v2119_v9, %v2121_v50  ;;  %v2766_v10 = vshll.u32 %v1885_v18, 16 }
 0x13d   : > { %v7395_v61 = vpack.c.bf16 %v655_v20, %v654_v35  ;;  %v2699_v44 = vshrl.u32 %v2122_v32, 16  ;;  %v2702_v54 = vshll.u32 %v2122_v32, 16  ;;  %5931 = vmatpush3.bf16.msra.mxu1 %v6417_v57  ;;  %v2765_v40 = vrot.slane %v2763_v19, 7 }
 0x13e   : > { %v2624_v41 = vor.u32 %v2622_v45, %v7388_v4  ;;  %697 = vst [vmem:[#allocation2 + $0x68] sm:$0xff] %v7390_v11  ;;  %v2691_v63 = vshrl.u32 %v1526_v31, 16  ;;  %v2694_v34 = vshll.u32 %v1526_v31, 16  ;;  %6222 = vmatprep.subr.bf16.mxu1 %v7379_v38  ;;  %v2013_v9 = vor.u32 %v2011_v52, %v2009_v60 }
 0x13f   : > { %696 = vst [vmem:[#allocation2 + $0x60] sm:$0xff] %v7395_v61  ;;  %v2701_v24 = vrot.slane %v2699_v44, 7  ;;  %v2015_v28 = vshll.u32 %v7200_v33, 16  ;;  %v7405_v35 = vsel %vm8568_vm7, %v7200_v33, 0  ;;  %v2768_v7 = vor.u32 %v2766_v10, %v2765_v40 }
 0x140   : > { %v7409_v51 = vsel %vm1715_vm2, %v7341_v21, %v2624_v41  ;;  %v2693_v56 = vrot.slane %v2691_v63, 7  ;;  %v2123_v57 = vrot.slane %v7405_v35, 1  ;;  %vm8574_vm13 = vcmp.ne.s16.totalorder %v6974_v26, 0 }
 0x141   : > { %3992 = vmatprep.mubr.bf16.mxu1 %v7409_v51  ;;  %v2704_v60 = vor.u32 %v2702_v54, %v2701_v24  ;;  %v2017_v30 = vrot.slane %v2015_v28, 1  ;;  %v1886_v45 = vsel %vm8571_vm4, %v7259_v16, 0  ;;  %v1527_v43 = vsel %vm8569_vm1, %v7207_v49, 0 }
 0x142   : > { %v2769_v21 = vsel %vm1715_vm2, %v7343_v12, %v2768_v7  ;;  %v2696_v20 = vor.u32 %v2694_v34, %v2693_v56  ;;  %v2124_v18 = vsel %vm2111_vm11, %v2121_v50, %v2123_v57  ;;  %v2819_v31 = vshrl.u32 %v1886_v45, 16 }
 0x143   : > { %v2705_v52 = vsel %vm1715_vm2, %v7350_v14, %v2704_v60  ;;  %v2018_v32 = vsel %vm8593_vm14, %v2013_v9, %v2017_v30  ;;  %v2755_v19 = vshrl.u32 %v2124_v18, 16  ;;  %v2758_v44 = vshll.u32 %v2124_v18, 16 }
 0x144   : > { %vm8573_vm7 = vcmp.ne.s16.totalorder %v6988_v27, 0  ;;  %4154 = vmatmul.mubr.bf16.gmra.mrb[32].mxu0 %v2705_v52  ;;  %v2697_v49 = vsel %vm1715_vm2, %v7345_v15, %v2696_v20  ;;  %v2675_v12 = vshrl.u32 %v2018_v32, 16  ;;  %v2678_v54 = vshll.u32 %v2018_v32, 16 }
 0x145   : > { %v7431_v10 = vrot.slane %v2819_v31, 7  ;;  %4161 = vmatprep.mubr.bf16.mxu0 %v2769_v21  ;;  %3993 = vmatmul.mubr.bf16.gmra.mrb[32].mxu1 %v2697_v49  ;;  %v7433_v50 = vrot.slane %v2755_v19, 7  ;;  %v2822_v41 = vshll.u32 %v1886_v45, 16  ;;  %v2747_v14 = vshrl.u32 %v1527_v43, 16 }
 0x146   : > { %v2750_v63 = vshll.u32 %v1527_v43, 16  ;;  %v2677_v34 = vrot.slane %v2675_v12, 7  ;;  %v2019_v9 = vshrl.u32 %v7200_v33, 16  ;;  %v2023_v28 = vshll.u32 %v7259_v16, 16 }
 0x147   : > { %v612_v7 = vadd.f32 %v7198_v17, %v7053_v13  ;;  %vm8572_vm1 = vcmp.ne.s16.totalorder %v6991_v46, 0  ;;  %v2760_v15 = vor.u32 %v2758_v44, %v7433_v50  ;;  %v2824_v60 = vor.u32 %v2822_v41, %v7431_v10 }
 0x148   : > { %v2749_v21 = vrot.slane %v2747_v14, 7  ;;  %v604_v45 = vadd.f32 %v7053_v13, %v7205_v23  ;;  %v2680_v20 = vor.u32 %v2678_v54, %v2677_v34  ;;  %v2021_v43 = vor.u32 %v2019_v9, %v2017_v30 }
 0x149   : > { %v2025_v18 = vrot.slane %v2023_v28, 1  ;;  %v660_v31 = vmax.f32 %v612_v7, 0.0  ;;  %vm8576_vm15 = vcmp.ne.s16.totalorder %v6994_v62, 0  ;;  %v2761_v52 = vsel %vm1715_vm2, %v2701_v24, %v2760_v15 }
 0x14a   : > { %v2825_v17 = vsel %vm1715_vm2, %v2765_v40, %v2824_v60  ;;  %v2752_v32 = vor.u32 %v2750_v63, %v2749_v21  ;;  %v658_v19 = vmax.f32 %v604_v45, 0.0  ;;  %v7449_v44 = vsel %vm1715_vm2, %v7388_v4, %v2680_v20 }
 0x14b   : > { %v2026_v49 = vsel %vm8593_vm14, %v2021_v43, %v2025_v18  ;;  %v615_v23 = vadd.f32 %v7213_v42, %v7053_v13  ;;  %v607_v30 = vadd.f32 %v7053_v13, %v7223_v22  ;;  %4000 = vmatprep.mubr.bf16.mxu1 %v7449_v44  ;;  %v1867_v54 = vsel %vm8574_vm13, %v7259_v16, 0 }
 0x14c   : > { %v2753_v24 = vsel %vm1715_vm2, %v2693_v56, %v2752_v32  ;;  %v2731_v12 = vshrl.u32 %v2026_v49, 16  ;;  %v2734_v40 = vshll.u32 %v2026_v49, 16  ;;  %4162 = vmatmul.mubr.bf16.gmra.mrb[36].mxu0 %v2761_v52  ;;  %v2125_v14 = vrot.slane %v1867_v54, 1 }
 0x14d   : > { %v661_v4 = vmax.f32 %v615_v23, 0.0  ;;  %v659_v41 = vmax.f32 %v607_v30, 0.0  ;;  %v1887_v42 = vsel %vm8573_vm7, %v7251_v37, 0  ;;  %4169 = vmatprep.mubr.bf16.mxu0 %v2825_v17  ;;  %4001 = vmatmul.mubr.bf16.gmra.mrb[36].mxu1 %v2753_v24  ;;  %v1528_v9 = vsel %vm8571_vm4, %v7200_v33, 0  ;;  %v8674_v23 = vld [vmem:[#allocation15_spill] sm:$0xff] }
 0x14e   : > { %v7464_v22 = vrot.slane %v2731_v12, 7  ;;  %v2875_v63 = vshrl.u32 %v1887_v42, 16  ;;  %v2878_v56 = vshll.u32 %v1887_v42, 16  ;;  %v2126_v15 = vsel %vm2111_vm11, %v2123_v57, %v2125_v14 }
 0x14f   : > { %v7469_v28 = vpack.c.bf16 %v661_v4, %v660_v31  ;;  %v7471_v7 = vpack.c.bf16 %v659_v41, %v658_v19  ;;  %v2803_v60 = vshrl.u32 %v1528_v9, 16  ;;  %v2811_v20 = vshrl.u32 %v2126_v15, 16 }
 0x150   : > { %v2736_v45 = vor.u32 %v2734_v40, %v7464_v22  ;;  %v2814_v43 = vshll.u32 %v2126_v15, 16  ;;  %v2877_v52 = vrot.slane %v2875_v63, 7  ;;  %v2806_v33 = vshll.u32 %v1528_v9, 16 }
 0x151   : > { %699 = vst [vmem:[#allocation2 + $0x78] sm:$0xff] %v7469_v28  ;;  %698 = vst [vmem:[#allocation2 + $0x70] sm:$0xff] %v7471_v7  ;;  %v2805_v17 = vrot.slane %v2803_v60, 7  ;;  %v2027_v31 = vshrl.u32 %v7259_v16, 16  ;;  %v2031_v32 = vshll.u32 %v7251_v37, 16  ;;  %v2813_v57 = vrot.slane %v2811_v20, 7 }
 0x152   : > { %v7482_v35 = vsel %vm1715_vm2, %v2677_v34, %v2736_v45  ;;  %v2880_v19 = vor.u32 %v2878_v56, %v2877_v52  ;;  %v7487_v49 = vsel %vm8572_vm1, %v7251_v37, 0  ;;  %vm8581_vm4 = vcmp.ne.s16.totalorder %v8674_v23, 0  ;;  %v8675_v45 = vld [vmem:[#allocation16_spill] sm:$0xff] }
 0x153   : > { %4008 = vmatprep.mubr.bf16.mxu1 %v7482_v35  ;;  %v2808_v30 = vor.u32 %v2806_v33, %v2805_v17  ;;  %v2029_v24 = vor.u32 %v2027_v31, %v2025_v18  ;;  %v2033_v12 = vrot.slane %v2031_v32, 1  ;;  %v2127_v40 = vrot.slane %v7487_v49, 1 }
 0x154   : > { %v2816_v54 = vor.u32 %v2814_v43, %v2813_v57  ;;  %v2881_v34 = vsel %vm1715_vm2, %v7431_v10, %v2880_v19  ;;  %v1888_v4 = vsel %vm8576_vm15, %v7289_v48, 0  ;;  %v1529_v41 = vsel %vm8573_vm7, %v7259_v16, 0 }
 0x155   : > { %v2809_v42 = vsel %vm1715_vm2, %v2749_v21, %v2808_v30  ;;  %v2034_v63 = vsel %vm8593_vm14, %v2029_v24, %v2033_v12  ;;  %v2128_v18 = vsel %vm2111_vm11, %v2125_v14, %v2127_v40  ;;  %v2931_v56 = vshrl.u32 %v1888_v4, 16 }
 0x156   : > { %v2817_v10 = vsel %vm1715_vm2, %v7433_v50, %v2816_v54  ;;  %4009 = vmatmul.mubr.bf16.gmra.mrb[40].mxu1 %v2809_v42  ;;  %v2787_v9 = vshrl.u32 %v2034_v63, 16  ;;  %v2790_v15 = vshll.u32 %v2034_v63, 16  ;;  %v2867_v60 = vshrl.u32 %v2128_v18, 16  ;;  %v8676_v50 = vld [vmem:[#allocation17_spill] sm:$0xff]  ;;  %v8677_v63 = vld [vmem:[#allocation19_spill] sm:$0xff] }
 0x157   : > { %vm8578_vm1 = vcmp.ne.s16.totalorder %v8675_v45, 0  ;;  %4170 = vmatmul.mubr.bf16.gmra.mrb[40].mxu0 %v2817_v10  ;;  %v2870_v16 = vshll.u32 %v2128_v18, 16  ;;  %v7508_v20 = vrot.slane %v2931_v56, 7  ;;  %v2934_v21 = vshll.u32 %v1888_v4, 16 }
 0x158   : > { %v2859_v43 = vshrl.u32 %v1529_v41, 16  ;;  %4177 = vmatprep.mubr.bf16.mxu0 %v2881_v34  ;;  %v2789_v33 = vrot.slane %v2787_v9, 7  ;;  %v7510_v31 = vrot.slane %v2867_v60, 7  ;;  %v2862_v14 = vshll.u32 %v1529_v41, 16 }
 0x159   : > { %v2035_v32 = vshrl.u32 %v7251_v37, 16  ;;  %vm8577_vm7 = vcmp.ne.s16.totalorder %v8676_v50, 0  ;;  %v2936_v19 = vor.u32 %v2934_v21, %v7508_v20  ;;  %v2039_v24 = vshll.u32 %v7289_v48, 16 }
 0x15a   : > { %v7515_v30 = vrot.slane %v2859_v43, 7  ;;  %v628_v54 = vadd.f32 %v7249_v8, %v7053_v13  ;;  %v2792_v4 = vor.u32 %v2790_v15, %v2789_v33  ;;  %v2872_v34 = vor.u32 %v2870_v16, %v7510_v31  ;;  %v6440_v16 = vld [vmem:[%s8525_s2] ss:$0 sm:$0xff] }
 0x15b   : > { %v2037_v42 = vor.u32 %v2035_v32, %v2033_v12  ;;  %v620_v41 = vadd.f32 %v7053_v13, %v7257_v47  ;;  %vm8583_vm13 = vcmp.ne.s16.totalorder %v8677_v63, 0  ;;  %v2937_v18 = vsel %vm1715_vm2, %v2877_v52, %v2936_v19  ;;  %v8678_v19 = vld [vmem:[#allocation21_spill] sm:$0xff] }
 0x15c   : > { %v2864_v56 = vor.u32 %v2862_v14, %v7515_v30  ;;  %v2041_v10 = vrot.slane %v2039_v24, 1  ;;  %v664_v9 = vmax.f32 %v628_v54, 0.0  ;;  %v7528_v60 = vsel %vm1715_vm2, %v7464_v22, %v2792_v4 }
 0x15d   : > { %v2873_v8 = vsel %vm1715_vm2, %v2813_v57, %v2872_v34  ;;  %v662_v15 = vmax.f32 %v620_v41, 0.0  ;;  %v631_v12 = vadd.f32 %v7269_v29, %v7053_v13  ;;  %4016 = vmatprep.mubr.bf16.mxu1 %v7528_v60  ;;  %v623_v21 = vadd.f32 %v6440_v16, %v7278_v36 }
 0x15e   : > { %v2865_v47 = vsel %vm1715_vm2, %v2805_v17, %v2864_v56  ;;  %v2042_v52 = vsel %vm8593_vm14, %v2037_v42, %v2041_v10  ;;  %v1869_v22 = vsel %vm8581_vm4, %v7289_v48, 0  ;;  %v1889_v17 = vsel %vm8578_vm1, %v7282_v39, 0 }
 0x15f   : > { %4017 = vmatmul.mubr.bf16.gmra.mrb[44].mxu1 %v2865_v47  ;;  %v2843_v57 = vshrl.u32 %v2042_v52, 16  ;;  %v2846_v43 = vshll.u32 %v2042_v52, 16  ;;  %v665_v13 = vmax.f32 %v631_v12, 0.0  ;;  %v2129_v29 = vrot.slane %v1869_v22, 1  ;;  %4178 = vmatmul.mubr.bf16.gmra.mrb[44].mxu0 %v2873_v8 }
 0x160   : > { %v663_v14 = vmax.f32 %v623_v21, 0.0  ;;  %v1530_v32 = vsel %vm8576_vm15, %v7251_v37, 0  ;;  %v2043_v36 = vshrl.u32 %v7289_v48, 16  ;;  %vm8580_vm12 = vcmp.ne.s16.totalorder %v8678_v19, 0  ;;  %4185 = vmatprep.mubr.bf16.mxu0 %v2937_v18 }
 0x161   : > { %v7551_v24 = vrot.slane %v2843_v57, 7  ;;  %v7553_v54 = vpack.c.bf16 %v665_v13, %v664_v9  ;;  %v2130_v4 = vsel %vm2111_vm11, %v2127_v40, %v2129_v29  ;;  %v2987_v34 = vshrl.u32 %v1889_v17, 16 }
 0x162   : > { %v7558_v42 = vpack.c.bf16 %v663_v14, %v662_v15  ;;  %v2923_v41 = vshrl.u32 %v2130_v4, 16  ;;  %v2926_v56 = vshll.u32 %v2130_v4, 16  ;;  %v2990_v8 = vshll.u32 %v1889_v17, 16  ;;  %v8679_v15 = vld [vmem:[#allocation22_spill] sm:$0xff] }
 0x163   : > { %v2848_v37 = vor.u32 %v2846_v43, %v7551_v24  ;;  %701 = vst [vmem:[#allocation2 + $0x88] sm:$0xff] %v7553_v54  ;;  %v2989_v12 = vrot.slane %v2987_v34, 7  ;;  %v2915_v18 = vshrl.u32 %v1530_v32, 16  ;;  %v2918_v47 = vshll.u32 %v1530_v32, 16 }
 0x164   : > { %700 = vst [vmem:[#allocation2 + $0x80] sm:$0xff] %v7558_v42  ;;  %v2925_v9 = vrot.slane %v2923_v41, 7  ;;  %v2045_v52 = vor.u32 %v2043_v36, %v2041_v10  ;;  %v2047_v49 = vshll.u32 %v7282_v39, 16  ;;  %v1870_v40 = vsel %vm8577_vm7, %v7282_v39, 0 }
 0x165   : > { %vm1516_vm15 = vcmp.ne.s16.totalorder %v8679_v15, 0  ;;  %v7569_v16 = vsel %vm1715_vm2, %v2789_v33, %v2848_v37  ;;  %v2992_v21 = vor.u32 %v2990_v8, %v2989_v12  ;;  %v2917_v22 = vrot.slane %v2915_v18, 7  ;;  %v8680_v8 = vld [vmem:[#allocation23_spill] sm:$0xff] }
 0x166   : > { %v2131_v57 = vrot.slane %v1870_v40, 1  ;;  %4024 = vmatprep.mubr.bf16.mxu1 %v7569_v16  ;;  %v2928_v43 = vor.u32 %v2926_v56, %v2925_v9  ;;  %v2049_v13 = vrot.slane %v2047_v49, 1  ;;  %v1890_v10 = vsel %vm8583_vm13, %v7395_v61, 0 }
 0x167   : > { %v1531_v14 = vsel %vm8578_vm1, %v7289_v48, 0  ;;  %v2993_v17 = vsel %vm1715_vm2, %v7508_v20, %v2992_v21  ;;  %v2920_v33 = vor.u32 %v2918_v47, %v2917_v22  ;;  %v3043_v36 = vshrl.u32 %v1890_v10, 16 }
 0x168   : > { %v2132_v32 = vsel %vm2111_vm11, %v2129_v29, %v2131_v57  ;;  %v2929_v4 = vsel %vm1715_vm2, %v7510_v31, %v2928_v43  ;;  %v2050_v34 = vsel %vm8593_vm14, %v2045_v52, %v2049_v13  ;;  %vm1855_vm7 = vcmp.ne.s16.totalorder %v8680_v8, 0  ;;  %v8681_v31 = vld [vmem:[#allocation24_spill] sm:$0xff] }
 0x169   : > { %v2979_v41 = vshrl.u32 %v2132_v32, 16  ;;  %v2982_v56 = vshll.u32 %v2132_v32, 16  ;;  %4186 = vmatmul.mubr.bf16.gmra.mrb[48].mxu0 %v2929_v4  ;;  %v2921_v48 = vsel %vm1715_vm2, %v7515_v30, %v2920_v33  ;;  %v2899_v37 = vshrl.u32 %v2050_v34, 16 }
 0x16a   : > { %v2902_v18 = vshll.u32 %v2050_v34, 16  ;;  %v3045_v20 = vrot.slane %v3043_v36, 7  ;;  %4193 = vmatprep.mubr.bf16.mxu0 %v2993_v17  ;;  %4025 = vmatmul.mubr.bf16.gmra.mrb[48].mxu1 %v2921_v48  ;;  %v3046_v47 = vshll.u32 %v1890_v10, 16  ;;  %v2971_v49 = vshrl.u32 %v1531_v14, 16 }
 0x16b   : > { %v2981_v29 = vrot.slane %v2979_v41, 7  ;;  %v2974_v40 = vshll.u32 %v1531_v14, 16  ;;  %vm8588_vm1 = vcmp.ne.s16.totalorder %v8681_v31, 0  ;;  %v2901_v52 = vrot.slane %v2899_v37, 7 }
 0x16c   : > { %v2051_v21 = vshrl.u32 %v7282_v39, 16  ;;  %v2055_v43 = vshll.u32 %v7395_v61, 16  ;;  %v1871_v30 = vsel %vm8580_vm12, %v7395_v61, 0  ;;  %v3048_v32 = vor.u32 %v3046_v47, %v3045_v20 }
 0x16d   : > { %v2984_v33 = vor.u32 %v2982_v56, %v2981_v29  ;;  %v2973_v36 = vrot.slane %v2971_v49, 7  ;;  %v2133_v17 = vrot.slane %v1871_v30, 1  ;;  %v2904_v4 = vor.u32 %v2902_v18, %v2901_v52  ;;  %v8682_v49 = vld [vmem:[#allocation25_spill] sm:$0xff] }
 0x16e   : > { %v2053_v34 = vor.u32 %v2051_v21, %v2049_v13  ;;  %v2057_v10 = vrot.slane %v2055_v43, 1  ;;  %v1891_v14 = vsel %vm1516_vm15, %v7390_v11, 0  ;;  %v3049_v48 = vsel %vm1715_vm2, %v2989_v12, %v3048_v32 }
 0x16f   : > { %v2985_v41 = vsel %vm1715_vm2, %v2925_v9, %v2984_v33  ;;  %v2976_v37 = vor.u32 %v2974_v40, %v2973_v36  ;;  %v2134_v45 = vsel %vm2111_vm11, %v2131_v57, %v2133_v17  ;;  %v7601_v56 = vsel %vm1715_vm2, %v7551_v24, %v2904_v4 }
 0x170   : > { %v2058_v47 = vsel %vm8593_vm14, %v2053_v34, %v2057_v10  ;;  %v3035_v18 = vshrl.u32 %v2134_v45, 16  ;;  %v3038_v13 = vshll.u32 %v2134_v45, 16  ;;  %vm1856_vm12 = vcmp.ne.s16.totalorder %v8682_v49, 0  ;;  %4032 = vmatprep.mubr.bf16.mxu1 %v7601_v56 }
 0x171   : > { %v2977_v21 = vsel %vm1715_vm2, %v2917_v22, %v2976_v37  ;;  %v2955_v9 = vshrl.u32 %v2058_v47, 16  ;;  %v2958_v43 = vshll.u32 %v2058_v47, 16  ;;  %v3099_v12 = vshrl.u32 %v1891_v14, 16  ;;  %4194 = vmatmul.mubr.bf16.gmra.mrb[52].mxu0 %v2985_v41  ;;  %v8683_v41 = vld [vmem:[#allocation26_spill] sm:$0xff] }
 0x172   : > { %v3037_v40 = vrot.slane %v3035_v18, 7  ;;  %v3102_v57 = vshll.u32 %v1891_v14, 16  ;;  %v1532_v24 = vsel %vm8583_vm13, %v7282_v39, 0  ;;  %v2059_v30 = vshrl.u32 %v7395_v61, 16  ;;  %4201 = vmatprep.mubr.bf16.mxu0 %v3049_v48  ;;  %4033 = vmatmul.mubr.bf16.gmra.mrb[52].mxu1 %v2977_v21 }
 0x173   : > { %v2957_v45 = vrot.slane %v2955_v9, 7  ;;  %v3101_v33 = vrot.slane %v3099_v12, 7  ;;  %v3027_v32 = vshrl.u32 %v1532_v24, 16  ;;  %v3030_v4 = vshll.u32 %v1532_v24, 16 }
 0x174   : > { %v3040_v34 = vor.u32 %v3038_v13, %v3037_v40  ;;  %v2061_v22 = vor.u32 %v2059_v30, %v2057_v10  ;;  %v2063_v37 = vshll.u32 %v7390_v11, 16  ;;  %v1872_v14 = vsel %vm1855_vm7, %v7390_v11, 0 }
 0x175   : > { %vm8594_vm4 = vcmp.ne.s16.totalorder %v8683_v41, 0  ;;  %v2960_v47 = vor.u32 %v2958_v43, %v2957_v45  ;;  %v3104_v39 = vor.u32 %v3102_v57, %v3101_v33  ;;  %v3029_v18 = vrot.slane %v3027_v32, 7 }
 0x176   : > { %v2135_v63 = vrot.slane %v1872_v14, 1  ;;  %v3041_v48 = vsel %vm1715_vm2, %v2981_v29, %v3040_v34  ;;  %v2065_v21 = vrot.slane %v2063_v37, 1  ;;  %v1892_v13 = vsel %vm8588_vm1, %v7471_v7, 0  ;;  %v8685_v34 = vld [vmem:[#allocation28_spill] sm:$0xff] }
 0x177   : > { %v1533_v10 = vsel %vm1516_vm15, %v7395_v61, 0  ;;  %v7624_v9 = vsel %vm1715_vm2, %v2901_v52, %v2960_v47  ;;  %v3105_v12 = vsel %vm1715_vm2, %v3045_v20, %v3104_v39  ;;  %v3032_v43 = vor.u32 %v3030_v4, %v3029_v18 }
 0x178   : > { %8684 = vst [vmem:[#allocation15_spill] sm:$0xff] %v7624_v9  ;;  %v2136_v57 = vsel %vm2111_vm11, %v2133_v17, %v2135_v63  ;;  %4040 = vmatprep.mubr.bf16.mxu1 %v7624_v9  ;;  %v2066_v29 = vsel %vm8593_vm14, %v2061_v22, %v2065_v21  ;;  %v3155_v32 = vshrl.u32 %v1892_v13, 16  ;;  %vm1857_vm13 = vcmp.ne.s16.totalorder %v8685_v34, 0 }
 0x179   : > { %v3091_v24 = vshrl.u32 %v2136_v57, 16  ;;  %v3094_v30 = vshll.u32 %v2136_v57, 16  ;;  %v3033_v37 = vsel %vm1715_vm2, %v2973_v36, %v3032_v43  ;;  %v3011_v61 = vshrl.u32 %v2066_v29, 16  ;;  %4202 = vmatmul.mubr.bf16.gmra.mrb[56].mxu0 %v3041_v48 }
 0x17a   : > { %v3014_v14 = vshll.u32 %v2066_v29, 16  ;;  %v3158_v52 = vshll.u32 %v1892_v13, 16  ;;  %v3157_v20 = vrot.slane %v3155_v32, 7  ;;  %v3083_v4 = vshrl.u32 %v1533_v10, 16  ;;  %4209 = vmatprep.mubr.bf16.mxu0 %v3105_v12  ;;  %4041 = vmatmul.mubr.bf16.gmra.mrb[56].mxu1 %v3033_v37 }
 0x17b   : > { %v3093_v47 = vrot.slane %v3091_v24, 7  ;;  %v3086_v39 = vshll.u32 %v1533_v10, 16  ;;  %v3013_v17 = vrot.slane %v3011_v61, 7  ;;  %v2067_v22 = vshrl.u32 %v7390_v11, 16 }
 0x17c   : > { %v2071_v57 = vshll.u32 %v7471_v7, 16  ;;  %v1873_v15 = vsel %vm1856_vm12, %v7471_v7, 0  ;;  %v3160_v43 = vor.u32 %v3158_v52, %v3157_v20  ;;  %v3085_v29 = vrot.slane %v3083_v4, 7 }
 0x17d   : > { %v3096_v36 = vor.u32 %v3094_v30, %v3093_v47  ;;  %v2137_v13 = vrot.slane %v1873_v15, 1  ;;  %v3016_v48 = vor.u32 %v3014_v14, %v3013_v17  ;;  %v2069_v24 = vor.u32 %v2067_v22, %v2065_v21 }
 0x17e   : > { %v2073_v32 = vrot.slane %v2071_v57, 1  ;;  %v1893_v10 = vsel %vm8594_vm4, %v7469_v28, 0  ;;  %v3161_v37 = vsel %vm1715_vm2, %v3101_v33, %v3160_v43  ;;  %v3088_v61 = vor.u32 %v3086_v39, %v3085_v29 }
 0x17f   : > { %v3097_v12 = vsel %vm1715_vm2, %v3037_v40, %v3096_v36  ;;  %v2138_v9 = vsel %vm2111_vm11, %v2135_v63, %v2137_v13  ;;  %v7644_v49 = vsel %vm1715_vm2, %v2957_v45, %v3016_v48  ;;  %v3211_v22 = vshrl.u32 %v1893_v10, 16 }
 0x180   : > { %v2074_v30 = vsel %vm8593_vm14, %v2069_v24, %v2073_v32  ;;  %v3147_v15 = vshrl.u32 %v2138_v9, 16  ;;  %v3150_v14 = vshll.u32 %v2138_v9, 16  ;;  %4048 = vmatprep.mubr.bf16.mxu1 %v7644_v49  ;;  %v3089_v21 = vsel %vm1715_vm2, %v3029_v18, %v3088_v61 }
 0x181   : > { %v3067_v52 = vshrl.u32 %v2074_v30, 16  ;;  %v3070_v4 = vshll.u32 %v2074_v30, 16  ;;  %v3214_v57 = vshll.u32 %v1893_v10, 16  ;;  %v1534_v63 = vsel %vm8588_vm1, %v7390_v11, 0  ;;  %4210 = vmatmul.mubr.bf16.gmra.mrb[60].mxu0 %v3097_v12 }
 0x182   : > { %v3149_v40 = vrot.slane %v3147_v15, 7  ;;  %v2075_v45 = vshrl.u32 %v7471_v7, 16  ;;  %v7653_v39 = vrot.slane %v3211_v22, 7  ;;  %v3139_v9 = vshrl.u32 %v1534_v63, 16  ;;  %4217 = vmatprep.mubr.bf16.mxu0 %v3161_v37  ;;  %4049 = vmatmul.mubr.bf16.gmra.mrb[60].mxu1 %v3089_v21  ;;  %v8686_v37 = vld [vmem:[#allocation20_spill] sm:$0xff]  ;;  %v8687_v21 = vld [vmem:[#allocation14_spill] sm:$0xff] }
 0x183   : > { %v3069_v33 = vrot.slane %v3067_v52, 7  ;;  %v3142_v36 = vshll.u32 %v1534_v63, 16  ;;  %v2079_v48 = vshll.u32 %v7469_v28, 16  ;;  %v7659_v24 = vsel %vm1857_vm13, %v7469_v28, 0  ;;  %v8689_v52 = vld [vmem:[#allocation29_spill] sm:$0xff] }
 0x184   : > { %v3152_v18 = vor.u32 %v3150_v14, %v3149_v40  ;;  %v2077_v43 = vor.u32 %v2075_v45, %v2073_v32  ;;  %v3216_v10 = vor.u32 %v3214_v57, %v7653_v39  ;;  %v3141_v12 = vrot.slane %v3139_v9, 7 }
 0x185   : > { %v3072_v11 = vor.u32 %v3070_v4, %v3069_v33  ;;  %v8589_v61 = vrot.slane %v7659_v24, 1  ;;  %v2081_v15 = vrot.slane %v2079_v48, 1  ;;  %v8688_v14 = vshrl.u32 %v8687_v21, 16 }
 0x186   : > { %v3153_v30 = vsel %vm1715_vm2, %v3093_v47, %v3152_v18  ;;  %v1497_v22 = vshll.u32 %v8689_v52, 16  ;;  %v3217_v45 = vsel %vm1715_vm2, %v3157_v20, %v3216_v10  ;;  %v3144_v4 = vor.u32 %v3142_v36, %v3141_v12 }
 0x187   : > { %v1495_v32 = vor.u32 %v8688_v14, %v8686_v37  ;;  %v7669_v63 = vsel %vm1715_vm2, %v3013_v17, %v3072_v11  ;;  %v2140_v57 = vsel %vm2111_vm11, %v2137_v13, %v8589_v61  ;;  %v2082_v47 = vsel %vm8593_vm14, %v2077_v43, %v2081_v15 }
 0x188   : > { %4056 = vmatprep.mubr.bf16.mxu1 %v7669_v63  ;;  %v3203_v9 = vshrl.u32 %v2140_v57, 16  ;;  %v3206_v18 = vshll.u32 %v2140_v57, 16  ;;  %v1499_v48 = vrot.slane %v1497_v22, 1  ;;  %v3145_v37 = vsel %vm1715_vm2, %v3085_v29, %v3144_v4  ;;  %v8690_v4 = vld [vmem:[#allocation27_spill] sm:$0xff] }
 0x189   : > { %v3123_v21 = vshrl.u32 %v2082_v47, 16  ;;  %v3126_v14 = vshll.u32 %v2082_v47, 16  ;;  %v1535_v20 = vsel %vm8594_vm4, %v7471_v7, 0  ;;  %4218 = vmatmul.mubr.bf16.gmra.mrb[64].mxu0 %v3153_v30  ;;  %v2083_v10 = vshrl.u32 %v7469_v28, 16 }
 0x18a   : > { %v7681_v17 = vrot.slane %v3203_v9, 7  ;;  %v7684_v36 = vsel %vm8593_vm14, %v1495_v32, %v1499_v48  ;;  %v3195_v13 = vshrl.u32 %v1535_v20, 16  ;;  %v3198_v11 = vshll.u32 %v1535_v20, 16  ;;  %4225 = vmatprep.mubr.bf16.mxu0 %v3217_v45  ;;  %4057 = vmatmul.mubr.bf16.gmra.mrb[64].mxu1 %v3145_v37 }
 0x18b   : > { %v3125_v43 = vrot.slane %v3123_v21, 7  ;;  %vm8592_vm1 = vcmp.ne.s16.totalorder %v7684_v36, 0  ;;  %v2087_v29 = vshll.u32 %v7558_v42, 16  ;;  %v8691_v57 = vshrl.u32 %v8690_v4, 16 }
 0x18c   : > { %v3208_v22 = vor.u32 %v3206_v18, %v7681_v17  ;;  %v1894_v7 = vsel %vm8592_vm1, %v7558_v42, 0  ;;  %v7693_v32 = vrot.slane %v3195_v13, 7  ;;  %v2085_v20 = vor.u32 %v2083_v10, %v2081_v15 }
 0x18d   : > { %v7697_v30 = vrot.slane %v8691_v57, 7  ;;  %v3128_v47 = vor.u32 %v3126_v14, %v3125_v43  ;;  %v3267_v9 = vshrl.u32 %v1894_v7, 16  ;;  %v3270_v21 = vshll.u32 %v1894_v7, 16 }
 0x18e   : > { %v3209_v61 = vsel %vm1715_vm2, %v3149_v40, %v3208_v22  ;;  %v3200_v45 = vor.u32 %v3198_v11, %v7693_v32  ;;  %v2089_v37 = vrot.slane %v2087_v29, 1  ;;  %v1839_v18 = vshll.u32 %v8690_v4, 16 }
 0x18f   : > { %v7703_v41 = vsel %vm1715_vm2, %v3069_v33, %v3128_v47  ;;  %v7705_v13 = vrot.slane %v3267_v9, 7  ;;  %v1501_v31 = vshrl.u32 %v8689_v52, 16  ;;  %v1536_v14 = vsel %vm8592_vm1, %v7469_v28, 0  ;;  %v8693_v52 = vld [vmem:[#allocation18_spill] sm:$0xff] }
 0x190   : > { %4064 = vmatprep.mubr.bf16.mxu1 %v7703_v41  ;;  %v3201_v40 = vsel %vm1715_vm2, %v3141_v12, %v3200_v45  ;;  %v2090_v15 = vsel %vm8593_vm14, %v2085_v20, %v2089_v37  ;;  %v1841_v11 = vor.u32 %v1839_v18, %v7697_v30  ;;  %v3251_v10 = vshrl.u32 %v1536_v14, 16 }
 0x191   : > { %v3272_v33 = vor.u32 %v3270_v21, %v7705_v13  ;;  %v3179_v29 = vshrl.u32 %v2090_v15, 16  ;;  %v3182_v22 = vshll.u32 %v2090_v15, 16  ;;  %v7716_v7 = vor.u32 %v1501_v31, %v1499_v48  ;;  %4226 = vmatmul.mubr.bf16.gmra.mrb[68].mxu0 %v3209_v61  ;;  %v1538_v21 = vld [vmem:[#allocation2 + $0x88] sm:$0x1] }
 0x192   : > { %v7720_v4 = vsel %vm1715_vm2, %v8693_v52, %v1841_v11  ;;  %v7722_v28 = vrot.slane %v3251_v10, 7  ;;  %v3254_v57 = vshll.u32 %v1536_v14, 16  ;;  %v2091_v12 = vshrl.u32 %v7558_v42, 16  ;;  %4065 = vmatmul.mubr.bf16.gmra.mrb[68].mxu1 %v3201_v40 }
 0x193   : > { %8692 = vst [vmem:[#allocation17_spill] sm:$0xff] %v7716_v7  ;;  %v3273_v47 = vsel %vm1715_vm2, %v7653_v39, %v3272_v33  ;;  %v7727_v9 = vrot.slane %v3179_v29, 7  ;;  %vm1858_vm1 = vcmp.ne.s16.totalorder %v7720_v4, 0  ;;  %vm1520_vm14 = vcmp.ne.s16.totalorder %v7716_v7, 0 }
 0x194   : > { %4233 = vmatprep.mubr.bf16.mxu0 %v3273_v47  ;;  %v1875_v31 = vsel %vm1858_vm1, %v7558_v42, 0  ;;  %v1895_v48 = vsel %vm1520_vm14, %v7553_v54, 0  ;;  %v7737_v61 = vor.u32 %v2091_v12, %v2089_v37  ;;  %v3256_v18 = vor.u32 %v3254_v57, %v7722_v28 }
 0x195   : > { %v3184_v39 = vor.u32 %v3182_v22, %v7727_v9  ;;  %v2141_v20 = vrot.slane %v1875_v31, 1  ;;  %v3331_v45 = vshrl.u32 %v1895_v48, 16  ;;  %v3334_v14 = vshll.u32 %v1895_v48, 16 }
 0x196   : > { %v3315_v40 = vshrl.u32 %v7737_v61, 16  ;;  %v3318_v15 = vshll.u32 %v7737_v61, 16  ;;  %vm1859_vm4 = vcmp.ne.s16.totalorder %v7697_v30, 0  ;;  %v8695_v54 = vrot.slane %v7659_v24, 1 }
 0x197   : > { %v7745_v11 = vsel %vm1715_vm2, %v3125_v43, %v3184_v39  ;;  %v3333_v10 = vrot.slane %v3331_v45, 7  ;;  %v1876_v33 = vsel %vm1859_vm4, %v1538_v21, 0  ;;  %v1537_v12 = vsel %vm1520_vm14, %v7558_v42, 0  ;;  %v6441_v43 = vld [vmem:[#allocation2 + $0x10] sm:$0xff] }
 0x198   : > { %8694 = vst [vmem:[#allocation21_spill] sm:$0xff] %v7745_v11  ;;  %v2142_v37 = vsel %vm2111_vm11, %v8695_v54, %v2141_v20  ;;  %4072 = vmatprep.mubr.bf16.mxu1 %v7745_v11  ;;  %v3317_v52 = vrot.slane %v3315_v40, 7  ;;  %v2143_v57 = vrot.slane %v1876_v33, 1  ;;  %v1897_v24 = vsel %vm1843_vm3, %v6441_v43, 0  ;;  %v6442_v43 = vld [vmem:[#allocation2 + $0x18] sm:$0xff] }
 0x199   : > { %v3259_v29 = vshrl.u32 %v2142_v37, 16  ;;  %v3262_v22 = vshll.u32 %v2142_v37, 16  ;;  %v3307_v45 = vshrl.u32 %v1537_v12, 16  ;;  %v3336_v21 = vor.u32 %v3334_v14, %v3333_v10 }
 0x19a   : > { %v3320_v48 = vor.u32 %v3318_v15, %v3317_v52  ;;  %v2144_v39 = vsel %vm2111_vm11, %v2141_v20, %v2143_v57  ;;  %v3257_v54 = vsel %vm1715_vm2, %v7693_v32, %v3256_v18  ;;  %v3310_v11 = vshll.u32 %v1537_v12, 16  ;;  %v1914_v52 = vld [vmem:[#allocation2 + $0x10] sm:$0x80] }
 0x19b   : > { %v3261_v31 = vrot.slane %v3259_v29, 7  ;;  %v3323_v37 = vshrl.u32 %v2144_v39, 16  ;;  %4073 = vmatmul.mubr.bf16.gmra.mrb[72].mxu1 %v3257_v54  ;;  %v3309_v7 = vrot.slane %v3307_v45, 7  ;;  %v3326_v47 = vshll.u32 %v2144_v39, 16 }
 0x19c   : > { %v3321_v33 = vsel %vm1715_vm2, %v7727_v9, %v3320_v48  ;;  %v1898_v15 = vsel %vm1844_vm10, %v6442_v43, 0  ;;  %v2170_v20 = vrot.slane %v1897_v24, 1  ;;  %v2497_v57 = vshrl.u32 %v7180_v6, 16 }
 0x19d   : > { %v3264_v40 = vor.u32 %v3262_v22, %v3261_v31  ;;  %4080 = vmatprep.mubr.bf16.mxu1 %v3321_v33  ;;  %v3325_v10 = vrot.slane %v3323_v37, 7  ;;  %v3312_v32 = vor.u32 %v3310_v11, %v3309_v7  ;;  %v2171_v18 = vrot.slane %v1898_v15, 1  ;;  %v6443_v37 = vld [vmem:[#allocation2 + $0x20] sm:$0xff]  ;;  %v6444_v15 = vld [vmem:[#allocation2 + $0x28] sm:$0xff] }
 0x19e   : > { %v3337_v22 = vsel %vm1715_vm2, %v7705_v13, %v3336_v21  ;;  %v2473_v48 = vshrl.u32 %v2170_v20, 16  ;;  %v1917_v24 = vsel %vm1505_vm6, %v6442_v43, 0  ;;  %v1916_v11 = vsel %vm1504_vm0, %v1914_v52, 0 }
 0x19f   : > { %v3265_v14 = vsel %vm1715_vm2, %v7681_v17, %v3264_v40  ;;  %v2172_v12 = vsel %vm2111_vm11, %v2170_v20, %v2171_v18  ;;  %v3328_v54 = vor.u32 %v3326_v47, %v3325_v10  ;;  %v3313_v17 = vsel %vm1715_vm2, %v7722_v28, %v3312_v32  ;;  %v8702_v28 = vld [vmem:[#allocation30_spill] sm:$0xff] }
 0x1a0   : > { %4234 = vmatmul.mubr.bf16.gmra.mrb[72].mxu0 %v3265_v14  ;;  %v2477_v39 = vshrl.u32 %v2172_v12, 16  ;;  %v1899_v21 = vsel %vm1845_vm9, %v6443_v37, 0  ;;  %v2480_v6 = vshll.u32 %v2172_v12, 16  ;;  %v1900_v14 = vsel %vm1846_vm5, %v6444_v15, 0 }
 0x1a1   : > { %4241 = vmatprep.mubr.bf16.mxu0 %v3337_v22  ;;  %v2173_v33 = vrot.slane %v1899_v21, 1  ;;  %v2499_v22 = vrot.slane %v2497_v57, 7  ;;  %v2475_v47 = vrot.slane %v2473_v48, 7  ;;  %v2489_v43 = vshrl.u32 %v1917_v24, 16 }
 0x1a2   : > { %v2479_v40 = vrot.slane %v2477_v39, 7  ;;  %v2461_v32 = vshrl.u32 %v8702_v28, 16  ;;  %v2175_v45 = vrot.slane %v1900_v14, 1  ;;  %v3329_v7 = vsel %vm1715_vm2, %v3261_v31, %v3328_v54 }
 0x1a3   : > { %4081 = vmatmul.mubr.bf16.gmra.mrb[76].mxu1 %v3313_v17  ;;  %v2174_v52 = vsel %vm2111_vm11, %v2171_v18, %v2173_v33  ;;  %v2485_v13 = vshrl.u32 %v1916_v11, 16  ;;  %v2507_v12 = vsel %vm1715_vm2, %v2499_v22, %v7306_v0  ;;  %v1918_v48 = vsel %vm1506_vm8, %v6443_v37, 0  ;;  %v6445_v11 = vld [vmem:[#allocation2 + $0x30] sm:$0xff]  ;;  %v8705_v37 = vld [vmem:[#allocation31_spill] sm:$0xff] }
 0x1a4   : > { %v2482_v10 = vor.u32 %v2480_v6, %v2479_v40  ;;  %v2547_v39 = vshrl.u32 %v2174_v52, 16  ;;  %v2176_v17 = vsel %vm2111_vm11, %v2173_v33, %v2175_v45  ;;  %v2491_v6 = vrot.slane %v2489_v43, 7 }
 0x1a5   : > { %v2550_v14 = vshll.u32 %v2174_v52, 16  ;;  %v2603_v28 = vshrl.u32 %v2176_v17, 16  ;;  %v2492_v31 = vshll.u32 %v1917_v24, 16  ;;  %v2463_v54 = vrot.slane %v2461_v32, 7 }
 0x1a6   : > { %v2483_v21 = vsel %vm1715_vm2, %v2475_v47, %v2482_v10  ;;  %v2549_v18 = vrot.slane %v2547_v39, 7  ;;  %vm8704_vm0 = vcmp.ne.s16.totalorder %v6950_v55, 0  ;;  %v2487_v0 = vrot.slane %v2485_v13, 7  ;;  %v6425_v10 = vld [vmem:[#allocation3 + $0x208] sm:$0xff]  }
 0x1a7   : > { %4282 = vmatprep.mubr.bf16.mxu1 %v2483_v21  ;;  %v2555_v47 = vshrl.u32 %v1918_v48, 16  ;;  %v2471_v33 = vsel %vm1715_vm2, %v2463_v54, %v8705_v37  ;;  %v2605_v52 = vrot.slane %v2603_v28, 7  ;;  %v2606_v39 = vshll.u32 %v2176_v17, 16 }
 0x1a8   : > { %4242 = vmatmul.mubr.bf16.gmra.mrb[76].mxu0 %v3329_v7  ;;  %v1901_v7 = vsel %vm8704_vm0, %v6445_v11, 0  ;;  %v2552_v22 = vor.u32 %v2550_v14, %v2549_v18  ;;  %v2558_v21 = vshll.u32 %v1918_v48, 16  ;;  %v6446_v14 = vld [vmem:[#allocation2 + $0x38] sm:$0xff]  ;;  %vm8706_vm6 = vcmp.ne.s16.totalorder %v6958_v59, 0 }
 0x1a9   : > { %4443 = vmatprep.mubr.bf16.mxu0 %v2507_v12  ;;  %v2177_v57 = vrot.slane %v1901_v7, 1  ;;  %v2494_v12 = vor.u32 %v2492_v31, %v2491_v6  ;;  %v2557_v32 = vrot.slane %v2555_v47, 7  ;;  %v1902_v54 = vsel %vm8706_vm6, %v6446_v14, 0  ;;  %v6426_v31 = vld [vmem:[#allocation3 + $0x210] sm:$0xff]   ;;  %v6427_v48 = vld [vmem:[#allocation3 + $0x218] sm:$0xff]  }
 0x1aa   : > { %v2553_v43 = vsel %vm1715_vm2, %v2479_v40, %v2552_v22  ;;  %vm8707_vm8 = vcmp.ne.s16.totalorder %v6818_v58, 0  ;;  %vm8708_vm0 = vcmp.ne.s16.totalorder %v6965_v3, 0 }
 0x1ab   : > { %4283 = vmatmul.mubr.bf16.vlgmr.msra.gmra.mrb[80].mxu1 %v2471_v33  ;;  %v2178_v24 = vsel %vm2111_vm11, %v2175_v45, %v2177_v57  ;;  %v2495_v13 = vsel %vm1715_vm2, %v2487_v0, %v2494_v12  ;;  %v1919_v40 = vsel %vm8707_vm8, %v6444_v15, 0  ;;  %v2179_v45 = vrot.slane %v1902_v54, 1 }
 0x1ac   : > { %6223 = vmatpush3.bf16.msra.mxu1 %v7379_v38  ;;  %4290 = vmatprep.mubr.bf16.mxu1 %v2553_v43  ;;  %v2608_v38 = vor.u32 %v2606_v39, %v2605_v52  ;;  %v2659_v17 = vshrl.u32 %v2178_v24, 16  ;;  %v2560_v28 = vor.u32 %v2558_v21, %v2557_v32  ;;  %v2611_v7 = vshrl.u32 %v1919_v40, 16  ;;  %v6428_v43 = vld [vmem:[#allocation3 + $0x220] sm:$0xff]  }
 0x1ad   : > { %6224 = vmatprep.subr.bf16.mxu1 %v6425_v10  ;;  %v2614_v47 = vshll.u32 %v1919_v40, 16  ;;  %v2180_v58 = vsel %vm2111_vm11, %v2177_v57, %v2179_v45  ;;  %v2662_v33 = vshll.u32 %v2178_v24, 16  ;;  %v6429_v24 = vld [vmem:[#allocation3 + $0x228] sm:$0xff]   ;;  %vm8711_vm8 = vcmp.ne.s16.totalorder %v6974_v26, 0 }
 0x1ae   : > { %v2609_v0 = vsel %vm1715_vm2, %v2549_v18, %v2608_v38  ;;  %v2661_v22 = vrot.slane %v2659_v17, 7  ;;  %v2561_v15 = vsel %vm1715_vm2, %v2491_v6, %v2560_v28  ;;  %v2613_v37 = vrot.slane %v2611_v7, 7  ;;  %v6448_v7 = vld [vmem:[#allocation2 + $0x48] sm:$0xff] }
 0x1af   : > { %v2718_v40 = vshll.u32 %v2180_v58, 16 }
 0x1b0   : > { %4444 = vmatmul.mubr.bf16.vlgmr.msra.gmra.mrb[80].mxu0 %v2495_v13  ;;  %6225 = vmatpush3.bf16.msra.mxu1 %v6425_v10  ;;  %v6447_v10 = vld [vmem:[#allocation2 + $0x40] sm:$0xff]  ;;  %v2664_v39 = vor.u32 %v2662_v33, %v2661_v22  ;;  %v2715_v13 = vshrl.u32 %v2180_v58, 16  ;;  %v2616_v21 = vor.u32 %v2614_v47, %v2613_v37 }
 0x1b1   : > { %4451 = vmatprep.mubr.bf16.mxu0 %v7362_v53  ;;  %6226 = vmatprep.subr.bf16.mxu1 %v6426_v31  ;;  %v1903_v12 = vsel %vm8708_vm0, %v6447_v10, 0  ;;  %vm8712_vm0 = vcmp.ne.s16.totalorder %v6954_v25, 0 }
 0x1b2   : > { %v2181_v57 = vrot.slane %v1903_v12, 1  ;;  %v2665_v54 = vsel %vm1715_vm2, %v2605_v52, %v2664_v39  ;;  %v6449_v39 = vld [vmem:[#allocation2 + $0x50] sm:$0xff] }
 0x1b3   : > { %4291 = vmatmul.mubr.bf16.gmra.mrb[84].mxu1 %v7321_v2  ;;  %v8709_v2 = vld [vmem:[#allocation13_spill] sm:$0xff] }
 0x1b4   : > { %4298 = vmatprep.mubr.bf16.mxu1 %v2609_v0  ;;  %6227 = vmatpush3.bf16.msra.mxu1 %v6426_v31  ;;  %vm8710_vm6 = vcmp.ne.s16.totalorder %v8709_v2, 0  ;;  %v2717_v31 = vrot.slane %v2715_v13, 7  ;;  %v2182_v38 = vsel %vm2111_vm11, %v2179_v45, %v2181_v57  ;;  %v6430_v0 = vld [vmem:[#allocation3 + $0x230] sm:$0xff]  }
 0x1b5   : > { %6228 = vmatprep.subr.bf16.mxu1 %v6427_v48  ;;  %v1920_v18 = vsel %vm8710_vm6, %v6445_v11, 0  ;;  %v2617_v11 = vsel %vm1715_vm2, %v2557_v32, %v2616_v21  ;;  %v2771_v47 = vshrl.u32 %v2182_v38, 16  ;;  %vm8713_vm6 = vcmp.ne.s16.totalorder %v6991_v46, 0 }
 0x1b6   : > { %v2667_v6 = vshrl.u32 %v1920_v18, 16  ;;  %v2670_v28 = vshll.u32 %v1920_v18, 16  ;;  %v2720_v52 = vor.u32 %v2718_v40, %v2717_v31  ;;  %v1905_v13 = vsel %vm8713_vm6, %v6449_v39, 0 }
 0x1b7   : > { %v2773_v12 = vrot.slane %v2771_v47, 7  ;;  %vm8716_vm6 = vcmp.ne.s16.totalorder %v6968_v5, 0 }
 0x1b8   : > { %4452 = vmatmul.mubr.bf16.gmra.mrb[84].mxu0 %v2561_v15  ;;  %6229 = vmatpush3.bf16.msra.mxu1 %v6427_v48  ;;  %v2669_v17 = vrot.slane %v2667_v6, 7  ;;  %v1904_v48 = vsel %vm8711_vm8, %v6448_v7, 0  ;;  %v6431_v15 = vld [vmem:[#allocation3 + $0x238] sm:$0xff]   ;;  %v2721_v33 = vsel %vm1715_vm2, %v2661_v22, %v2720_v52  ;;  %vm8714_vm8 = vcmp.ne.s16.totalorder %v6961_v1, 0 }
 0x1b9   : > { %4459 = vmatprep.mubr.bf16.mxu0 %v7409_v51  ;;  %6230 = vmatprep.subr.bf16.mxu1 %v6428_v43  ;;  %v2183_v45 = vrot.slane %v1904_v48, 1  ;;  %v2185_v6 = vrot.slane %v1905_v13, 1 }
 0x1ba   : > { %v2672_v58 = vor.u32 %v2670_v28, %v2669_v17  ;;  %v6450_v28 = vld [vmem:[#allocation2 + $0x58] sm:$0xff] }
 0x1bb   : > { %4299 = vmatmul.mubr.bf16.gmra.mrb[88].mxu1 %v7362_v53  ;;  %v1921_v53 = vsel %vm8712_vm0, %v6446_v14, 0  ;;  %v2184_v25 = vsel %vm2111_vm11, %v2181_v57, %v2183_v45  ;;  %vm8715_vm0 = vcmp.ne.s16.totalorder %v8674_v23, 0 }
 0x1bc   : > { %4306 = vmatprep.mubr.bf16.mxu1 %v2665_v54  ;;  %6231 = vmatpush3.bf16.msra.mxu1 %v6428_v43  ;;  %v2723_v32 = vshrl.u32 %v1921_v53, 16  ;;  %v2774_v43 = vshll.u32 %v2182_v38, 16  ;;  %v2673_v14 = vsel %vm1715_vm2, %v2613_v37, %v2672_v58  ;;  %v2726_v18 = vshll.u32 %v1921_v53, 16 }
 0x1bd   : > { %6232 = vmatprep.subr.bf16.mxu1 %v6429_v24  ;;  %v2827_v21 = vshrl.u32 %v2184_v25, 16  ;;  %v2830_v40 = vshll.u32 %v2184_v25, 16  ;;  %v2186_v38 = vsel %vm2111_vm11, %v2183_v45, %v2185_v6  ;;  %v1906_v48 = vsel %vm8715_vm0, %v6450_v28, 0 }
 0x1be   : > { %v2725_v2 = vrot.slane %v2723_v32, 7  ;;  %v2776_v22 = vor.u32 %v2774_v43, %v2773_v12  ;;  %v2187_v53 = vrot.slane %v1906_v48, 1  ;;  %v2886_v58 = vshll.u32 %v2186_v38, 16 }
 0x1bf   : > { %v2829_v54 = vrot.slane %v2827_v21, 7  ;;  %vm8718_vm0 = vcmp.ne.s16.totalorder %v6988_v27, 0 }
 0x1c0   : > { %4460 = vmatmul.mubr.bf16.gmra.mrb[88].mxu0 %v2617_v11  ;;  %6233 = vmatpush3.bf16.msra.mxu1 %v6429_v24  ;;  %v2728_v57 = vor.u32 %v2726_v18, %v2725_v2  ;;  %v2777_v37 = vsel %vm1715_vm2, %v2717_v31, %v2776_v22  ;;  %v2883_v31 = vshrl.u32 %v2186_v38, 16  ;;  %v2188_v32 = vsel %vm2111_vm11, %v2185_v6, %v2187_v53 }
 0x1c1   : > { %4467 = vmatprep.mubr.bf16.mxu0 %v7449_v44  ;;  %6234 = vmatprep.subr.bf16.mxu1 %v6430_v0  ;;  %v1924_v25 = vsel %vm8718_vm0, %v6449_v39, 0  ;;  %v2942_v22 = vshll.u32 %v2188_v32, 16 }
 0x1c2   : > { %v2729_v1 = vsel %vm1715_vm2, %v2669_v17, %v2728_v57  ;;  %v2885_v45 = vrot.slane %v2883_v31, 7  ;;  %v2891_v13 = vshrl.u32 %v1924_v25, 16  ;;  %v2894_v39 = vshll.u32 %v1924_v25, 16  ;;  %v6452_v57 = vld [vmem:[#allocation2 + $0x68] sm:$0xff]  ;;  %v6453_v31 = vld [vmem:[#allocation2 + $0x70] sm:$0xff] }
 0x1c3   : > { %4307 = vmatmul.mubr.bf16.gmra.mrb[92].mxu1 %v7409_v51  ;;  %v1922_v51 = vsel %vm8714_vm8, %v6447_v10, 0  ;;  %vm8717_vm8 = vcmp.ne.s16.totalorder %v8676_v50, 0 }
 0x1c4   : > { %4314 = vmatprep.mubr.bf16.mxu1 %v2721_v33  ;;  %6235 = vmatpush3.bf16.msra.mxu1 %v6430_v0  ;;  %v2779_v24 = vshrl.u32 %v1922_v51, 16  ;;  %v2782_v11 = vshll.u32 %v1922_v51, 16  ;;  %v1923_v0 = vsel %vm8716_vm6, %v6448_v7, 0  ;;  %v6451_v33 = vld [vmem:[#allocation2 + $0x60] sm:$0xff]  ;;  %v2893_v27 = vrot.slane %v2891_v13, 7 }
 0x1c5   : > { %6236 = vmatprep.subr.bf16.mxu1 %v6431_v15  ;;  %v2835_v47 = vshrl.u32 %v1923_v0, 16  ;;  %v2838_v7 = vshll.u32 %v1923_v0, 16  ;;  %v1907_v43 = vsel %vm8717_vm8, %v6451_v33, 0  ;;  %vm8719_vm6 = vcmp.ne.s16.totalorder %v8678_v19, 0 }
 0x1c6   : > { %v2781_v10 = vrot.slane %v2779_v24, 7  ;;  %v1908_v24 = vsel %vm8719_vm6, %v6452_v57, 0  ;;  %vm8720_vm8 = vcmp.ne.s16.totalorder %v6994_v62, 0  ;;  %v2896_v38 = vor.u32 %v2894_v39, %v2893_v27 }
 0x1c7   : > { %v2837_v5 = vrot.slane %v2835_v47, 7 }
 0x1c8   : > { %4468 = vmatmul.mubr.bf16.gmra.mrb[92].mxu0 %v2673_v14  ;;  %6237 = vmatpush3.bf16.msra.mxu1 %v6431_v15  ;;  %v2784_v52 = vor.u32 %v2782_v11, %v2781_v10  ;;  %v2189_v14 = vrot.slane %v1907_v43, 1 }
 0x1c9   : > { %4475 = vmatprep.mubr.bf16.mxu0 %v7482_v35  ;;  %v2840_v18 = vor.u32 %v2838_v7, %v2837_v5 }
 0x1ca   : > { %v2785_v15 = vsel %vm1715_vm2, %v2725_v2, %v2784_v52  ;;  %v2190_v21 = vsel %vm2111_vm11, %v2187_v53, %v2189_v14  ;;  %v1909_v53 = vsel %vm1855_vm7, %v6453_v31, 0  ;;  %v8721_v52 = vld [vmem:[#allocation16_spill] sm:$0xff] }
 0x1cb   : > { %4315 = vmatmul.mubr.bf16.gmra.mrb[96].mxu1 %v7449_v44  ;;  %v2832_v44 = vor.u32 %v2830_v40, %v2829_v54  ;;  %v2841_v6 = vsel %vm1715_vm2, %v2781_v10, %v2840_v18  ;;  %v2191_v40 = vrot.slane %v1908_v24, 1  ;;  %v2998_v48 = vshll.u32 %v2190_v21, 16 }
 0x1cc   : > { %4322 = vmatprep.mubr.bf16.mxu1 %v2777_v37  ;;  %v1925_v37 = vsel %vm8720_vm8, %v6450_v28, 0  ;;  %vm8722_vm0 = vcmp.ne.s16.totalorder %v8721_v52, 0 }
 0x1cd   : > { %v2833_v17 = vsel %vm1715_vm2, %v2773_v12, %v2832_v44  ;;  %v2939_v12 = vshrl.u32 %v2188_v32, 16  ;;  %v2192_v0 = vsel %vm2111_vm11, %v2189_v14, %v2191_v40  ;;  %v2897_v44 = vsel %vm1715_vm2, %v2837_v5, %v2896_v38  ;;  %v6454_v14 = vld [vmem:[#allocation2 + $0x78] sm:$0xff] }
 0x1ce   : > { %v2950_v28 = vshll.u32 %v1925_v37, 16  ;;  %v1926_v47 = vsel %vm8722_vm0, %v6451_v33, 0  ;;  %v3054_v43 = vshll.u32 %v2192_v0, 16  ;;  %v1910_v13 = vsel %vm1856_vm12, %v6454_v14, 0 }
 0x1cf   : > { %v2941_v51 = vrot.slane %v2939_v12, 7  ;;  %v3006_v33 = vshll.u32 %v1926_v47, 16  ;;  %vm8732_vm0 = vsmask.f32 7424 }
 0x1d0   : > { %4476 = vmatmul.mubr.bf16.gmra.mrb[96].mxu0 %v2729_v1  ;;  %v2947_v1 = vshrl.u32 %v1925_v37, 16 }
 0x1d1   : > { %4483 = vmatprep.mubr.bf16.mxu0 %v7528_v60 }
 0x1d2   : > { %v2949_v62 = vrot.slane %v2947_v1, 7 }
 0x1d3   : > { %4323 = vmatmul.mubr.bf16.gmra.mrb[100].mxu1 %v7482_v35  ;;  %v2888_v35 = vor.u32 %v2886_v58, %v2885_v45  ;;  %v2193_v58 = vrot.slane %v1909_v53, 1 }
 0x1d4   : > { %4330 = vmatprep.mubr.bf16.mxu1 %v2833_v17  ;;  %v2952_v32 = vor.u32 %v2950_v28, %v2949_v62  ;;  %v7890_v28 = vsel %vm1857_vm13, %v7558_v42, 0 }
 0x1d5   : > { %v2889_v2 = vsel %vm1715_vm2, %v2829_v54, %v2888_v35  ;;  %v2995_v54 = vshrl.u32 %v2190_v21, 16  ;;  %v2194_v25 = vsel %vm2111_vm11, %v2191_v40, %v2193_v58  ;;  %v2195_v21 = vrot.slane %v1910_v13, 1 }
 0x1d6   : > { %v2953_v35 = vsel %vm1715_vm2, %v2893_v27, %v2952_v32  ;;  %v1928_v40 = vsel %vm1516_vm15, %v6453_v31, 0  ;;  %v2197_v42 = vrot.slane %v7890_v28, 1 }
 0x1d7   : > { %v2997_v11 = vrot.slane %v2995_v54, 7  ;;  %v2196_v1 = vsel %vm2111_vm11, %v2193_v58, %v2195_v21  ;;  %v3115_v52 = vshrl.u32 %v1928_v40, 16  ;;  %v3118_v13 = vshll.u32 %v1928_v40, 16 }
 0x1d8   : > { %4484 = vmatmul.mubr.bf16.gmra.mrb[100].mxu0 %v2785_v15  ;;  %v3003_v15 = vshrl.u32 %v1926_v47, 16  ;;  %v7892_v47 = vld [vmem:[#allocation2 + $0x88] sm:$0xff]  ;;  %v3163_v32 = vshrl.u32 %v2196_v1, 16 }
 0x1d9   : > { %4491 = vmatprep.mubr.bf16.mxu0 %v7569_v16  ;;  %v3000_v17 = vor.u32 %v2998_v48, %v2997_v11  ;;  %v7921_v54 = vsel %vm1858_vm1, %v7892_v47, 0 }
 0x1da   : > { %v3005_v12 = vrot.slane %v3003_v15, 7 }
 0x1db   : > { %4331 = vmatmul.mubr.bf16.gmra.mrb[104].mxu1 %v7528_v60  ;;  %v2944_v60 = vor.u32 %v2942_v22, %v2941_v51  ;;  %v3001_v5 = vsel %vm1715_vm2, %v2941_v51, %v3000_v17  ;;  %v3107_v51 = vshrl.u32 %v2194_v25, 16 }
 0x1dc   : > { %4338 = vmatprep.mubr.bf16.mxu1 %v2889_v2  ;;  %v8725_v2 = vld [vmem:[#allocation19_spill] sm:$0xff] }
 0x1dd   : > { %v2945_v10 = vsel %vm1715_vm2, %v2885_v45, %v2944_v60  ;;  %v3051_v45 = vshrl.u32 %v2192_v0, 16  ;;  %vm8726_vm6 = vcmp.ne.s16.totalorder %v8725_v2, 0  ;;  %v7877_v37 = vrot.slane %v3107_v51, 7 }
 0x1de   : > { %v1927_v22 = vsel %vm8726_vm6, %v6452_v57, 0  ;;  %v3110_v60 = vshll.u32 %v2194_v25, 16  ;;  %v8728_v25 = vld [vmem:[#allocation24_spill] sm:$0xff]  ;;  %v3166_v51 = vshll.u32 %v2196_v1, 16  ;;  %v2150_v1 = vshrl.u32 %v7892_v47, 16 }
 0x1df   : > { %v3053_v7 = vrot.slane %v3051_v45, 7  ;;  %v3059_v39 = vshrl.u32 %v1927_v22, 16  ;;  %v3062_v57 = vshll.u32 %v1927_v22, 16  ;;  %vm8729_vm15 = vcmp.ne.s16.totalorder %v8728_v25, 0 }
 0x1e0   : > { %4492 = vmatmul.mubr.bf16.gmra.mrb[104].mxu0 %v2841_v6  ;;  %v3008_v6 = vor.u32 %v3006_v33, %v3005_v12  ;;  %v7903_v33 = vrot.slane %v3115_v52, 7  ;;  %vm8733_vm6 = vcmp.ne.s16.totalorder %v7684_v36, 0 }
 0x1e1   : > { %4499 = vmatprep.mubr.bf16.mxu0 %v7601_v56  ;;  %v7883_v48 = vrot.slane %v3059_v39, 7 }
 0x1e2   : > { %v3120_v40 = vor.u32 %v3118_v13, %v7903_v33 }
 0x1e3   : > { %4339 = vmatmul.mubr.bf16.gmra.mrb[108].mxu1 %v7569_v16  ;;  %v8723_v16 = vld [vmem:[#allocation15_spill] sm:$0xff] }
 0x1e4   : > { %4346 = vmatprep.mubr.bf16.mxu1 %v2945_v10  ;;  %v3009_v10 = vsel %vm1715_vm2, %v2949_v62, %v3008_v6  ;;  %v3112_v62 = vor.u32 %v3110_v60, %v7877_v37 }
 0x1e6   : > { %v3113_v2 = vsel %vm1715_vm2, %v3053_v7, %v3112_v62 }
 0x1e8   : > { %4500 = vmatmul.mubr.bf16.gmra.mrb[108].mxu0 %v2897_v44 }
 0x1e9   : > { %4507 = vmatprep.mubr.bf16.mxu0 %v8723_v16 }
 0x1eb   : > { %4347 = vmatmul.mubr.bf16.gmra.mrb[112].mxu1 %v7601_v56  ;;  %v3056_v56 = vor.u32 %v3054_v43, %v3053_v7 }
 0x1ec   : > { %4354 = vmatprep.mubr.bf16.mxu1 %v3001_v5  ;;  %v3064_v5 = vor.u32 %v3062_v57, %v7883_v48 }
 0x1ed   : > { %v3057_v27 = vsel %vm1715_vm2, %v2997_v11, %v3056_v56  ;;  %v7907_v56 = vrot.slane %v3163_v32, 7 }
 0x1ee   : > { %v3065_v60 = vsel %vm1715_vm2, %v3005_v12, %v3064_v5 }
 0x1ef   : > { %v5820_v24 = vpop.f32.mrb[16].mxu0 }
 0x1f0   : > { %4508 = vmatmul.mubr.bf16.gmra.mrb[112].mxu0 %v2953_v35  ;;  %v5821_v38 = vpop.f32.mrb[17].mxu0  ;;  %v1929_v35 = vsel %vm8729_vm15, %v6454_v14, 0  ;;  %v7914_v14 = vld [vmem:[%s8527_s4] ss:$0 sm:$0xff]  ;;  %vm8734_vm15 = vmmov %vm8732_vm0 }
 0x1f1   : > { %4515 = vmatprep.mubr.bf16.mxu0 %v7644_v49  ;;  %v7885_v0 = vadd.f32 %v5821_v38, %v5820_v24  ;;  %v5708_v44 = vpop.f32.mrb[16].mxu1  ;;  %v5823_v11 = vpop.f32.mrb[18].mxu0  ;;  %v2198_v24 = vsel %vm2111_vm11, %v2195_v21, %v2197_v42  ;;  %v6456_v21 = vld [vmem:[#allocation2 + $0x80] sm:$0xff]  ;;  %v3174_v32 = vshll.u32 %v1929_v35, 16 }
 0x1f2   : > { %v5709_v31 = vpop.f32.mrb[17].mxu1  ;;  %v5824_v53 = vpop.f32.mrb[19].mxu0  ;;  %v8730_v38 = vld [vmem:[#allocation26_spill] sm:$0xff]  ;;  %v3219_v52 = vshrl.u32 %v2198_v24, 16 }
 0x1f3   : > { %4355 = vmatmul.mubr.bf16.gmra.mrb[116].mxu1 %v8723_v16  ;;  %v2146_v16 = vshll.u32 %v7892_v47, 16  ;;  %v5710_v17 = vadd.f32 %v5709_v31, %v5708_v44  ;;  %v7897_v45 = vadd.f32 %v5824_v53, %v5823_v11  ;;  %v5711_v58 = vpop.f32.mrb[18].mxu1  ;;  %vm8731_vm8 = vcmp.ne.s16.totalorder %v8730_v38, 0  ;;  %v8735_v38 = vld [vmem:[#allocation21_spill] sm:$0xff] }
 0x1f4   : > { %4362 = vmatprep.mubr.bf16.mxu1 %v3057_v27  ;;  %v5712_v15 = vpop.f32.mrb[19].mxu1  ;;  %v3171_v27 = vshrl.u32 %v1929_v35, 16  ;;  %v1930_v12 = vsel %vm8731_vm8, %v6456_v21, 0  ;;  %v3168_v11 = vor.u32 %v3166_v51, %v7907_v56  ;;  %vm8744_vm8 = vcmp.ne.s16.totalorder %v8674_v23, 0 }
 0x1f5   : > { %v5713_v43 = vadd.f32 %v5712_v15, %v5711_v58  ;;  %v2148_v6 = vrot.slane %v2146_v16, 1  ;;  %v3963_v16 = vadd.f32 %v5710_v17, %v7914_v14  ;;  %v2199_v15 = vrot.slane %v7921_v54, 1  ;;  %v1896_v17 = vld [vmem:[#allocation2 + $0x90] sm:$0x1] }
 0x1f6   : > { %v7937_v58 = vrot.slane %v3171_v27, 7  ;;  %v3169_v35 = vsel %vm1715_vm2, %v7877_v37, %v3168_v11  ;;  %v1913_v37 = vsel %vm1859_vm4, %v1896_v17, 0 }
 0x1f7   : > { %v5826_v22 = vpop.f32.mrb[20].mxu0  ;;  %v2149_v53 = vsel %vm8732_vm0, %v7737_v61, %v2148_v6  ;;  %v3966_v5 = vadd.f32 %v5713_v43, %v7914_v14  ;;  %v7943_v61 = vor.u32 %v2150_v1, %v2148_v6  ;;  %v3222_v43 = vshll.u32 %v2198_v24, 16 }
 0x1f8   : > { %4516 = vmatmul.mubr.bf16.gmra.mrb[116].mxu0 %v3009_v10  ;;  %v5827_v39 = vpop.f32.mrb[21].mxu0  ;;  %v7927_v10 = vld [vmem:[#allocation2 + $0x8] sm:$0xff]  ;;  %v3176_v54 = vor.u32 %v3174_v32, %v7937_v58  ;;  %v7953_v6 = vadd.f32 %v7885_v0, %v3963_v16  ;;  %v2201_v11 = vrot.slane %v1913_v37, 1  ;;  %vm8745_vm0 = vcmp.ne.s16.totalorder %v8676_v50, 0 }
 0x1f9   : > { %4523 = vmatprep.mubr.bf16.mxu0 %v7669_v63  ;;  %v5829_v7 = vpop.f32.mrb[22].mxu0  ;;  %v2204_v44 = vshll.u32 %v7927_v10, 16  ;;  %v7965_v24 = vadd.f32 %v7897_v45, %v3966_v5 }
 0x1fa   : > { %v5830_v57 = vpop.f32.mrb[23].mxu0  ;;  %v3177_v1 = vsel %vm1715_vm2, %v7903_v33, %v3176_v54 }
 0x1fb   : > { %4363 = vmatmul.mubr.bf16.gmra.mrb[120].mxu1 %v7644_v49  ;;  %v7916_v49 = vadd.f32 %v5827_v39, %v5826_v22  ;;  %v5714_v28 = vpop.f32.mrb[20].mxu1  ;;  %v7932_v31 = vadd.f32 %v5830_v57, %v5829_v7  ;;  %v3121_v22 = vsel %vm1715_vm2, %v7883_v48, %v3120_v40  ;;  %v3235_v39 = vshrl.u32 %v2149_v53, 16 }
 0x1fc   : > { %4370 = vmatprep.mubr.bf16.mxu1 %v3113_v2  ;;  %v5715_v62 = vpop.f32.mrb[21].mxu1  ;;  %v3227_v2 = vshrl.u32 %v1930_v12, 16  ;;  %v7948_v7 = vrot.slane %v3219_v52, 7  ;;  %v3230_v57 = vshll.u32 %v1930_v12, 16  ;;  %v2200_v48 = vsel %vm2111_vm11, %v2197_v42, %v2199_v15 }
 0x1fd   : > { %v5716_v25 = vadd.f32 %v5715_v62, %v5714_v28  ;;  %v5717_v13 = vpop.f32.mrb[22].mxu1  ;;  %v7967_v21 = vrot.slane %v3235_v39, 7  ;;  %v3238_v42 = vshll.u32 %v2149_v53, 16  ;;  %v2208_v62 = vshrl.u32 %v7927_v10, 16 }
 0x1fe   : > { %v5718_v51 = vpop.f32.mrb[23].mxu1  ;;  %v7955_v40 = vrot.slane %v3227_v2, 7  ;;  %v3224_v36 = vor.u32 %v3222_v43, %v7948_v7 }
 0x1ff   : > { %v5719_v27 = vadd.f32 %v5718_v51, %v5717_v13  ;;  %v3971_v12 = vadd.f32 %v5716_v25, %v7914_v14  ;;  %v3240_v32 = vor.u32 %v3238_v42, %v7967_v21 }
 0x200   : > { %4524 = vmatmul.mubr.bf16.gmra.mrb[120].mxu0 %v3065_v60  ;;  %v2206_v60 = vrot.slane %v2204_v44, 1  ;;  %v3232_v52 = vor.u32 %v3230_v57, %v7955_v40  ;;  %v3225_v51 = vsel %vm1715_vm2, %v7907_v56, %v3224_v36 }
 0x201   : > { %4531 = vmatprep.mubr.bf16.mxu0 %v7703_v41  ;;  %v3974_v28 = vadd.f32 %v5719_v27, %v7914_v14  ;;  %v3278_v27 = vshll.u32 %v2200_v48, 16  ;;  %v7988_v43 = vadd.f32 %v7916_v49, %v3971_v12  ;;  %v6432_v49 = vld [vmem:[%s8528_s5] sm:$0xff]  }
 0x202   : > { %v2207_v0 = vsel %vm8734_vm15, %v7943_v61, %v2206_v60  ;;  %v2210_v56 = vor.u32 %v2208_v62, %v2206_v60  ;;  %6270 = vmatprep.subr.bf16.mxu0 %v6432_v49 }
 0x203   : > { %4371 = vmatmul.mubr.bf16.gmra.mrb[124].mxu1 %v7669_v63  ;;  %v7960_v63 = vsel %vm8733_vm6, %v7892_v47, 0  ;;  %v3275_v47 = vshrl.u32 %v2200_v48, 16  ;;  %v3291_v16 = vshrl.u32 %v2207_v0, 16  ;;  %v3294_v2 = vshll.u32 %v2207_v0, 16  ;;  %6271 = vmatpush3.bf16.msra.mxu0 %v6432_v49 }
 0x204   : > { %4378 = vmatprep.mubr.bf16.mxu1 %v3169_v35  ;;  %v3283_v45 = vshrl.u32 %v7960_v63, 16  ;;  %v3286_v33 = vshll.u32 %v7960_v63, 16  ;;  %v2202_v63 = vsel %vm2111_vm11, %v2199_v15, %v2201_v11  ;;  %v8003_v48 = vadd.f32 %v7932_v31, %v3974_v28  ;;  %v1935_v28 = vld [vmem:[#allocation2 + $0x28] sm:$0xff] }
 0x205   : > { %v7985_v35 = vrot.slane %v3275_v47, 7  ;;  %v8007_v15 = vsel %vm1715_vm2, %v7727_v9, %v3240_v32  ;;  %v3347_v47 = vshrl.u32 %v2202_v63, 16  ;;  %v3233_v31 = vsel %vm1715_vm2, %v7937_v58, %v3232_v52 }
 0x206   : > { %v5832_v44 = vpop.f32.mrb[24].mxu0  ;;  %v5720_v25 = vpop.f32.mrb[24].mxu1  ;;  %v7990_v42 = vrot.slane %v3283_v45, 7  ;;  %v8025_v52 = vsel %vm1520_vm14, %v7927_v10, 0  ;;  %vm8739_vm14 = vcmp.ne.s16.totalorder %v6950_v55, 0  ;;  %vm8746_vm6 = vcmp.ne.s16.totalorder %v8678_v19, 0 }
 0x207   : > { %v5833_v53 = vpop.f32.mrb[25].mxu0  ;;  %v5721_v39 = vpop.f32.mrb[25].mxu1  ;;  %v3280_v29 = vor.u32 %v3278_v27, %v7985_v35  ;;  %v3358_v58 = vshll.u32 %v8025_v52, 16 }
 0x208   : > { %4532 = vmatmul.mubr.bf16.gmra.mrb[124].mxu0 %v3121_v22  ;;  %v5834_v5 = vadd.f32 %v5833_v53, %v5832_v44  ;;  %v5835_v13 = vpop.f32.mrb[26].mxu0  ;;  %v1934_v22 = vld [vmem:[#allocation2 + $0x20] sm:$0xff]  ;;  %v5722_v54 = vadd.f32 %v5721_v39, %v5720_v25  ;;  %v5723_v37 = vpop.f32.mrb[26].mxu1  ;;  %v7993_v44 = vrot.slane %v3291_v16, 7  ;;  %v3288_v32 = vor.u32 %v3286_v33, %v7990_v42 }
 0x209   : > { %4539 = vmatprep.mubr.bf16.mxu0 %v8735_v38  ;;  %v5836_v17 = vpop.f32.mrb[27].mxu0  ;;  %v5724_v0 = vpop.f32.mrb[27].mxu1  ;;  %v7997_v36 = vsel %vm1844_vm10, %v1934_v22, 0  ;;  %v3363_v25 = vshrl.u32 %v2210_v56, 16  ;;  %vm8742_vm10 = vcmp.ne.s16.totalorder %v6974_v26, 0 }
 0x20a   : > { %v5837_v57 = vadd.f32 %v5836_v17, %v5835_v13  ;;  %v5725_v12 = vadd.f32 %v5724_v0, %v5723_v37  ;;  %v3979_v60 = vadd.f32 %v5722_v54, %v7914_v14  ;;  %v2229_v9 = vrot.slane %v7997_v36, 1  ;;  %v1936_v13 = vld [vmem:[#allocation2 + $0x30] sm:$0xff] }
 0x20b   : > { %4379 = vmatmul.mubr.bf16.gmra.mrb[128].mxu1 %v7703_v41  ;;  %v1933_v41 = vld [vmem:[#allocation2 + $0x18] sm:$0xff]  ;;  %v3296_v16 = vor.u32 %v3294_v2, %v7993_v44  ;;  %v3350_v17 = vshll.u32 %v2202_v63, 16  ;;  %v3281_v2 = vsel %vm1715_vm2, %v7948_v7, %v3280_v29  ;;  %v3349_v37 = vrot.slane %v3347_v47, 7 }
 0x20c   : > { %4386 = vmatprep.mubr.bf16.mxu1 %v3225_v51  ;;  %v8014_v11 = vsel %vm1843_vm3, %v1933_v41, 0  ;;  %v3982_v53 = vadd.f32 %v5725_v12, %v7914_v14  ;;  %v1952_v0 = vsel %vm1845_vm9, %v1935_v28, 0  ;;  %v8033_v36 = vadd.f32 %v5834_v5, %v3979_v60 }
 0x20d   : > { %v2228_v27 = vrot.slane %v8014_v11, 1  ;;  %v3365_v7 = vrot.slane %v3363_v25, 7  ;;  %v3366_v29 = vshll.u32 %v2210_v56, 16  ;;  %v3355_v47 = vshrl.u32 %v8025_v52, 16 }
 0x20e   : > { %v5726_v51 = vpop.f32.mrb[28].mxu1  ;;  %v3297_v5 = vsel %vm1715_vm2, %v7967_v21, %v3296_v16  ;;  %v3339_v28 = vshrl.u32 %v7943_v61, 16  ;;  %vm8740_vm3 = vcmp.ne.s16.totalorder %v6958_v59, 0  ;;  %vm8741_vm9 = vcmp.ne.s16.totalorder %v6965_v3, 0 }
 0x20f   : > { %v5727_v54 = vpop.f32.mrb[29].mxu1  ;;  %v2230_v45 = vsel %vm2111_vm11, %v2228_v27, %v2229_v9 }
 0x210   : > { %4540 = vmatmul.mubr.bf16.gmra.mrb[128].mxu0 %v3177_v1  ;;  %v5838_v1 = vpop.f32.mrb[28].mxu0  ;;  %v5728_v63 = vadd.f32 %v5727_v54, %v5726_v51  ;;  %v5729_v12 = vpop.f32.mrb[30].mxu1  ;;  %v2513_v51 = vshrl.u32 %v2230_v45, 16  ;;  %v3342_v54 = vshll.u32 %v7943_v61, 16 }
 0x211   : > { %4547 = vmatprep.mubr.bf16.mxu0 %v8007_v15  ;;  %v5839_v62 = vpop.f32.mrb[29].mxu0  ;;  %v5730_v11 = vpop.f32.mrb[31].mxu1 }
 0x212   : > { %v5840_v22 = vadd.f32 %v5839_v62, %v5838_v1  ;;  %v5841_v39 = vpop.f32.mrb[30].mxu0  ;;  %v8041_v1 = vadd.f32 %v5837_v57, %v3982_v53  ;;  %v5731_v60 = vadd.f32 %v5730_v11, %v5729_v12  ;;  %v2231_v62 = vrot.slane %v1952_v0, 1 }
 0x213   : > { %4387 = vmatmul.mubr.bf16.gmra.mrb[132].mxu1 %v8735_v38  ;;  %v5842_v33 = vpop.f32.mrb[31].mxu0  ;;  %v8038_v38 = vsel %vm1846_vm5, %v1936_v13, 0  ;;  %v3987_v20 = vadd.f32 %v5728_v63, %v7914_v14  ;;  %v3352_v13 = vor.u32 %v3350_v17, %v3349_v37  ;;  %v3289_v57 = vsel %vm1715_vm2, %v7955_v40, %v3288_v32  ;;  %v1938_v17 = vld [vmem:[#allocation2 + $0x40] sm:$0xff] }
 0x214   : > { %4394 = vmatprep.mubr.bf16.mxu1 %v3281_v2  ;;  %v5843_v49 = vadd.f32 %v5842_v33, %v5841_v39  ;;  %v2233_v25 = vrot.slane %v8038_v38, 1  ;;  %v3990_v56 = vadd.f32 %v5731_v60, %v7914_v14  ;;  %v3357_v53 = vrot.slane %v3355_v47, 7  ;;  %v1937_v39 = vld [vmem:[#allocation2 + $0x38] sm:$0xff] }
 0x215   : > { %v3341_v2 = vrot.slane %v3339_v28, 7  ;;  %v8054_v33 = vsel %vm2111_vm11, %v2229_v9, %v2231_v62  ;;  %v3353_v37 = vsel %vm1715_vm2, %v7985_v35, %v3352_v13  ;;  %v8059_v32 = vrot.slane %v2513_v51, 7 }
 0x216   : > { %v8062_v0 = vsel %vm2111_vm11, %v2231_v62, %v2233_v25  ;;  %v8064_v52 = vadd.f32 %v5840_v22, %v3987_v20  ;;  %v2509_v12 = vshrl.u32 %v2228_v27, 16  ;;  %v2516_v38 = vshll.u32 %v2230_v45, 16  ;;  %v6433_v22 = vld [vmem:[%s8528_s5 + $0x8] sm:$0xff]  }
 0x217   : > { %v5844_v16 = vpop.f32.mrb[32].mxu0  ;;  %v8071_v47 = vsel %vm8740_vm3, %v1938_v17, 0  ;;  %v3344_v60 = vor.u32 %v3342_v54, %v3341_v2  ;;  %v2627_v28 = vshrl.u32 %v8062_v0, 16  ;;  %6272 = vmatprep.subr.bf16.mxu0 %v6433_v22  ;;  %v3360_v51 = vor.u32 %v3358_v58, %v3357_v53 }
 0x218   : > { %4548 = vmatmul.mubr.bf16.gmra.mrb[132].mxu0 %v3233_v31  ;;  %v3368_v31 = vor.u32 %v3366_v29, %v3365_v7  ;;  %v5845_v41 = vpop.f32.mrb[33].mxu0  ;;  %v5732_v40 = vpop.f32.mrb[32].mxu1  ;;  %v2571_v29 = vshrl.u32 %v8054_v33, 16  ;;  %v2518_v20 = vor.u32 %v2516_v38, %v8059_v32  ;;  %vm8743_vm5 = vcmp.ne.s16.totalorder %v6991_v46, 0 }
 0x219   : > { %4555 = vmatprep.mubr.bf16.mxu0 %v3297_v5  ;;  %v5846_v61 = vadd.f32 %v5845_v41, %v5844_v16  ;;  %v5847_v63 = vpop.f32.mrb[34].mxu0  ;;  %v5733_v9 = vpop.f32.mrb[33].mxu1  ;;  %v8076_v5 = vadd.f32 %v5843_v49, %v3990_v56  ;;  %v2237_v49 = vrot.slane %v8071_v47, 1  ;;  %v1939_v56 = vld [vmem:[#allocation2 + $0x48] sm:$0xff]  ;;  %6273 = vmatpush3.bf16.msra.mxu0 %v6433_v22  ;;  %v1940_v16 = vld [vmem:[#allocation2 + $0x50] sm:$0xff]  ;;  %v3345_v2 = vsel %vm1715_vm2, %v7967_v21, %v3344_v60 }
 0x21a   : > { %v5734_v11 = vadd.f32 %v5733_v9, %v5732_v40  ;;  %v5848_v35 = vpop.f32.mrb[35].mxu0  ;;  %v5735_v7 = vpop.f32.mrb[34].mxu1  ;;  %v3369_v55 = vsel %vm1715_vm2, %v7993_v44, %v3368_v31  ;;  %v2573_v31 = vrot.slane %v2571_v29, 7  ;;  %v8088_v17 = vrot.slane %v2627_v28, 7 }
 0x21b   : > { %4395 = vmatmul.mubr.bf16.gmra.mrb[136].mxu1 %v8007_v15  ;;  %v1954_v15 = vsel %vm8739_vm14, %v1937_v39, 0  ;;  %v5849_v27 = vadd.f32 %v5848_v35, %v5847_v63  ;;  %v5736_v45 = vpop.f32.mrb[35].mxu1  ;;  %v2574_v39 = vshll.u32 %v8054_v33, 16  ;;  %v1956_v40 = vsel %vm8741_vm9, %v1939_v56, 0  ;;  %v1942_v56 = vld [vmem:[#allocation2 + $0x60] sm:$0xff] }
 0x21c   : > { %4402 = vmatprep.mubr.bf16.mxu1 %v3353_v37  ;;  %v3995_v59 = vadd.f32 %v5734_v11, %v7914_v14  ;;  %v5737_v62 = vadd.f32 %v5736_v45, %v5735_v7  ;;  %v2235_v13 = vrot.slane %v1954_v15, 1  ;;  %v2630_v21 = vshll.u32 %v8062_v0, 16 }
 0x21d   : > { %v8100_v15 = vsel %vm8742_vm10, %v1940_v16, 0 }
 0x21e   : > { %v3998_v44 = vadd.f32 %v5737_v62, %v7914_v14  ;;  %v2236_v41 = vsel %vm2111_vm11, %v2233_v25, %v2235_v13  ;;  %v8094_v63 = vadd.f32 %v5846_v61, %v3995_v59  ;;  %v2238_v38 = vsel %vm2111_vm11, %v2235_v13, %v2237_v49  ;;  %v1941_v62 = vld [vmem:[#allocation2 + $0x58] sm:$0xff] }
 0x21f   : > { %v5850_v54 = vpop.f32.mrb[36].mxu0  ;;  %v3361_v25 = vsel %vm1715_vm2, %v7990_v42, %v3360_v51  ;;  %v2576_v61 = vor.u32 %v2574_v39, %v2573_v31  ;;  %v2632_v0 = vor.u32 %v2630_v21, %v8088_v17  ;;  %v2683_v22 = vshrl.u32 %v2236_v41, 16 }
 0x220   : > { %4556 = vmatmul.mubr.bf16.gmra.mrb[136].mxu0 %v3289_v57  ;;  %v2511_v57 = vrot.slane %v2509_v12, 7  ;;  %v5851_v58 = vpop.f32.mrb[37].mxu0  ;;  %v5738_v37 = vpop.f32.mrb[36].mxu1  ;;  %v8104_v7 = vadd.f32 %v5849_v27, %v3998_v44  ;;  %v2739_v60 = vshrl.u32 %v2238_v38, 16  ;;  %v2241_v28 = vrot.slane %v8100_v15, 1 }
 0x221   : > { %4563 = vmatprep.mubr.bf16.mxu0 %v3369_v55  ;;  %v5852_v33 = vadd.f32 %v5851_v58, %v5850_v54  ;;  %v5853_v9 = vpop.f32.mrb[38].mxu0  ;;  %v5739_v12 = vpop.f32.mrb[37].mxu1  ;;  %v2239_v55 = vrot.slane %v1956_v40, 1  ;;  %v2686_v59 = vshll.u32 %v2236_v41, 16  ;;  %v2577_v27 = vsel %vm1715_vm2, %v8059_v32, %v2576_v61 }
 0x222   : > { %v2519_v53 = vsel %vm1715_vm2, %v2511_v57, %v2518_v20  ;;  %v5740_v11 = vadd.f32 %v5739_v12, %v5738_v37  ;;  %v5854_v3 = vpop.f32.mrb[39].mxu0  ;;  %v5741_v35 = vpop.f32.mrb[38].mxu1  ;;  %v2633_v20 = vsel %vm1715_vm2, %v2573_v31, %v2632_v0  ;;  %v2685_v13 = vrot.slane %v2683_v22, 7  ;;  %v1943_v0 = vld [vmem:[#allocation2 + $0x68] sm:$0xff] }
 0x223   : > { %4403 = vmatmul.mubr.bf16.gmra.mrb[140].mxu1 %v3345_v2  ;;  %v5855_v29 = vadd.f32 %v5854_v3, %v5853_v9  ;;  %v5742_v47 = vpop.f32.mrb[39].mxu1  ;;  %v2742_v51 = vshll.u32 %v2238_v38, 16  ;;  %v8113_v57 = vrot.slane %v2739_v60, 7  ;;  %v2240_v39 = vsel %vm2111_vm11, %v2237_v49, %v2239_v55  ;;  %v6434_v49 = vld [vmem:[%s8528_s5 + $0x10] sm:$0xff]  }
 0x224   : > { %6238 = vmatprep.mubr.bf16.mxu1 %v2519_v53  ;;  %v4003_v26 = vadd.f32 %v5740_v11, %v7914_v14  ;;  %v5743_v45 = vadd.f32 %v5742_v47, %v5741_v35  ;;  %v2242_v16 = vsel %vm2111_vm11, %v2239_v55, %v2241_v28  ;;  %v1958_v32 = vsel %vm8743_vm5, %v1941_v62, 0  ;;  %6274 = vmatprep.subr.bf16.mxu0 %v6434_v49  ;;  %v1944_v60 = vld [vmem:[#allocation2 + $0x70] sm:$0xff] }
 0x225   : > { %v8123_v41 = vsel %vm8744_vm8, %v1942_v56, 0  ;;  %v2688_v21 = vor.u32 %v2686_v59, %v2685_v13  ;;  %v2795_v38 = vshrl.u32 %v2240_v39, 16  ;;  %v2851_v46 = vshrl.u32 %v2242_v16, 16  ;;  %6275 = vmatpush3.bf16.msra.mxu0 %v6434_v49 }
 0x226   : > { %v4006_v42 = vadd.f32 %v5743_v45, %v7914_v14  ;;  %v8117_v2 = vadd.f32 %v5852_v33, %v4003_v26  ;;  %v2744_v23 = vor.u32 %v2742_v51, %v8113_v57  ;;  %v2243_v3 = vrot.slane %v1958_v32, 1 }
 0x227   : > { %v2245_v61 = vrot.slane %v8123_v41, 1  ;;  %v2798_v47 = vshll.u32 %v2240_v39, 16  ;;  %v2689_v22 = vsel %vm1715_vm2, %v8088_v17, %v2688_v21  ;;  %v2797_v55 = vrot.slane %v2795_v38, 7  ;;  %v1945_v38 = vld [vmem:[#allocation2 + $0x78] sm:$0xff] }
 0x228   : > { %4564 = vmatmul.mubr.bf16.gmra.mrb[140].mxu0 %v3361_v25  ;;  %v8128_v40 = vadd.f32 %v5855_v29, %v4006_v42  ;;  %v8136_v26 = vrot.slane %v2851_v46, 7  ;;  %v2854_v45 = vshll.u32 %v2242_v16, 16  ;;  %v2745_v42 = vsel %vm1715_vm2, %v2685_v13, %v2744_v23  ;;  %v1946_v23 = vld [vmem:[#allocation2 + $0x80] sm:$0xff] }
 0x229   : > { %v5744_v44 = vpop.f32.mrb[40].mxu1  ;;  %v2244_v62 = vsel %vm2111_vm11, %v2241_v28, %v2243_v3  ;;  %v2246_v56 = vsel %vm2111_vm11, %v2243_v3, %v2245_v61  ;;  %v1960_v17 = vsel %vm8745_vm0, %v1943_v0, 0 }
 0x22a   : > { %v5856_v54 = vpop.f32.mrb[40].mxu0  ;;  %v5745_v53 = vpop.f32.mrb[41].mxu1 }
 0x22b   : > { %6239 = vmatmul.mubr.bf16.vlgmr.msra.gmra.mrb[144].mxu1 %v2577_v27  ;;  %v5857_v31 = vpop.f32.mrb[41].mxu0  ;;  %v5746_v58 = vadd.f32 %v5745_v53, %v5744_v44  ;;  %v5747_v37 = vpop.f32.mrb[42].mxu1 }
 0x22c   : > { %6242 = vmatprep.mubr.bf16.mxu1 %v2633_v20  ;;  %v5858_v33 = vadd.f32 %v5857_v31, %v5856_v54  ;;  %v5859_v9 = vpop.f32.mrb[42].mxu0  ;;  %v5748_v12 = vpop.f32.mrb[43].mxu1  ;;  %v8147_v54 = vsel %vm8746_vm6, %v1944_v60, 0  ;;  %v2800_v31 = vor.u32 %v2798_v47, %v2797_v55 }
 0x22d   : > { %v4011_v15 = vadd.f32 %v5746_v58, %v7914_v14  ;;  %v5860_v25 = vpop.f32.mrb[43].mxu0  ;;  %v5749_v11 = vadd.f32 %v5748_v12, %v5747_v37  ;;  %v2856_v58 = vor.u32 %v2854_v45, %v8136_v26  ;;  %v2907_v37 = vshrl.u32 %v2244_v62, 16 }
 0x22e   : > { %v5861_v35 = vadd.f32 %v5860_v25, %v5859_v9  ;;  %v2247_v9 = vrot.slane %v1960_v17, 1  ;;  %v2249_v19 = vrot.slane %v8147_v54, 1  ;;  %v2801_v46 = vsel %vm1715_vm2, %v8113_v57, %v2800_v31  ;;  %v1947_v31 = vld [vmem:[#allocation2 + $0x88] sm:$0xff] }
 0x22f   : > { %v4014_v29 = vadd.f32 %v5749_v11, %v7914_v14  ;;  %v8140_v27 = vadd.f32 %v5858_v33, %v4011_v15  ;;  %v2963_v33 = vshrl.u32 %v2246_v56, 16  ;;  %v2909_v15 = vrot.slane %v2907_v37, 7 }
 0x230   : > { %v2910_v25 = vshll.u32 %v2244_v62, 16  ;;  %v2966_v11 = vshll.u32 %v2246_v56, 16  ;;  %v2857_v3 = vsel %vm1715_vm2, %v2797_v55, %v2856_v58  ;;  %v2250_v0 = vsel %vm2111_vm11, %v2247_v9, %v2249_v19  ;;  %v6435_v55 = vld [vmem:[%s8528_s5 + $0x18] sm:$0xff]  }
 0x231   : > { %v8149_v13 = vadd.f32 %v5861_v35, %v4014_v29  ;;  %v8158_v35 = vrot.slane %v2963_v33, 7  ;;  %v2248_v29 = vsel %vm2111_vm11, %v2245_v61, %v2247_v9  ;;  %v8168_v45 = vsel %vm1856_vm12, %v1946_v23, 0  ;;  %6276 = vmatprep.subr.bf16.mxu0 %v6435_v55 }
 0x232   : > { %v5750_v59 = vpop.f32.mrb[44].mxu1  ;;  %v5862_v20 = vpop.f32.mrb[44].mxu0  ;;  %v3019_v62 = vshrl.u32 %v2248_v29, 16  ;;  %v3075_v17 = vshrl.u32 %v2250_v0, 16  ;;  %v2253_v54 = vrot.slane %v8168_v45, 1  ;;  %6277 = vmatpush3.bf16.msra.mxu0 %v6435_v55  ;;  %v3078_v9 = vshll.u32 %v2250_v0, 16 }
 0x233   : > { %6243 = vmatmul.mubr.bf16.gmra.mrb[148].mxu1 %v2689_v22  ;;  %v5751_v51 = vpop.f32.mrb[45].mxu1  ;;  %v5863_v44 = vpop.f32.mrb[45].mxu0  ;;  %v1962_v22 = vsel %vm1855_vm7, %v1945_v38, 0  ;;  %v2968_v8 = vor.u32 %v2966_v11, %v8158_v35 }
 0x234   : > { %6246 = vmatprep.mubr.bf16.mxu1 %v2745_v42  ;;  %v5752_v39 = vadd.f32 %v5751_v51, %v5750_v59  ;;  %v5753_v16 = vpop.f32.mrb[46].mxu1  ;;  %v5864_v28 = vadd.f32 %v5863_v44, %v5862_v20  ;;  %v5865_v53 = vpop.f32.mrb[46].mxu0  ;;  %v2912_v59 = vor.u32 %v2910_v25, %v2909_v15  ;;  %v2251_v44 = vrot.slane %v1962_v22, 1 }
 0x235   : > { %v5754_v32 = vpop.f32.mrb[47].mxu1  ;;  %v5866_v50 = vpop.f32.mrb[47].mxu0  ;;  %v8181_v33 = vrot.slane %v3075_v17, 7 }
 0x236   : > { %v4019_v41 = vadd.f32 %v5752_v39, %v7914_v14  ;;  %v5755_v49 = vadd.f32 %v5754_v32, %v5753_v16  ;;  %v5867_v12 = vadd.f32 %v5866_v50, %v5865_v53  ;;  %v3022_v32 = vshll.u32 %v2248_v29, 16 }
 0x237   : > { %v3021_v50 = vrot.slane %v3019_v62, 7  ;;  %v2254_v38 = vsel %vm2111_vm11, %v2251_v44, %v2253_v54  ;;  %v3080_v34 = vor.u32 %v3078_v9, %v8181_v33 }
 0x238   : > { %v4022_v21 = vadd.f32 %v5755_v49, %v7914_v14  ;;  %v8161_v47 = vadd.f32 %v5864_v28, %v4019_v41  ;;  %v2913_v41 = vsel %vm1715_vm2, %v8136_v26, %v2912_v59  ;;  %v2969_v49 = vsel %vm1715_vm2, %v2909_v15, %v2968_v8 }
 0x239   : > { %v8193_v15 = vsel %vm1858_vm1, %v7927_v10, 0  ;;  %v3187_v45 = vshrl.u32 %v2254_v38, 16 }
 0x23a   : > { %v8173_v60 = vadd.f32 %v5867_v12, %v4022_v21  ;;  %v2252_v12 = vsel %vm2111_vm11, %v2249_v19, %v2251_v44  ;;  %v2257_v4 = vrot.slane %v8193_v15, 1 }
 0x23b   : > { %6247 = vmatmul.mubr.bf16.gmra.mrb[152].mxu1 %v2801_v46  ;;  %v1964_v46 = vsel %vm1857_vm13, %v1947_v31, 0  ;;  %v3131_v19 = vshrl.u32 %v2252_v12, 16 }
 0x23c   : > { %6250 = vmatprep.mubr.bf16.mxu1 %v2857_v3  ;;  %v5868_v57 = vpop.f32.mrb[48].mxu0  ;;  %v3024_v3 = vor.u32 %v3022_v32, %v3021_v50  ;;  %v2255_v55 = vrot.slane %v1964_v46, 1 }
 0x23d   : > { %v5869_v61 = vpop.f32.mrb[49].mxu0  ;;  %v5756_v42 = vpop.f32.mrb[48].mxu1  ;;  %v3133_v44 = vrot.slane %v3131_v19, 7 }
 0x23e   : > { %v5870_v20 = vadd.f32 %v5869_v61, %v5868_v57  ;;  %v5871_v51 = vpop.f32.mrb[50].mxu0  ;;  %v5757_v56 = vpop.f32.mrb[49].mxu1  ;;  %v3025_v17 = vsel %vm1715_vm2, %v8158_v35, %v3024_v3  ;;  %v2258_v32 = vsel %vm2111_vm11, %v2255_v55, %v2257_v4  ;;  %v6436_v35 = vld [vmem:[%s8528_s5 + $0x20] sm:$0xff]  }
 0x23f   : > { %v5758_v18 = vadd.f32 %v5757_v56, %v5756_v42  ;;  %v5872_v39 = vpop.f32.mrb[51].mxu0  ;;  %v5759_v16 = vpop.f32.mrb[50].mxu1  ;;  %6278 = vmatprep.subr.bf16.mxu0 %v6436_v35 }
 0x240   : > { %v5873_v28 = vadd.f32 %v5872_v39, %v5871_v51  ;;  %v5760_v53 = vpop.f32.mrb[51].mxu1  ;;  %v1949_v51 = vld [vmem:[#allocation2 + $0x98] sm:$0x1]  ;;  %v3189_v39 = vrot.slane %v3187_v45, 7  ;;  %6279 = vmatpush3.bf16.msra.mxu0 %v6436_v35 }
 0x241   : > { %v4027_v58 = vadd.f32 %v5758_v18, %v7914_v14  ;;  %v5761_v37 = vadd.f32 %v5760_v53, %v5759_v16  ;;  %v3081_v18 = vsel %vm1715_vm2, %v3021_v50, %v3080_v34  ;;  %v3190_v16 = vshll.u32 %v2254_v38, 16 }
 0x242   : > { %v1966_v31 = vsel %vm1859_vm4, %v1949_v51, 0 }
 0x243   : > { %6251 = vmatmul.mubr.bf16.gmra.mrb[156].mxu1 %v2913_v41  ;;  %v4030_v21 = vadd.f32 %v5761_v37, %v7914_v14  ;;  %v8188_v25 = vadd.f32 %v5870_v20, %v4027_v58  ;;  %v3134_v20 = vshll.u32 %v2252_v12, 16  ;;  %v3192_v46 = vor.u32 %v3190_v16, %v3189_v39 }
 0x244   : > { %6254 = vmatprep.mubr.bf16.mxu1 %v2969_v49  ;;  %v5874_v26 = vpop.f32.mrb[52].mxu0  ;;  %v2259_v30 = vrot.slane %v1966_v31, 1 }
 0x245   : > { %v5875_v11 = vpop.f32.mrb[53].mxu0  ;;  %v5762_v23 = vpop.f32.mrb[52].mxu1  ;;  %v8195_v29 = vadd.f32 %v5873_v28, %v4030_v21  ;;  %v2256_v28 = vsel %vm2111_vm11, %v2253_v54, %v2255_v55  ;;  %v3136_v49 = vor.u32 %v3134_v20, %v3133_v44  ;;  %v3193_v55 = vsel %vm1715_vm2, %v3133_v44, %v3192_v46 }
 0x246   : > { %v5876_v0 = vadd.f32 %v5875_v11, %v5874_v26  ;;  %v5877_v22 = vpop.f32.mrb[54].mxu0  ;;  %v5763_v57 = vpop.f32.mrb[53].mxu1  ;;  %v3243_v9 = vshrl.u32 %v2256_v28, 16  ;;  %v3299_v26 = vshrl.u32 %v2258_v32, 16 }
 0x247   : > { %v5764_v61 = vadd.f32 %v5763_v57, %v5762_v23  ;;  %v5878_v42 = vpop.f32.mrb[55].mxu0  ;;  %v5765_v59 = vpop.f32.mrb[54].mxu1  ;;  %v3137_v34 = vsel %vm1715_vm2, %v8181_v33, %v3136_v49 }
 0x248   : > { %v5879_v10 = vadd.f32 %v5878_v42, %v5877_v22  ;;  %v5766_v62 = vpop.f32.mrb[55].mxu1  ;;  %v3245_v45 = vrot.slane %v3243_v9, 7  ;;  %v3302_v42 = vshll.u32 %v2258_v32, 16 }
 0x249   : > { %v4035_v56 = vadd.f32 %v5764_v61, %v7914_v14  ;;  %v5767_v8 = vadd.f32 %v5766_v62, %v5765_v59  ;;  %v3301_v61 = vrot.slane %v3299_v26, 7  ;;  %v2260_v59 = vsel %vm2111_vm11, %v2257_v4, %v2259_v30  ;;  %v6437_v26 = vld [vmem:[%s8528_s5 + $0x28] sm:$0xff]  }
 0x24a   : > { %v3374_v35 = vshll.u32 %v2260_v59, 16  ;;  %6280 = vmatprep.subr.bf16.mxu0 %v6437_v26 }
 0x24b   : > { %6255 = vmatmul.mubr.bf16.gmra.mrb[160].mxu1 %v3025_v17  ;;  %v4038_v53 = vadd.f32 %v5767_v8, %v7914_v14  ;;  %v8208_v58 = vadd.f32 %v5876_v0, %v4035_v56  ;;  %v3246_v0 = vshll.u32 %v2256_v28, 16  ;;  %v3371_v17 = vshrl.u32 %v2260_v59, 16  ;;  %6281 = vmatpush3.bf16.msra.mxu0 %v6437_v26 }
 0x24c   : > { %6258 = vmatprep.mubr.bf16.mxu1 %v3081_v18  ;;  %v5880_v37 = vpop.f32.mrb[56].mxu0  ;;  %v3304_v44 = vor.u32 %v3302_v42, %v3301_v61 }
 0x24d   : > { %v5881_v41 = vpop.f32.mrb[57].mxu0  ;;  %v5768_v50 = vpop.f32.mrb[56].mxu1  ;;  %v8213_v54 = vadd.f32 %v5879_v10, %v4038_v53  ;;  %v3248_v8 = vor.u32 %v3246_v0, %v3245_v45  ;;  %v3373_v9 = vrot.slane %v3371_v17, 7 }
 0x24e   : > { %v5882_v12 = vadd.f32 %v5881_v41, %v5880_v37  ;;  %v5883_v21 = vpop.f32.mrb[58].mxu0  ;;  %v5769_v38 = vpop.f32.mrb[57].mxu1 }
 0x24f   : > { %v5770_v15 = vadd.f32 %v5769_v38, %v5768_v50  ;;  %v5884_v11 = vpop.f32.mrb[59].mxu0  ;;  %v5771_v23 = vpop.f32.mrb[58].mxu1  ;;  %v3249_v49 = vsel %vm1715_vm2, %v3189_v39, %v3248_v8 }
 0x250   : > { %v5885_v3 = vadd.f32 %v5884_v11, %v5883_v21  ;;  %v5772_v19 = vpop.f32.mrb[59].mxu1  ;;  %v3376_v11 = vor.u32 %v3374_v35, %v3373_v9 }
 0x251   : > { %v4043_v22 = vadd.f32 %v5770_v15, %v7914_v14  ;;  %v5773_v57 = vadd.f32 %v5772_v19, %v5771_v23 }
 0x252   : > { %v3377_v59 = vsel %vm1715_vm2, %v3301_v61, %v3376_v11 }
 0x253   : > { %6259 = vmatmul.mubr.bf16.gmra.mrb[164].mxu1 %v3137_v34  ;;  %v4046_v10 = vadd.f32 %v5773_v57, %v7914_v14  ;;  %v8221_v62 = vadd.f32 %v5882_v12, %v4043_v22  ;;  %v3305_v12 = vsel %vm1715_vm2, %v3245_v45, %v3304_v44  ;;  %vm5269_vm2 = vcmask 125952  }
 0x254   : > { %6262 = vmatprep.mubr.bf16.mxu1 %v3193_v55  ;;  %v5886_v20 = vpop.f32.mrb[60].mxu0 }
 0x255   : > { %v5887_v51 = vpop.f32.mrb[61].mxu0  ;;  %v5774_v56 = vpop.f32.mrb[60].mxu1  ;;  %v8223_v18 = vadd.f32 %v5885_v3, %v4046_v10 }
 0x256   : > { %v5888_v33 = vadd.f32 %v5887_v51, %v5886_v20  ;;  %v5889_v16 = vpop.f32.mrb[62].mxu0  ;;  %v5775_v28 = vpop.f32.mrb[61].mxu1 }
 0x257   : > { %v5776_v53 = vadd.f32 %v5775_v28, %v5774_v56  ;;  %v5890_v32 = vpop.f32.mrb[63].mxu0  ;;  %v5777_v31 = vpop.f32.mrb[62].mxu1 }
 0x258   : > { %v5891_v4 = vadd.f32 %v5890_v32, %v5889_v16  ;;  %v5778_v37 = vpop.f32.mrb[63].mxu1 }
 0x259   : > { %v4051_v41 = vadd.f32 %v5776_v53, %v7914_v14  ;;  %v5779_v50 = vadd.f32 %v5778_v37, %v5777_v31 }
 0x25b   : > { %6263 = vmatmul.mubr.bf16.gmra.mrb[168].mxu1 %v3249_v49  ;;  %v4054_v21 = vadd.f32 %v5779_v50, %v7914_v14  ;;  %v8229_v38 = vadd.f32 %v5888_v33, %v4051_v41  ;;  %v6438_v50 = vld [vmem:[%s8528_s5 + $0x30] sm:$0xff]  }
 0x25c   : > { %6266 = vmatprep.mubr.bf16.mxu1 %v3305_v12  ;;  %v5892_v46 = vpop.f32.mrb[64].mxu0  ;;  %6282 = vmatprep.subr.bf16.mxu0 %v6438_v50 }
 0x25d   : > { %v5893_v30 = vpop.f32.mrb[65].mxu0  ;;  %v5780_v15 = vpop.f32.mrb[64].mxu1  ;;  %v8234_v23 = vadd.f32 %v5891_v4, %v4054_v21  ;;  %6283 = vmatpush3.bf16.msra.mxu0 %v6438_v50 }
 0x25e   : > { %v5894_v39 = vadd.f32 %v5893_v30, %v5892_v46  ;;  %v5895_v3 = vpop.f32.mrb[66].mxu0  ;;  %v5781_v19 = vpop.f32.mrb[65].mxu1 }
 0x25f   : > { %v5782_v0 = vadd.f32 %v5781_v19, %v5780_v15  ;;  %v5896_v22 = vpop.f32.mrb[67].mxu0  ;;  %v5783_v57 = vpop.f32.mrb[66].mxu1 }
 0x260   : > { %v5897_v34 = vadd.f32 %v5896_v22, %v5895_v3  ;;  %v5784_v45 = vpop.f32.mrb[67].mxu1 }
 0x261   : > { %v4059_v55 = vadd.f32 %v5782_v0, %v7914_v14  ;;  %v5785_v42 = vadd.f32 %v5784_v45, %v5783_v57 }
 0x263   : > { %6267 = vmatmul.mubr.bf16.gmra.mrb[172].mxu1 %v3377_v59  ;;  %v4062_v10 = vadd.f32 %v5785_v42, %v7914_v14  ;;  %v8239_v20 = vadd.f32 %v5894_v39, %v4059_v55 }
 0x264   : > { %v5898_v51 = vpop.f32.mrb[68].mxu0 }
 0x265   : > { %v5899_v56 = vpop.f32.mrb[69].mxu0  ;;  %v5786_v8 = vpop.f32.mrb[68].mxu1  ;;  %v8241_v17 = vadd.f32 %v5897_v34, %v4062_v10 }
 0x266   : > { %v5900_v33 = vadd.f32 %v5899_v56, %v5898_v51  ;;  %v5901_v16 = vpop.f32.mrb[70].mxu0  ;;  %v5787_v28 = vpop.f32.mrb[69].mxu1 }
 0x267   : > { %v5788_v44 = vadd.f32 %v5787_v28, %v5786_v8  ;;  %v5902_v53 = vpop.f32.mrb[71].mxu0  ;;  %v5789_v32 = vpop.f32.mrb[70].mxu1 }
 0x268   : > { %v5903_v31 = vadd.f32 %v5902_v53, %v5901_v16  ;;  %v5790_v4 = vpop.f32.mrb[71].mxu1 }
 0x269   : > { %v4067_v61 = vadd.f32 %v5788_v44, %v7914_v14  ;;  %v5791_v37 = vadd.f32 %v5790_v4, %v5789_v32 }
 0x26b   : > { %v4070_v35 = vadd.f32 %v5791_v37, %v7914_v14  ;;  %v8245_v41 = vadd.f32 %v5900_v33, %v4067_v61  ;;  %v6458_v33 = vld [vmem:[%s8527_s4] ss:$0 sm:$0xff]  ;;  %v6439_v61 = vld [vmem:[%s8528_s5 + $0x38] sm:$0xff]  }
 0x26c   : > { %6284 = vmatprep.subr.bf16.mxu0 %v6439_v61 }
 0x26d   : > { %v8250_v9 = vadd.f32 %v5903_v31, %v4070_v35  ;;  %6285 = vmatpush3.bf16.msra.mxu0 %v6439_v61 }
 0x26e   : > { %v5792_v49 = vpop.f32.mrb[72].mxu1 }
 0x26f   : > { %v5793_v12 = vpop.f32.mrb[73].mxu1 }
 0x270   : > { %v5794_v21 = vadd.f32 %v5793_v12, %v5792_v49  ;;  %v5795_v46 = vpop.f32.mrb[74].mxu1 }
 0x271   : > { %v5796_v30 = vpop.f32.mrb[75].mxu1 }
 0x272   : > { %v4075_v11 = vadd.f32 %v5794_v21, %v7914_v14  ;;  %v5797_v39 = vadd.f32 %v5796_v30, %v5795_v46 }
 0x273   : > { %v5904_v26 = vpop.f32.mrb[72].mxu0 }
 0x274   : > { %v5905_v15 = vpop.f32.mrb[73].mxu0  ;;  %v4078_v22 = vadd.f32 %v5797_v39, %v7914_v14 }
 0x275   : > { %v5906_v3 = vadd.f32 %v5905_v15, %v5904_v26  ;;  %v5907_v19 = vpop.f32.mrb[74].mxu0 }
 0x276   : > { %v5908_v0 = vpop.f32.mrb[75].mxu0  ;;  %v5798_v45 = vpop.f32.mrb[76].mxu1 }
 0x277   : > { %v5909_v57 = vadd.f32 %v5908_v0, %v5907_v19  ;;  %v8254_v34 = vadd.f32 %v5906_v3, %v4075_v11  ;;  %v5799_v55 = vpop.f32.mrb[77].mxu1 }
 0x278   : > { %v5800_v59 = vadd.f32 %v5799_v55, %v5798_v45  ;;  %v5801_v10 = vpop.f32.mrb[78].mxu1 }
 0x279   : > { %v8256_v42 = vadd.f32 %v5909_v57, %v4078_v22  ;;  %v5802_v56 = vpop.f32.mrb[79].mxu1 }
 0x27a   : > { %v4083_v16 = vadd.f32 %v6458_v33, %v5800_v59  ;;  %v5803_v28 = vadd.f32 %v5802_v56, %v5801_v10 }
 0x27b   : > { %v5910_v51 = vpop.f32.mrb[76].mxu0 }
 0x27c   : > { %v5911_v8 = vpop.f32.mrb[77].mxu0  ;;  %v4086_v32 = vadd.f32 %v6458_v33, %v5803_v28 }
 0x27d   : > { %v5912_v44 = vadd.f32 %v5911_v8, %v5910_v51  ;;  %v5913_v14 = vpop.f32.mrb[78].mxu0 }
 0x27e   : > { %v5914_v53 = vpop.f32.mrb[79].mxu0  ;;  %v5932_v37 = vpop.f32.mrb[80].mxu1 }
 0x27f   : > { %v5915_v31 = vadd.f32 %v5914_v53, %v5913_v14  ;;  %v8261_v4 = vadd.f32 %v5912_v44, %v4083_v16  ;;  %v5933_v35 = vpop.f32.mrb[81].mxu1 }
 0x280   : > { %v5934_v49 = vadd.f32 %v5933_v35, %v5932_v37  ;;  %v5935_v12 = vpop.f32.mrb[82].mxu1 }
 0x281   : > { %v8266_v50 = vadd.f32 %v5915_v31, %v4086_v32  ;;  %v5936_v46 = vpop.f32.mrb[83].mxu1 }
 0x282   : > { %v4285_v30 = vadd.f32 %v5934_v49, %v7953_v6  ;;  %v5937_v15 = vadd.f32 %v5936_v46, %v5935_v12 }
 0x283   : > { %v6044_v21 = vpop.f32.mrb[80].mxu0 }
 0x284   : > { %v6045_v26 = vpop.f32.mrb[81].mxu0  ;;  %v4288_v19 = vadd.f32 %v5937_v15, %v7965_v24 }
 0x285   : > { %v6046_v11 = vadd.f32 %v6045_v26, %v6044_v21  ;;  %v6047_v39 = vpop.f32.mrb[82].mxu0 }
 0x286   : > { %v6048_v3 = vpop.f32.mrb[83].mxu0  ;;  %v5938_v57 = vpop.f32.mrb[84].mxu1 }
 0x287   : > { %v6049_v0 = vadd.f32 %v6048_v3, %v6047_v39  ;;  %v8270_v22 = vadd.f32 %v6046_v11, %v4285_v30  ;;  %v5939_v45 = vpop.f32.mrb[85].mxu1 }
 0x288   : > { %v5940_v59 = vadd.f32 %v5939_v45, %v5938_v57  ;;  %v5941_v10 = vpop.f32.mrb[86].mxu1 }
 0x289   : > { %v8272_v55 = vadd.f32 %v6049_v0, %v4288_v19  ;;  %v5942_v56 = vpop.f32.mrb[87].mxu1 }
 0x28a   : > { %v4293_v6 = vadd.f32 %v5940_v59, %v7988_v43  ;;  %v5943_v33 = vadd.f32 %v5942_v56, %v5941_v10 }
 0x28b   : > { %v6050_v51 = vpop.f32.mrb[84].mxu0 }
 0x28c   : > { %v6051_v8 = vpop.f32.mrb[85].mxu0  ;;  %v4296_v24 = vadd.f32 %v5943_v33, %v8003_v48 }
 0x28d   : > { %v6052_v16 = vadd.f32 %v6051_v8, %v6050_v51  ;;  %v6053_v28 = vpop.f32.mrb[86].mxu0 }
 0x28e   : > { %v6054_v44 = vpop.f32.mrb[87].mxu0  ;;  %v5944_v32 = vpop.f32.mrb[88].mxu1 }
 0x28f   : > { %v6055_v14 = vadd.f32 %v6054_v44, %v6053_v28  ;;  %v8276_v53 = vadd.f32 %v6052_v16, %v4293_v6  ;;  %v5945_v31 = vpop.f32.mrb[89].mxu1 }
 0x290   : > { %v5946_v37 = vadd.f32 %v5945_v31, %v5944_v32  ;;  %v5947_v35 = vpop.f32.mrb[90].mxu1 }
 0x291   : > { %v8278_v61 = vadd.f32 %v6055_v14, %v4296_v24  ;;  %v5948_v12 = vpop.f32.mrb[91].mxu1 }
 0x292   : > { %v4301_v43 = vadd.f32 %v5946_v37, %v8033_v36  ;;  %v5949_v46 = vadd.f32 %v5948_v12, %v5947_v35 }
 0x293   : > { %v6056_v49 = vpop.f32.mrb[88].mxu0 }
 0x294   : > { %v6057_v21 = vpop.f32.mrb[89].mxu0  ;;  %v4304_v48 = vadd.f32 %v5949_v46, %v8041_v1 }
 0x295   : > { %v6058_v26 = vadd.f32 %v6057_v21, %v6056_v49  ;;  %v6059_v30 = vpop.f32.mrb[90].mxu0 }
 0x296   : > { %v6060_v15 = vpop.f32.mrb[91].mxu0  ;;  %v5950_v3 = vpop.f32.mrb[92].mxu1 }
 0x297   : > { %v6061_v11 = vadd.f32 %v6060_v15, %v6059_v30  ;;  %v8282_v39 = vadd.f32 %v6058_v26, %v4301_v43  ;;  %v5951_v19 = vpop.f32.mrb[93].mxu1 }
 0x298   : > { %v5952_v57 = vadd.f32 %v5951_v19, %v5950_v3  ;;  %v5953_v45 = vpop.f32.mrb[94].mxu1 }
 0x299   : > { %v8284_v0 = vadd.f32 %v6061_v11, %v4304_v48  ;;  %v5954_v10 = vpop.f32.mrb[95].mxu1 }
 0x29a   : > { %v4309_v36 = vadd.f32 %v5952_v57, %v8064_v52  ;;  %v5955_v56 = vadd.f32 %v5954_v10, %v5953_v45 }
 0x29b   : > { %v6062_v59 = vpop.f32.mrb[92].mxu0 }
 0x29c   : > { %v6063_v51 = vpop.f32.mrb[93].mxu0  ;;  %v4312_v1 = vadd.f32 %v5955_v56, %v8076_v5 }
 0x29d   : > { %v6064_v8 = vadd.f32 %v6063_v51, %v6062_v59  ;;  %v6065_v6 = vpop.f32.mrb[94].mxu0 }
 0x29e   : > { %v6066_v33 = vpop.f32.mrb[95].mxu0  ;;  %v5956_v44 = vpop.f32.mrb[96].mxu1 }
 0x29f   : > { %v6067_v16 = vadd.f32 %v6066_v33, %v6065_v6  ;;  %v8288_v28 = vadd.f32 %v6064_v8, %v4309_v36  ;;  %v5957_v24 = vpop.f32.mrb[97].mxu1 }
 0x2a0   : > { %v5958_v32 = vadd.f32 %v5957_v24, %v5956_v44  ;;  %v5959_v31 = vpop.f32.mrb[98].mxu1 }
 0x2a1   : > { %v8290_v14 = vadd.f32 %v6067_v16, %v4312_v1  ;;  %v5960_v35 = vpop.f32.mrb[99].mxu1 }
 0x2a2   : > { %v4317_v52 = vadd.f32 %v5958_v32, %v8094_v63  ;;  %v5961_v12 = vadd.f32 %v5960_v35, %v5959_v31 }
 0x2a3   : > { %v6068_v37 = vpop.f32.mrb[96].mxu0 }
 0x2a4   : > { %v6069_v49 = vpop.f32.mrb[97].mxu0  ;;  %v4320_v5 = vadd.f32 %v5961_v12, %v8104_v7 }
 0x2a5   : > { %v6070_v21 = vadd.f32 %v6069_v49, %v6068_v37  ;;  %v6071_v43 = vpop.f32.mrb[98].mxu0 }
 0x2a6   : > { %v6072_v46 = vpop.f32.mrb[99].mxu0  ;;  %v5962_v15 = vpop.f32.mrb[100].mxu1 }
 0x2a7   : > { %v6073_v26 = vadd.f32 %v6072_v46, %v6071_v43  ;;  %v8294_v30 = vadd.f32 %v6070_v21, %v4317_v52  ;;  %v5963_v48 = vpop.f32.mrb[101].mxu1 }
 0x2a8   : > { %v5964_v3 = vadd.f32 %v5963_v48, %v5962_v15  ;;  %v5965_v19 = vpop.f32.mrb[102].mxu1 }
 0x2a9   : > { %v8296_v11 = vadd.f32 %v6073_v26, %v4320_v5  ;;  %v5966_v45 = vpop.f32.mrb[103].mxu1 }
 0x2aa   : > { %v4325_v63 = vadd.f32 %v5964_v3, %v8117_v2  ;;  %v5967_v10 = vadd.f32 %v5966_v45, %v5965_v19 }
 0x2ab   : > { %v6074_v57 = vpop.f32.mrb[100].mxu0 }
 0x2ac   : > { %v6075_v59 = vpop.f32.mrb[101].mxu0  ;;  %v4328_v7 = vadd.f32 %v5967_v10, %v8128_v40 }
 0x2ad   : > { %v6076_v51 = vadd.f32 %v6075_v59, %v6074_v57  ;;  %v6077_v36 = vpop.f32.mrb[102].mxu0 }
 0x2ae   : > { %v6078_v56 = vpop.f32.mrb[103].mxu0  ;;  %v5968_v33 = vpop.f32.mrb[104].mxu1 }
 0x2af   : > { %v6079_v8 = vadd.f32 %v6078_v56, %v6077_v36  ;;  %v8300_v6 = vadd.f32 %v6076_v51, %v4325_v63  ;;  %v5969_v1 = vpop.f32.mrb[105].mxu1 }
 0x2b0   : > { %v5970_v44 = vadd.f32 %v5969_v1, %v5968_v33  ;;  %v5971_v24 = vpop.f32.mrb[106].mxu1 }
 0x2b1   : > { %v8302_v16 = vadd.f32 %v6079_v8, %v4328_v7  ;;  %v5972_v31 = vpop.f32.mrb[107].mxu1 }
 0x2b2   : > { %v4333_v2 = vadd.f32 %v5970_v44, %v8140_v27  ;;  %v5973_v35 = vadd.f32 %v5972_v31, %v5971_v24 }
 0x2b3   : > { %v6080_v32 = vpop.f32.mrb[104].mxu0 }
 0x2b4   : > { %v6081_v37 = vpop.f32.mrb[105].mxu0  ;;  %v4336_v40 = vadd.f32 %v5973_v35, %v8149_v13 }
 0x2b5   : > { %v6082_v49 = vadd.f32 %v6081_v37, %v6080_v32  ;;  %v6083_v52 = vpop.f32.mrb[106].mxu0 }
 0x2b6   : > { %v6084_v12 = vpop.f32.mrb[107].mxu0  ;;  %v5974_v46 = vpop.f32.mrb[108].mxu1 }
 0x2b7   : > { %v6085_v21 = vadd.f32 %v6084_v12, %v6083_v52  ;;  %v8306_v43 = vadd.f32 %v6082_v49, %v4333_v2  ;;  %v5975_v5 = vpop.f32.mrb[109].mxu1 }
 0x2b8   : > { %v5976_v15 = vadd.f32 %v5975_v5, %v5974_v46  ;;  %v5977_v48 = vpop.f32.mrb[110].mxu1 }
 0x2b9   : > { %v8308_v26 = vadd.f32 %v6085_v21, %v4336_v40  ;;  %v5978_v19 = vpop.f32.mrb[111].mxu1 }
 0x2ba   : > { %v4341_v27 = vadd.f32 %v5976_v15, %v8161_v47  ;;  %v5979_v45 = vadd.f32 %v5978_v19, %v5977_v48 }
 0x2bb   : > { %v6086_v3 = vpop.f32.mrb[108].mxu0 }
 0x2bc   : > { %v6087_v57 = vpop.f32.mrb[109].mxu0  ;;  %v4344_v13 = vadd.f32 %v5979_v45, %v8173_v60 }
 0x2bd   : > { %v6088_v59 = vadd.f32 %v6087_v57, %v6086_v3  ;;  %v6089_v63 = vpop.f32.mrb[110].mxu0 }
 0x2be   : > { %v6090_v10 = vpop.f32.mrb[111].mxu0  ;;  %v5980_v56 = vpop.f32.mrb[112].mxu1 }
 0x2bf   : > { %v6091_v51 = vadd.f32 %v6090_v10, %v6089_v63  ;;  %v8312_v36 = vadd.f32 %v6088_v59, %v4341_v27  ;;  %v5981_v7 = vpop.f32.mrb[113].mxu1 }
 0x2c0   : > { %v5982_v33 = vadd.f32 %v5981_v7, %v5980_v56  ;;  %v5983_v1 = vpop.f32.mrb[114].mxu1 }
 0x2c1   : > { %v8314_v8 = vadd.f32 %v6091_v51, %v4344_v13  ;;  %v5984_v24 = vpop.f32.mrb[115].mxu1 }
 0x2c2   : > { %v4349_v47 = vadd.f32 %v5982_v33, %v8188_v25  ;;  %v5985_v31 = vadd.f32 %v5984_v24, %v5983_v1 }
 0x2c3   : > { %v6092_v44 = vpop.f32.mrb[112].mxu0 }
 0x2c4   : > { %v6093_v32 = vpop.f32.mrb[113].mxu0  ;;  %v4352_v60 = vadd.f32 %v5985_v31, %v8195_v29 }
 0x2c5   : > { %v6094_v37 = vadd.f32 %v6093_v32, %v6092_v44  ;;  %v6095_v2 = vpop.f32.mrb[114].mxu0 }
 0x2c6   : > { %v6096_v35 = vpop.f32.mrb[115].mxu0  ;;  %v5986_v12 = vpop.f32.mrb[116].mxu1 }
 0x2c7   : > { %v6097_v49 = vadd.f32 %v6096_v35, %v6095_v2  ;;  %v8318_v52 = vadd.f32 %v6094_v37, %v4349_v47  ;;  %v5987_v40 = vpop.f32.mrb[117].mxu1 }
 0x2c8   : > { %v5988_v46 = vadd.f32 %v5987_v40, %v5986_v12  ;;  %v5989_v5 = vpop.f32.mrb[118].mxu1 }
 0x2c9   : > { %v8320_v21 = vadd.f32 %v6097_v49, %v4352_v60  ;;  %v5990_v48 = vpop.f32.mrb[119].mxu1 }
 0x2ca   : > { %v4357_v25 = vadd.f32 %v5988_v46, %v8208_v58  ;;  %v5991_v19 = vadd.f32 %v5990_v48, %v5989_v5 }
 0x2cb   : > { %v6098_v15 = vpop.f32.mrb[116].mxu0 }
 0x2cc   : > { %v6099_v3 = vpop.f32.mrb[117].mxu0  ;;  %v4360_v29 = vadd.f32 %v5991_v19, %v8213_v54 }
 0x2cd   : > { %v6100_v57 = vadd.f32 %v6099_v3, %v6098_v15  ;;  %v6101_v27 = vpop.f32.mrb[118].mxu0 }
 0x2ce   : > { %v6102_v45 = vpop.f32.mrb[119].mxu0  ;;  %v5992_v10 = vpop.f32.mrb[120].mxu1 }
 0x2cf   : > { %v6103_v59 = vadd.f32 %v6102_v45, %v6101_v27  ;;  %v8324_v63 = vadd.f32 %v6100_v57, %v4357_v25  ;;  %v5993_v13 = vpop.f32.mrb[121].mxu1 }
 0x2d0   : > { %v5994_v56 = vadd.f32 %v5993_v13, %v5992_v10  ;;  %v5995_v7 = vpop.f32.mrb[122].mxu1 }
 0x2d1   : > { %v8326_v51 = vadd.f32 %v6103_v59, %v4360_v29  ;;  %v5996_v1 = vpop.f32.mrb[123].mxu1 }
 0x2d2   : > { %v4365_v58 = vadd.f32 %v5994_v56, %v8221_v62  ;;  %v5997_v24 = vadd.f32 %v5996_v1, %v5995_v7 }
 0x2d3   : > { %v6104_v33 = vpop.f32.mrb[120].mxu0 }
 0x2d4   : > { %v6105_v44 = vpop.f32.mrb[121].mxu0  ;;  %v4368_v54 = vadd.f32 %v5997_v24, %v8223_v18 }
 0x2d5   : > { %v6106_v32 = vadd.f32 %v6105_v44, %v6104_v33  ;;  %v6107_v47 = vpop.f32.mrb[122].mxu0 }
 0x2d6   : > { %v6108_v31 = vpop.f32.mrb[123].mxu0  ;;  %v5998_v35 = vpop.f32.mrb[124].mxu1 }
 0x2d7   : > { %v6109_v37 = vadd.f32 %v6108_v31, %v6107_v47  ;;  %v8330_v2 = vadd.f32 %v6106_v32, %v4365_v58  ;;  %v5999_v60 = vpop.f32.mrb[125].mxu1 }
 0x2d8   : > { %v6000_v12 = vadd.f32 %v5999_v60, %v5998_v35  ;;  %v6001_v40 = vpop.f32.mrb[126].mxu1 }
 0x2d9   : > { %v8332_v49 = vadd.f32 %v6109_v37, %v4368_v54  ;;  %v6002_v5 = vpop.f32.mrb[127].mxu1 }
 0x2da   : > { %v4373_v62 = vadd.f32 %v6000_v12, %v8229_v38  ;;  %v6003_v48 = vadd.f32 %v6002_v5, %v6001_v40 }
 0x2db   : > { %v6110_v46 = vpop.f32.mrb[124].mxu0 }
 0x2dc   : > { %v6111_v15 = vpop.f32.mrb[125].mxu0  ;;  %v4376_v18 = vadd.f32 %v6003_v48, %v8234_v23 }
 0x2dd   : > { %v6112_v3 = vadd.f32 %v6111_v15, %v6110_v46  ;;  %v6113_v25 = vpop.f32.mrb[126].mxu0 }
 0x2de   : > { %v6114_v19 = vpop.f32.mrb[127].mxu0  ;;  %v6004_v45 = vpop.f32.mrb[128].mxu1 }
 0x2df   : > { %v6115_v57 = vadd.f32 %v6114_v19, %v6113_v25  ;;  %v8336_v27 = vadd.f32 %v6112_v3, %v4373_v62  ;;  %v6005_v29 = vpop.f32.mrb[129].mxu1 }
 0x2e0   : > { %v6006_v10 = vadd.f32 %v6005_v29, %v6004_v45  ;;  %v6007_v13 = vpop.f32.mrb[130].mxu1 }
 0x2e1   : > { %v8338_v59 = vadd.f32 %v6115_v57, %v4376_v18  ;;  %v6008_v7 = vpop.f32.mrb[131].mxu1 }
 0x2e2   : > { %v4381_v38 = vadd.f32 %v6006_v10, %v8239_v20  ;;  %v6009_v1 = vadd.f32 %v6008_v7, %v6007_v13 }
 0x2e3   : > { %v6116_v56 = vpop.f32.mrb[128].mxu0 }
 0x2e4   : > { %v6117_v33 = vpop.f32.mrb[129].mxu0  ;;  %v4384_v23 = vadd.f32 %v6009_v1, %v8241_v17 }
 0x2e5   : > { %v6118_v44 = vadd.f32 %v6117_v33, %v6116_v56  ;;  %v6119_v58 = vpop.f32.mrb[130].mxu0 }
 0x2e6   : > { %v6120_v24 = vpop.f32.mrb[131].mxu0  ;;  %v6010_v31 = vpop.f32.mrb[132].mxu1 }
 0x2e7   : > { %v6121_v32 = vadd.f32 %v6120_v24, %v6119_v58  ;;  %v8342_v47 = vadd.f32 %v6118_v44, %v4381_v38  ;;  %v6011_v54 = vpop.f32.mrb[133].mxu1 }
 0x2e8   : > { %v6012_v35 = vadd.f32 %v6011_v54, %v6010_v31  ;;  %v6013_v60 = vpop.f32.mrb[134].mxu1 }
 0x2e9   : > { %v8344_v37 = vadd.f32 %v6121_v32, %v4384_v23  ;;  %v6014_v40 = vpop.f32.mrb[135].mxu1 }
 0x2ea   : > { %v4389_v20 = vadd.f32 %v6012_v35, %v8245_v41  ;;  %v6015_v5 = vadd.f32 %v6014_v40, %v6013_v60 }
 0x2eb   : > { %v6122_v12 = vpop.f32.mrb[132].mxu0 }
 0x2ec   : > { %v6123_v46 = vpop.f32.mrb[133].mxu0  ;;  %v4392_v17 = vadd.f32 %v6015_v5, %v8250_v9 }
 0x2ed   : > { %v6124_v15 = vadd.f32 %v6123_v46, %v6122_v12  ;;  %v6125_v62 = vpop.f32.mrb[134].mxu0 }
 0x2ee   : > { %v6126_v48 = vpop.f32.mrb[135].mxu0  ;;  %v6016_v19 = vpop.f32.mrb[136].mxu1 }
 0x2ef   : > { %v6127_v3 = vadd.f32 %v6126_v48, %v6125_v62  ;;  %v8348_v25 = vadd.f32 %v6124_v15, %v4389_v20  ;;  %v6017_v18 = vpop.f32.mrb[137].mxu1 }
 0x2f0   : > { %v6018_v45 = vadd.f32 %v6017_v18, %v6016_v19  ;;  %v6019_v29 = vpop.f32.mrb[138].mxu1 }
 0x2f1   : > { %v8350_v57 = vadd.f32 %v6127_v3, %v4392_v17  ;;  %v6020_v13 = vpop.f32.mrb[139].mxu1 }
 0x2f2   : > { %v4397_v41 = vadd.f32 %v6018_v45, %v8254_v34  ;;  %v6021_v7 = vadd.f32 %v6020_v13, %v6019_v29 }
 0x2f3   : > { %v6128_v10 = vpop.f32.mrb[136].mxu0 }
 0x2f4   : > { %v6129_v56 = vpop.f32.mrb[137].mxu0  ;;  %v4400_v9 = vadd.f32 %v6021_v7, %v8256_v42 }
 0x2f5   : > { %v6130_v33 = vadd.f32 %v6129_v56, %v6128_v10  ;;  %v6131_v38 = vpop.f32.mrb[138].mxu0 }
 0x2f6   : > { %v6132_v1 = vpop.f32.mrb[139].mxu0  ;;  %v6022_v24 = vpop.f32.mrb[140].mxu1 }
 0x2f7   : > { %v6133_v44 = vadd.f32 %v6132_v1, %v6131_v38  ;;  %v8354_v58 = vadd.f32 %v6130_v33, %v4397_v41  ;;  %v6023_v23 = vpop.f32.mrb[141].mxu1 }
 0x2f8   : > { %v6024_v31 = vadd.f32 %v6023_v23, %v6022_v24  ;;  %v6025_v54 = vpop.f32.mrb[142].mxu1 }
 0x2f9   : > { %v8356_v32 = vadd.f32 %v6133_v44, %v4400_v9  ;;  %v6026_v60 = vpop.f32.mrb[143].mxu1 }
 0x2fa   : > { %v4405_v34 = vadd.f32 %v6024_v31, %v8261_v4  ;;  %v6027_v40 = vadd.f32 %v6026_v60, %v6025_v54 }
 0x2fb   : > { %v6134_v35 = vpop.f32.mrb[140].mxu0 }
 0x2fc   : > { %v6135_v12 = vpop.f32.mrb[141].mxu0  ;;  %v4408_v42 = vadd.f32 %v6027_v40, %v8266_v50 }
 0x2fd   : > { %v6136_v46 = vadd.f32 %v6135_v12, %v6134_v35  ;;  %v6137_v20 = vpop.f32.mrb[142].mxu0 }
 0x2fe   : > { %v6138_v5 = vpop.f32.mrb[143].mxu0  ;;  %v6240_v48 = vpop.f32.mrb[144].mxu1 }
 0x2ff   : > { %v6139_v15 = vadd.f32 %v6138_v5, %v6137_v20  ;;  %v8360_v62 = vadd.f32 %v6136_v46, %v4405_v34  ;;  %v4615_v17 = vadd.f32 %v6240_v48, %v8276_v53  ;;  %v4606_v3 = vpop.f32.mrb[145].mxu1 }
 0x300   : > { %v4607_v18 = vadd.f32 %v4606_v3, %v8270_v22  ;;  %v6241_v45 = vpop.f32.mrb[146].mxu1 }
 0x301   : > { %v8363_v19 = vadd.f32 %v6139_v15, %v4408_v42  ;;  %v4618_v4 = vadd.f32 %v6241_v45, %v8278_v61  ;;  %v4609_v29 = vpop.f32.mrb[147].mxu1  ;;  %v4735_v13 = vmax.f32 %v4615_v17, 0.0 }
 0x302   : > { %v4610_v10 = vadd.f32 %v4609_v29, %v8272_v55  ;;  %v4733_v50 = vmax.f32 %v4607_v18, 0.0 }
 0x303   : > { %v4736_v56 = vmax.f32 %v4618_v4, 0.0 }
 0x304   : > { %v4734_v41 = vmax.f32 %v4610_v10, 0.0 }
 0x305   : > { %v4766_v7 = vpack.c.bf16 %v4736_v56, %v4735_v13 }
 0x306   : > { %v4765_v33 = vpack.c.bf16 %v4734_v41, %v4733_v50  ;;  %v6244_v38 = vpop.f32.mrb[148].mxu1 }
 0x307   : > { %v4631_v53 = vadd.f32 %v6244_v38, %v8288_v28  ;;  %v4622_v1 = vpop.f32.mrb[149].mxu1 }
 0x308   : > { %v4623_v9 = vadd.f32 %v4622_v1, %v8282_v39  ;;  %v6245_v44 = vpop.f32.mrb[150].mxu1  ;;  %6286 = vmatprep.mubr.bf16.mxu0 %v4765_v33 }
 0x309   : > { %v4634_v22 = vadd.f32 %v6245_v44, %v8290_v14  ;;  %v4625_v61 = vpop.f32.mrb[151].mxu1  ;;  %6287 = vmatmul.mubr.bf16.vlgmr.msra.gmra.mrb[144].mxu0 %v4766_v7  ;;  %v4739_v24 = vmax.f32 %v4631_v53, 0.0 }
 0x30a   : > { %v4626_v55 = vadd.f32 %v4625_v61, %v8284_v0  ;;  %v4737_v31 = vmax.f32 %v4623_v9, 0.0 }
 0x30b   : > { %v4740_v23 = vmax.f32 %v4634_v22, 0.0 }
 0x30c   : > { %v4738_v54 = vmax.f32 %v4626_v55, 0.0 }
 0x30d   : > { %v4768_v35 = vpack.c.bf16 %v4740_v23, %v4739_v24 }
 0x30e   : > { %v4767_v60 = vpack.c.bf16 %v4738_v54, %v4737_v31  ;;  %v6248_v12 = vpop.f32.mrb[152].mxu1 }
 0x30f   : > { %v4647_v28 = vadd.f32 %v6248_v12, %v8300_v6  ;;  %v4638_v34 = vpop.f32.mrb[153].mxu1 }
 0x310   : > { %v4639_v39 = vadd.f32 %v4638_v34, %v8294_v30  ;;  %v6249_v40 = vpop.f32.mrb[154].mxu1  ;;  %6290 = vmatprep.mubr.bf16.mxu0 %v4767_v60 }
 0x311   : > { %v4650_v14 = vadd.f32 %v6249_v40, %v8302_v16  ;;  %v4641_v46 = vpop.f32.mrb[155].mxu1  ;;  %6291 = vmatmul.mubr.bf16.gmra.mrb[148].mxu0 %v4768_v35  ;;  %v4743_v20 = vmax.f32 %v4647_v28, 0.0 }
 0x312   : > { %v4642_v0 = vadd.f32 %v4641_v46, %v8296_v11  ;;  %v4741_v42 = vmax.f32 %v4639_v39, 0.0 }
 0x313   : > { %v4744_v5 = vmax.f32 %v4650_v14, 0.0 }
 0x314   : > { %v4742_v15 = vmax.f32 %v4642_v0, 0.0 }
 0x315   : > { %v4770_v48 = vpack.c.bf16 %v4744_v5, %v4743_v20 }
 0x316   : > { %v4769_v17 = vpack.c.bf16 %v4742_v15, %v4741_v42  ;;  %v6252_v3 = vpop.f32.mrb[156].mxu1 }
 0x317   : > { %v4663_v6 = vadd.f32 %v6252_v3, %v8312_v36  ;;  %v4654_v18 = vpop.f32.mrb[157].mxu1 }
 0x318   : > { %v4655_v30 = vadd.f32 %v4654_v18, %v8306_v43  ;;  %v6253_v45 = vpop.f32.mrb[158].mxu1  ;;  %6294 = vmatprep.mubr.bf16.mxu0 %v4769_v17 }
 0x319   : > { %v4666_v16 = vadd.f32 %v6253_v45, %v8314_v8  ;;  %v4657_v4 = vpop.f32.mrb[159].mxu1  ;;  %6295 = vmatmul.mubr.bf16.gmra.mrb[152].mxu0 %v4770_v48  ;;  %v4747_v29 = vmax.f32 %v4663_v6, 0.0 }
 0x31a   : > { %v4658_v11 = vadd.f32 %v4657_v4, %v8308_v26  ;;  %v4745_v13 = vmax.f32 %v4655_v30, 0.0 }
 0x31b   : > { %v4748_v10 = vmax.f32 %v4666_v16, 0.0 }
 0x31c   : > { %v4746_v56 = vmax.f32 %v4658_v11, 0.0 }
 0x31d   : > { %v4772_v50 = vpack.c.bf16 %v4748_v10, %v4747_v29 }
 0x31e   : > { %v4771_v41 = vpack.c.bf16 %v4746_v56, %v4745_v13  ;;  %v6256_v7 = vpop.f32.mrb[160].mxu1  ;;  %v5597_v13 = vld [vmem:[%s6599_s22] sm:$0xff]  }
 0x31f   : > { %v4679_v36 = vadd.f32 %v6256_v7, %v8324_v63  ;;  %v4670_v33 = vpop.f32.mrb[161].mxu1 }
 0x320   : > { %v4671_v43 = vadd.f32 %v4670_v33, %v8318_v52  ;;  %v6257_v38 = vpop.f32.mrb[162].mxu1  ;;  %6298 = vmatprep.mubr.bf16.mxu0 %v4771_v41 }
 0x321   : > { %v4682_v8 = vadd.f32 %v6257_v38, %v8326_v51  ;;  %v4673_v53 = vpop.f32.mrb[163].mxu1  ;;  %6299 = vmatmul.mubr.bf16.gmra.mrb[156].mxu0 %v4772_v50  ;;  %v4751_v1 = vmax.f32 %v4679_v36, 0.0 }
 0x322   : > { %v4674_v26 = vadd.f32 %v4673_v53, %v8320_v21  ;;  %v4749_v44 = vmax.f32 %v4671_v43, 0.0  ;;  %v5599_v43 = vunpack.c.h.bf16 %v5597_v13 }
 0x323   : > { %v4752_v9 = vmax.f32 %v4682_v8, 0.0 }
 0x324   : > { %v4750_v22 = vmax.f32 %v4674_v26, 0.0 }
 0x325   : > { %v4774_v61 = vpack.c.bf16 %v4752_v9, %v4751_v1  ;;  %v5662_v9 = vld [vmem:[%s6599_s22 + $0x18] sm:$0xff]  }
 0x326   : > { %v4773_v55 = vpack.c.bf16 %v4750_v22, %v4749_v44  ;;  %v6260_v24 = vpop.f32.mrb[164].mxu1 }
 0x327   : > { %v4695_v63 = vadd.f32 %v6260_v24, %v8336_v27  ;;  %v4686_v23 = vpop.f32.mrb[165].mxu1 }
 0x328   : > { %v4687_v52 = vadd.f32 %v4686_v23, %v8330_v2  ;;  %v6261_v31 = vpop.f32.mrb[166].mxu1  ;;  %6302 = vmatprep.mubr.bf16.mxu0 %v4773_v55 }
 0x329   : > { %v4698_v51 = vadd.f32 %v6261_v31, %v8338_v59  ;;  %v4689_v54 = vpop.f32.mrb[167].mxu1  ;;  %6303 = vmatmul.mubr.bf16.gmra.mrb[160].mxu0 %v4774_v61  ;;  %v4755_v35 = vmax.f32 %v4695_v63, 0.0  ;;  %v5661_v61 = vld [vmem:[%s6599_s22 + $0x10] sm:$0xff]  }
 0x32a   : > { %v4690_v21 = vadd.f32 %v4689_v54, %v8332_v49  ;;  %v4753_v12 = vmax.f32 %v4687_v52, 0.0  ;;  %v5610_v52 = vunpack.c.l.bf16 %v5662_v9 }
 0x32b   : > { %v4756_v60 = vmax.f32 %v4698_v51, 0.0 }
 0x32c   : > { %v4754_v28 = vmax.f32 %v4690_v21, 0.0  ;;  %v5606_v21 = vunpack.c.l.bf16 %v5661_v61 }
 0x32d   : > { %v4776_v34 = vpack.c.bf16 %v4756_v60, %v4755_v35 }
 0x32e   : > { %v4775_v39 = vpack.c.bf16 %v4754_v28, %v4753_v12  ;;  %v6264_v40 = vpop.f32.mrb[168].mxu1  ;;  %v5611_v28 = vunpack.c.h.bf16 %v5662_v9 }
 0x32f   : > { %v4711_v27 = vadd.f32 %v6264_v40, %v8348_v25  ;;  %v4702_v14 = vpop.f32.mrb[169].mxu1 }
 0x330   : > { %v4703_v2 = vadd.f32 %v4702_v14, %v8342_v47  ;;  %v6265_v46 = vpop.f32.mrb[170].mxu1  ;;  %6306 = vmatprep.mubr.bf16.mxu0 %v4775_v39 }
 0x331   : > { %v4714_v59 = vadd.f32 %v6265_v46, %v8350_v57  ;;  %v4705_v0 = vpop.f32.mrb[171].mxu1  ;;  %6307 = vmatmul.mubr.bf16.gmra.mrb[164].mxu0 %v4776_v34  ;;  %v4759_v20 = vmax.f32 %v4711_v27, 0.0  ;;  %v5607_v27 = vunpack.c.h.bf16 %v5661_v61 }
 0x332   : > { %v4706_v49 = vadd.f32 %v4705_v0, %v8344_v37  ;;  %v4757_v42 = vmax.f32 %v4703_v2, 0.0 }
 0x333   : > { %v4760_v5 = vmax.f32 %v4714_v59, 0.0 }
 0x334   : > { %v4758_v15 = vmax.f32 %v4706_v49, 0.0  ;;  %v5664_v49 = vld [vmem:[%s6599_s22 + $0x28] sm:$0xff]  }
 0x335   : > { %v4778_v48 = vpack.c.bf16 %v4760_v5, %v4759_v20 }
 0x336   : > { %v4777_v17 = vpack.c.bf16 %v4758_v15, %v4757_v42  ;;  %v6268_v3 = vpop.f32.mrb[172].mxu1  ;;  %v5663_v42 = vld [vmem:[%s6599_s22 + $0x20] sm:$0xff]  }
 0x337   : > { %v4727_v25 = vadd.f32 %v6268_v3, %v8360_v62  ;;  %v4718_v6 = vpop.f32.mrb[173].mxu1  ;;  %v5660_v62 = vld [vmem:[%s6599_s22 + $0x8] sm:$0xff]  }
 0x338   : > { %v4719_v47 = vadd.f32 %v4718_v6, %v8354_v58  ;;  %v6269_v18 = vpop.f32.mrb[174].mxu1  ;;  %6310 = vmatprep.mubr.bf16.mxu0 %v4777_v17  ;;  %v8401_v58 = vld [vmem:[%s8529_s6] ss:$0 sm:$0xff]  ;;  %v5603_v7 = vunpack.c.h.bf16 %v5660_v62 }
 0x339   : > { %v4730_v57 = vadd.f32 %v6269_v18, %v8363_v19  ;;  %v4721_v30 = vpop.f32.mrb[175].mxu1  ;;  %6311 = vmatmul.mubr.bf16.gmra.mrb[168].mxu0 %v4778_v48  ;;  %v4763_v45 = vmax.f32 %v4727_v25, 0.0  ;;  %v5602_v19 = vunpack.c.l.bf16 %v5660_v62  ;;  %v5618_v25 = vunpack.c.l.bf16 %v5664_v49 }
 0x33a   : > { %v4722_v37 = vadd.f32 %v4721_v30, %v8356_v32  ;;  %v4761_v4 = vmax.f32 %v4719_v47, 0.0  ;;  %v5598_v32 = vunpack.c.l.bf16 %v5597_v13 }
 0x33b   : > { %v4764_v16 = vmax.f32 %v4730_v57, 0.0  ;;  %v5614_v57 = vunpack.c.l.bf16 %v5663_v42 }
 0x33c   : > { %v4762_v11 = vmax.f32 %v4722_v37, 0.0 }
 0x33d   : > { %v4780_v29 = vpack.c.bf16 %v4764_v16, %v4763_v45  ;;  %v5619_v16 = vunpack.c.h.bf16 %v5664_v49 }
 0x33e   : > { %v4779_v10 = vpack.c.bf16 %v4762_v11, %v4761_v4 }
 0x340   : > { %6314 = vmatprep.mubr.bf16.mxu0 %v4779_v10  ;;  %v5615_v10 = vunpack.c.h.bf16 %v5663_v42 }
 0x341   : > { %6315 = vmatmul.mubr.bf16.gmra.mrb[172].mxu0 %v4780_v29 }
 0x3dc   : > { %v6288_v56 = vpop.f32.mrb[144].mxu0 }
 0x3dd   : > { %v4895_v50 = vadd.f32 %v6288_v56, %v8401_v58  ;;  %v4886_v41 = vpop.f32.mrb[145].mxu0 }
 0x3de   : > { %v4887_v36 = vadd.f32 %v8401_v58, %v4886_v41  ;;  %v6289_v33 = vpop.f32.mrb[146].mxu0 }
 0x3df   : > { %v5079_v38 = vadd.f32 %v5602_v19, %v4895_v50  ;;  %v4898_v8 = vadd.f32 %v6289_v33, %v8401_v58  ;;  %v4889_v53 = vpop.f32.mrb[147].mxu0  ;;  %v5666_v50 = vld [vmem:[%s6599_s22 + $0x38] sm:$0xff]  }
 0x3e0   : > { %v5077_v26 = vadd.f32 %v5598_v32, %v4887_v36  ;;  %v4890_v1 = vadd.f32 %v8401_v58, %v4889_v53  ;;  %v5665_v36 = vld [vmem:[%s6599_s22 + $0x30] sm:$0xff]   ;;  %v5626_v53 = vunpack.c.l.bf16 %v5666_v50 }
 0x3e1   : > { %v5111_v44 = vmax.f32 %v5079_v38, 0.0  ;;  %v5080_v22 = vadd.f32 %v5603_v7, %v4898_v8 }
 0x3e2   : > { %v5109_v55 = vmax.f32 %v5077_v26, 0.0  ;;  %v5078_v24 = vadd.f32 %v5599_v43, %v4890_v1 }
 0x3e3   : > { %v5566_v63 = vpack.c.bf16 %v5111_v44, %v5111_v44  ;;  %v5112_v23 = vmax.f32 %v5080_v22, 0.0  ;;  %v5622_v44 = vunpack.c.l.bf16 %v5665_v36 }
 0x3e4   : > { %v5564_v31 = vpack.c.bf16 %v5109_v55, %v5109_v55  ;;  %v5110_v51 = vmax.f32 %v5078_v24, 0.0  ;;  %v6292_v54 = vpop.f32.mrb[148].mxu0  ;;  %v5627_v24 = vunpack.c.h.bf16 %v5666_v50 }
 0x3e5   : > { %5272 = vst.msk [vmem:[%s8414_s13 + $0x8] sm:$0xf] %vm5269_vm2, %v5566_v63  ;;  %v5567_v35 = vpack.c.bf16 %v5112_v23, %v5112_v23  ;;  %v4911_v60 = vadd.f32 %v6292_v54, %v8401_v58  ;;  %v4902_v12 = vpop.f32.mrb[149].mxu0 }
 0x3e6   : > { %5270 = vst.msk [vmem:[%s8414_s13] sm:$0xf] %vm5269_vm2, %v5564_v31  ;;  %v5565_v34 = vpack.c.bf16 %v5110_v51, %v5110_v51  ;;  %v4903_v39 = vadd.f32 %v8401_v58, %v4902_v12  ;;  %v6293_v40 = vpop.f32.mrb[150].mxu0  ;;  %v5623_v31 = vunpack.c.h.bf16 %v5665_v36  ;;  %v5668_v12 = vld [vmem:[%s6599_s22 + $0x48] sm:$0xff]  }
 0x3e7   : > { %5273 = vst.msk [vmem:[%s8414_s13 + $0xc] sm:$0xf] %vm5269_vm2, %v5567_v35  ;;  %v5083_v14 = vadd.f32 %v5610_v52, %v4911_v60  ;;  %v4914_v2 = vadd.f32 %v6293_v40, %v8401_v58  ;;  %v4905_v46 = vpop.f32.mrb[151].mxu0 }
 0x3e8   : > { %5271 = vst.msk [vmem:[%s8414_s13 + $0x4] sm:$0xf] %vm5269_vm2, %v5565_v34  ;;  %v5081_v59 = vadd.f32 %v5606_v21, %v4903_v39  ;;  %v4906_v0 = vadd.f32 %v8401_v58, %v4905_v46  ;;  %v5667_v39 = vld [vmem:[%s6599_s22 + $0x40] sm:$0xff]   ;;  %v5634_v46 = vunpack.c.l.bf16 %v5668_v12 }
 0x3e9   : > { %v5115_v20 = vmax.f32 %v5083_v14, 0.0  ;;  %v5084_v5 = vadd.f32 %v5611_v28, %v4914_v2 }
 0x3ea   : > { %v5113_v15 = vmax.f32 %v5081_v59, 0.0  ;;  %v5082_v48 = vadd.f32 %v5607_v27, %v4906_v0 }
 0x3eb   : > { %v5570_v17 = vpack.c.bf16 %v5115_v20, %v5115_v20  ;;  %v5116_v3 = vmax.f32 %v5084_v5, 0.0  ;;  %v5630_v20 = vunpack.c.l.bf16 %v5667_v39 }
 0x3ec   : > { %v5568_v6 = vpack.c.bf16 %v5113_v15, %v5113_v15  ;;  %v5114_v47 = vmax.f32 %v5082_v48, 0.0  ;;  %v6296_v18 = vpop.f32.mrb[152].mxu0  ;;  %v5635_v48 = vunpack.c.h.bf16 %v5668_v12 }
 0x3ed   : > { %5276 = vst.msk [vmem:[%s8414_s13 + $0x18] sm:$0xf] %vm5269_vm2, %v5570_v17  ;;  %v5571_v30 = vpack.c.bf16 %v5116_v3, %v5116_v3  ;;  %v4927_v37 = vadd.f32 %v6296_v18, %v8401_v58  ;;  %v4918_v45 = vpop.f32.mrb[153].mxu0 }
 0x3ee   : > { %5274 = vst.msk [vmem:[%s8414_s13 + $0x10] sm:$0xf] %vm5269_vm2, %v5568_v6  ;;  %v5569_v4 = vpack.c.bf16 %v5114_v47, %v5114_v47  ;;  %v4919_v11 = vadd.f32 %v8401_v58, %v4918_v45  ;;  %v6297_v29 = vpop.f32.mrb[154].mxu0  ;;  %v5631_v6 = vunpack.c.h.bf16 %v5667_v39  ;;  %v5670_v45 = vld [vmem:[%s6599_s22 + $0x58] sm:$0xff]  }
 0x3ef   : > { %5277 = vst.msk [vmem:[%s8414_s13 + $0x1c] sm:$0xf] %vm5269_vm2, %v5571_v30  ;;  %v5087_v62 = vadd.f32 %v5618_v25, %v4927_v37  ;;  %v4930_v13 = vadd.f32 %v6297_v29, %v8401_v58  ;;  %v4921_v19 = vpop.f32.mrb[155].mxu0 }
 0x3f0   : > { %5275 = vst.msk [vmem:[%s8414_s13 + $0x14] sm:$0xf] %vm5269_vm2, %v5569_v4  ;;  %v5085_v56 = vadd.f32 %v5614_v57, %v4919_v11  ;;  %v4922_v32 = vadd.f32 %v8401_v58, %v4921_v19  ;;  %v5669_v11 = vld [vmem:[%s6599_s22 + $0x50] sm:$0xff]   ;;  %v5642_v19 = vunpack.c.l.bf16 %v5670_v45 }
 0x3f1   : > { %v5119_v41 = vmax.f32 %v5087_v62, 0.0  ;;  %v5088_v7 = vadd.f32 %v5619_v16, %v4930_v13 }
 0x3f2   : > { %v5117_v33 = vmax.f32 %v5085_v56, 0.0  ;;  %v5086_v43 = vadd.f32 %v5615_v10, %v4922_v32 }
 0x3f3   : > { %v5574_v38 = vpack.c.bf16 %v5119_v41, %v5119_v41  ;;  %v5120_v8 = vmax.f32 %v5088_v7, 0.0  ;;  %v5638_v41 = vunpack.c.l.bf16 %v5669_v11 }
 0x3f4   : > { %v5572_v26 = vpack.c.bf16 %v5117_v33, %v5117_v33  ;;  %v5118_v1 = vmax.f32 %v5086_v43, 0.0  ;;  %v6300_v9 = vpop.f32.mrb[156].mxu0  ;;  %v5643_v43 = vunpack.c.h.bf16 %v5670_v45 }
 0x3f5   : > { %5280 = vst.msk [vmem:[%s8414_s13 + $0x28] sm:$0xf] %vm5269_vm2, %v5574_v38  ;;  %v5575_v22 = vpack.c.bf16 %v5120_v8, %v5120_v8  ;;  %v4943_v61 = vadd.f32 %v6300_v9, %v8401_v58  ;;  %v4934_v55 = vpop.f32.mrb[157].mxu0 }
 0x3f6   : > { %5278 = vst.msk [vmem:[%s8414_s13 + $0x20] sm:$0xf] %vm5269_vm2, %v5572_v26  ;;  %v5573_v63 = vpack.c.bf16 %v5118_v1, %v5118_v1  ;;  %v4935_v23 = vadd.f32 %v8401_v58, %v4934_v55  ;;  %v6301_v52 = vpop.f32.mrb[158].mxu0  ;;  %v5639_v26 = vunpack.c.h.bf16 %v5669_v11  ;;  %v5672_v55 = vld [vmem:[%s6599_s22 + $0x68] sm:$0xff]  }
 0x3f7   : > { %5281 = vst.msk [vmem:[%s8414_s13 + $0x2c] sm:$0xf] %vm5269_vm2, %v5575_v22  ;;  %v5091_v51 = vadd.f32 %v5626_v53, %v4943_v61  ;;  %v4946_v54 = vadd.f32 %v6301_v52, %v8401_v58  ;;  %v4937_v21 = vpop.f32.mrb[159].mxu0 }
 0x3f8   : > { %5279 = vst.msk [vmem:[%s8414_s13 + $0x24] sm:$0xf] %vm5269_vm2, %v5573_v63  ;;  %v5089_v35 = vadd.f32 %v5622_v44, %v4935_v23  ;;  %v4938_v60 = vadd.f32 %v8401_v58, %v4937_v21  ;;  %v5671_v23 = vld [vmem:[%s6599_s22 + $0x60] sm:$0xff]   ;;  %v5650_v21 = vunpack.c.l.bf16 %v5672_v55 }
 0x3f9   : > { %v5123_v28 = vmax.f32 %v5091_v51, 0.0  ;;  %v5092_v34 = vadd.f32 %v5627_v24, %v4946_v54 }
 0x3fa   : > { %v5121_v40 = vmax.f32 %v5089_v35, 0.0  ;;  %v5090_v27 = vadd.f32 %v5623_v31, %v4938_v60 }
 0x3fb   : > { %v5578_v14 = vpack.c.bf16 %v5123_v28, %v5123_v28  ;;  %v5124_v2 = vmax.f32 %v5092_v34, 0.0  ;;  %v5646_v28 = vunpack.c.l.bf16 %v5671_v23 }
 0x3fc   : > { %v5576_v59 = vpack.c.bf16 %v5121_v40, %v5121_v40  ;;  %v5122_v0 = vmax.f32 %v5090_v27, 0.0  ;;  %v6304_v49 = vpop.f32.mrb[160].mxu0  ;;  %v5651_v27 = vunpack.c.h.bf16 %v5672_v55 }
 0x3fd   : > { %5284 = vst.msk [vmem:[%s8414_s13 + $0x38] sm:$0xf] %vm5269_vm2, %v5578_v14  ;;  %v5579_v5 = vpack.c.bf16 %v5124_v2, %v5124_v2  ;;  %v4959_v42 = vadd.f32 %v6304_v49, %v8401_v58  ;;  %v4950_v15 = vpop.f32.mrb[161].mxu0 }
 0x3fe   : > { %5282 = vst.msk [vmem:[%s8414_s13 + $0x30] sm:$0xf] %vm5269_vm2, %v5576_v59  ;;  %v5577_v17 = vpack.c.bf16 %v5122_v0, %v5122_v0  ;;  %v4951_v3 = vadd.f32 %v8401_v58, %v4950_v15  ;;  %v6305_v25 = vpop.f32.mrb[162].mxu0  ;;  %v5647_v59 = vunpack.c.h.bf16 %v5671_v23  ;;  %v5674_v15 = vld [vmem:[%s6599_s22 + $0x78] sm:$0xff]  }
 0x3ff   : > { %5285 = vst.msk [vmem:[%s8414_s13 + $0x3c] sm:$0xf] %vm5269_vm2, %v5579_v5  ;;  %v5095_v47 = vadd.f32 %v5634_v46, %v4959_v42  ;;  %v4962_v18 = vadd.f32 %v6305_v25, %v8401_v58  ;;  %v4953_v57 = vpop.f32.mrb[163].mxu0 }
 0x400   : > { %5283 = vst.msk [vmem:[%s8414_s13 + $0x34] sm:$0xf] %vm5269_vm2, %v5577_v17  ;;  %v5093_v30 = vadd.f32 %v5630_v20, %v4951_v3  ;;  %v4954_v37 = vadd.f32 %v8401_v58, %v4953_v57  ;;  %v5673_v3 = vld [vmem:[%s6599_s22 + $0x70] sm:$0xff]   ;;  %v5658_v57 = vunpack.c.l.bf16 %v5674_v15 }
 0x401   : > { %v5127_v16 = vmax.f32 %v5095_v47, 0.0  ;;  %v5096_v4 = vadd.f32 %v5635_v48, %v4962_v18 }
 0x402   : > { %v5125_v29 = vmax.f32 %v5093_v30, 0.0  ;;  %v5094_v10 = vadd.f32 %v5631_v6, %v4954_v37 }
 0x403   : > { %v5582_v62 = vpack.c.bf16 %v5127_v16, %v5127_v16  ;;  %v5128_v13 = vmax.f32 %v5096_v4, 0.0  ;;  %v5654_v16 = vunpack.c.l.bf16 %v5673_v3 }
 0x404   : > { %v5580_v56 = vpack.c.bf16 %v5125_v29, %v5125_v29  ;;  %v5126_v32 = vmax.f32 %v5094_v10, 0.0  ;;  %v6308_v50 = vpop.f32.mrb[164].mxu0  ;;  %v5659_v10 = vunpack.c.h.bf16 %v5674_v15 }
 0x405   : > { %5288 = vst.msk [vmem:[%s8414_s13 + $0x48] sm:$0xf] %vm5269_vm2, %v5582_v62  ;;  %v5583_v7 = vpack.c.bf16 %v5128_v13, %v5128_v13  ;;  %v4975_v36 = vadd.f32 %v6308_v50, %v8401_v58  ;;  %v4966_v33 = vpop.f32.mrb[165].mxu0 }
 0x406   : > { %5286 = vst.msk [vmem:[%s8414_s13 + $0x40] sm:$0xf] %vm5269_vm2, %v5580_v56  ;;  %v5581_v38 = vpack.c.bf16 %v5126_v32, %v5126_v32  ;;  %v4967_v8 = vadd.f32 %v8401_v58, %v4966_v33  ;;  %v6309_v53 = vpop.f32.mrb[166].mxu0  ;;  %v5655_v56 = vunpack.c.h.bf16 %v5673_v3 }
 0x407   : > { %5289 = vst.msk [vmem:[%s8414_s13 + $0x4c] sm:$0xf] %vm5269_vm2, %v5583_v7  ;;  %v5099_v1 = vadd.f32 %v5642_v19, %v4975_v36  ;;  %v4978_v9 = vadd.f32 %v6309_v53, %v8401_v58  ;;  %v4969_v44 = vpop.f32.mrb[167].mxu0 }
 0x408   : > { %5287 = vst.msk [vmem:[%s8414_s13 + $0x44] sm:$0xf] %vm5269_vm2, %v5581_v38  ;;  %v5097_v22 = vadd.f32 %v5638_v41, %v4967_v8  ;;  %v4970_v61 = vadd.f32 %v8401_v58, %v4969_v44 }
 0x409   : > { %v5131_v24 = vmax.f32 %v5099_v1, 0.0  ;;  %v5100_v63 = vadd.f32 %v5643_v43, %v4978_v9 }
 0x40a   : > { %v5129_v52 = vmax.f32 %v5097_v22, 0.0  ;;  %v5098_v31 = vadd.f32 %v5639_v26, %v4970_v61 }
 0x40b   : > { %v5586_v51 = vpack.c.bf16 %v5131_v24, %v5131_v24  ;;  %v5132_v54 = vmax.f32 %v5100_v63, 0.0 }
 0x40c   : > { %v5584_v35 = vpack.c.bf16 %v5129_v52, %v5129_v52  ;;  %v5130_v60 = vmax.f32 %v5098_v31, 0.0  ;;  %v6312_v12 = vpop.f32.mrb[168].mxu0 }
 0x40d   : > { %5292 = vst.msk [vmem:[%s8414_s13 + $0x58] sm:$0xf] %vm5269_vm2, %v5586_v51  ;;  %v5587_v34 = vpack.c.bf16 %v5132_v54, %v5132_v54  ;;  %v4991_v39 = vadd.f32 %v6312_v12, %v8401_v58  ;;  %v4982_v40 = vpop.f32.mrb[169].mxu0 }
 0x40e   : > { %5290 = vst.msk [vmem:[%s8414_s13 + $0x50] sm:$0xf] %vm5269_vm2, %v5584_v35  ;;  %v5585_v14 = vpack.c.bf16 %v5130_v60, %v5130_v60  ;;  %v4983_v2 = vadd.f32 %v8401_v58, %v4982_v40  ;;  %v6313_v46 = vpop.f32.mrb[170].mxu0 }
 0x40f   : > { %5293 = vst.msk [vmem:[%s8414_s13 + $0x5c] sm:$0xf] %vm5269_vm2, %v5587_v34  ;;  %v5103_v0 = vadd.f32 %v5650_v21, %v4991_v39  ;;  %v4994_v49 = vadd.f32 %v6313_v46, %v8401_v58  ;;  %v4985_v20 = vpop.f32.mrb[171].mxu0 }
 0x410   : > { %5291 = vst.msk [vmem:[%s8414_s13 + $0x54] sm:$0xf] %vm5269_vm2, %v5585_v14  ;;  %v5101_v5 = vadd.f32 %v5646_v28, %v4983_v2  ;;  %v4986_v42 = vadd.f32 %v8401_v58, %v4985_v20 }
 0x411   : > { %v5135_v48 = vmax.f32 %v5103_v0, 0.0  ;;  %v5104_v17 = vadd.f32 %v5651_v27, %v4994_v49 }
 0x412   : > { %v5133_v25 = vmax.f32 %v5101_v5, 0.0  ;;  %v5102_v6 = vadd.f32 %v5647_v59, %v4986_v42 }
 0x413   : > { %v5590_v47 = vpack.c.bf16 %v5135_v48, %v5135_v48  ;;  %v5136_v18 = vmax.f32 %v5104_v17, 0.0 }
 0x414   : > { %v5588_v30 = vpack.c.bf16 %v5133_v25, %v5133_v25  ;;  %v5134_v37 = vmax.f32 %v5102_v6, 0.0  ;;  %v6316_v45 = vpop.f32.mrb[172].mxu0 }
 0x415   : > { %5296 = vst.msk [vmem:[%s8414_s13 + $0x68] sm:$0xf] %vm5269_vm2, %v5590_v47  ;;  %v5591_v4 = vpack.c.bf16 %v5136_v18, %v5136_v18  ;;  %v5007_v11 = vadd.f32 %v6316_v45, %v8401_v58  ;;  %v4998_v29 = vpop.f32.mrb[173].mxu0 }
 0x416   : > { %5294 = vst.msk [vmem:[%s8414_s13 + $0x60] sm:$0xf] %vm5269_vm2, %v5588_v30  ;;  %v5589_v62 = vpack.c.bf16 %v5134_v37, %v5134_v37  ;;  %v4999_v13 = vadd.f32 %v8401_v58, %v4998_v29  ;;  %v6317_v19 = vpop.f32.mrb[174].mxu0 }
 0x417   : > { %5297 = vst.msk [vmem:[%s8414_s13 + $0x6c] sm:$0xf] %vm5269_vm2, %v5591_v4  ;;  %v5107_v32 = vadd.f32 %v5658_v57, %v5007_v11  ;;  %v5010_v50 = vadd.f32 %v6317_v19, %v8401_v58  ;;  %v5001_v41 = vpop.f32.mrb[175].mxu0 }
 0x418   : > { %5295 = vst.msk [vmem:[%s8414_s13 + $0x64] sm:$0xf] %vm5269_vm2, %v5589_v62  ;;  %v5105_v7 = vadd.f32 %v5654_v16, %v4999_v13  ;;  %v5002_v36 = vadd.f32 %v8401_v58, %v5001_v41 }
 0x419   : > { %v5139_v33 = vmax.f32 %v5107_v32, 0.0  ;;  %v5108_v43 = vadd.f32 %v5659_v10, %v5010_v50 }
 0x41a   : > { %v5137_v38 = vmax.f32 %v5105_v7, 0.0  ;;  %v5106_v8 = vadd.f32 %v5655_v56, %v5002_v36 }
 0x41b   : > { %v5594_v53 = vpack.c.bf16 %v5139_v33, %v5139_v33  ;;  %v5140_v26 = vmax.f32 %v5108_v43, 0.0 }
 0x41c   : > { %v5592_v1 = vpack.c.bf16 %v5137_v38, %v5137_v38  ;;  %v5138_v9 = vmax.f32 %v5106_v8, 0.0 }
 0x41d   : > { %5300 = vst.msk [vmem:[%s8414_s13 + $0x78] sm:$0xf] %vm5269_vm2, %v5594_v53  ;;  %v5595_v44 = vpack.c.bf16 %v5140_v26, %v5140_v26 }
 0x41e   : > { %5298 = vst.msk [vmem:[%s8414_s13 + $0x70] sm:$0xf] %vm5269_vm2, %v5592_v1  ;;  %v5593_v22 = vpack.c.bf16 %v5138_v9, %v5138_v9 }
 0x41f   : > { %5301 = vst.msk [vmem:[%s8414_s13 + $0x7c] sm:$0xf] %vm5269_vm2, %v5595_v44 }
 0x420   : > { %5299 = vst.msk [vmem:[%s8414_s13 + $0x74] sm:$0xf] %vm5269_vm2, %v5593_v22 }
 0x421 PF: > { %s18_s24 = sadd.s32 1, %s6497_s24  }
 0x422   : > { %p15_p3 = scmp.ge.s32.totalorder %s18_s24, 4  }
 0x424   :  { %17 = sbr.rel (!%p15_p3) target bundleno = 1 (0x1), region = 83 }
 0x42b   :  { %5323 = vsyncpa [#allocation4], 1 }
 0x42c   :  { %5325 = vsyncpa [#allocation4 + $0x1], 1 }

</bundles_post_ra>
